<compile_context>
chip_gen: v5e
topology: v5e:2x2
jax: 0.10.0
libtpu: 0.0.40
codegen_flags: <defaults>
</compile_context>

<pallas_src>
import jax
import jax.numpy as jnp
from jax import lax
from jax.experimental import pallas as pl
from jax.experimental.pallas import tpu as pltpu

KH = KW = 3  # 3x3 convolution, stride=1, padding=1


def _conv3x3_mfm(pad_ref, w_ref, b_ref, H, W, C):
    """3x3 'same' conv (+bias) + max-feature-map from a padded VMEM scratch.

    pad_ref: (H+2, W+2, C) zero-halo activation in VMEM.
    w_ref  : (9*C, 2*C)    weights with the 9 taps folded into K.
    Returns the MFM result as an (H*W, C) f32 value.
    """
    # im2col patch: 9 shifted windows concatenated along the channel (lane)
    # axis; (kh, kw, c) order matches the wrapper-side weight reshape.
    taps = [
        pad_ref[kh:kh + H, kw:kw + W, :]
        for kh in range(KH)
        for kw in range(KW)
    ]
    patch = jnp.concatenate(taps, axis=-1)             # (H, W, 9*C)
    patch = patch.reshape(H * W, KH * KW * C)          # leading-dim merge only
    y = jnp.dot(patch, w_ref[...],                     # single MXU dot, K=9*C
                preferred_element_type=jnp.float32)    # (H*W, 2*C)
    y = y + b_ref[0]
    return jnp.maximum(y[:, :C], y[:, C:])             # MFM: max of halves


def resblock_kernel(x_ref, w1_ref, b1_ref, w2_ref, b2_ref, o_ref, pad_ref):
    # x_ref  : (1, H, W, C)   unpadded NHWC input tile (one batch element)
    # w*_ref : (9*C, 2*C)     conv weights, taps folded into the contraction
    # b*_ref : (1, 2*C)       conv bias
    # o_ref  : (1, H, W, C)   NHWC output tile
    # pad_ref: (H+2, W+2, C)  VMEM scratch reused for both padded activations
    _, H, W, C = o_ref.shape
    Hp, Wp = H + 2, W + 2

    # Zero only the 1-wide halo each step (the interior is fully overwritten
    # below).  Cheap, and correct even when the batch axis is sharded across
    # TensorCores (scratch state is per-core, so no program_id==0 trick).
    pad_ref[0:1, :, :] = jnp.zeros((1, Wp, C), jnp.float32)
    pad_ref[Hp - 1:Hp, :, :] = jnp.zeros((1, Wp, C), jnp.float32)
    pad_ref[:, 0:1, :] = jnp.zeros((Hp, 1, C), jnp.float32)
    pad_ref[:, Wp - 1:Wp, :] = jnp.zeros((Hp, 1, C), jnp.float32)

    # ---------------- conv1 (3x3, pad=1) + MFM ----------------
    x = x_ref[0]                                       # (H, W, C); reused below
    pad_ref[1:H + 1, 1:W + 1, :] = x
    m1 = _conv3x3_mfm(pad_ref, w1_ref, b1_ref, H, W, C)

    # ---------------- conv2 (3x3, pad=1) + MFM ----------------
    # Reuse the same scratch: halo is already zero, only the interior changes.
    pad_ref[1:H + 1, 1:W + 1, :] = m1.reshape(H, W, C)
    m2 = _conv3x3_mfm(pad_ref, w2_ref, b2_ref, H, W, C)

    # ---------------- residual add (reuse the loaded x tile) ----------------
    o_ref[0] = m2.reshape(H, W, C) + x


def resblock_pallas(x_nchw, w1_hwio, b1, w2_hwio, b2):
    """x_nchw: (N, C, H, W) f32. Weights HWIO (3,3,C,2C), biases (2C,)."""
    N, C, H, W = x_nchw.shape
    assert w1_hwio.shape == (KH, KW, C, 2 * C), "residual needs in_ch == out_ch"
    assert w2_hwio.shape == (KH, KW, C, 2 * C)

    x = jnp.transpose(x_nchw, (0, 2, 3, 1))            # NHWC; no padded HBM copy
    # Fold the 9 taps into the contraction: (3,3,C,2C) -> (9C, 2C),
    # row index = (kh*3 + kw)*C + c, matching the in-kernel patch concat order.
    w1f = w1_hwio.reshape(KH * KW * C, 2 * C)
    w2f = w2_hwio.reshape(KH * KW * C, 2 * C)
    b1r = b1.reshape(1, 2 * C)
    b2r = b2.reshape(1, 2 * C)

    out_nhwc = pl.pallas_call(
        resblock_kernel,
        out_shape=jax.ShapeDtypeStruct((N, H, W, C), jnp.float32),
        grid_spec=pltpu.PrefetchScalarGridSpec(
            num_scalar_prefetch=0,
            grid=(N,),
            in_specs=[
                pl.BlockSpec((1, H, W, C), lambda n: (n, 0, 0, 0)),
                pl.BlockSpec((KH * KW * C, 2 * C), lambda n: (0, 0)),
                pl.BlockSpec((1, 2 * C), lambda n: (0, 0)),
                pl.BlockSpec((KH * KW * C, 2 * C), lambda n: (0, 0)),
                pl.BlockSpec((1, 2 * C), lambda n: (0, 0)),
            ],
            out_specs=pl.BlockSpec((1, H, W, C), lambda n: (n, 0, 0, 0)),
            scratch_shapes=[pltpu.VMEM((H + 2, W + 2, C), jnp.float32)],
        ),
        compiler_params=pltpu.CompilerParams(
            dimension_semantics=("parallel",),          # v7x: 2 TCs split batch
            vmem_limit_bytes=32 * 1024 * 1024,
        ),
    )(x, w1f, b1r, w2f, b2r)

    return jnp.transpose(out_nhwc, (0, 3, 1, 2))        # back to NCHW


# ---------------- pure-JAX reference (correctness check) ----------------
def _conv_ref(x_nhwc, w_hwio, b):
    y = lax.conv_general_dilated(
        x_nhwc, w_hwio, window_strides=(1, 1), padding="SAME",
        dimension_numbers=("NHWC", "HWIO", "NHWC"))
    return y + b


def resblock_ref(x_nchw, w1, b1, w2, b2):
    C = x_nchw.shape[1]
    x = jnp.transpose(x_nchw, (0, 2, 3, 1))
    y = _conv_ref(x, w1, b1)
    y = jnp.maximum(y[..., :C], y[..., C:])
    z = _conv_ref(y, w2, b2)
    z = jnp.maximum(z[..., :C], z[..., C:])
    return jnp.transpose(z + x, (0, 3, 1, 2))


if __name__ == "__main__":
    # small shapes consistent with the module (residual => in_ch == out_ch)
    N, C, H, W = 2, 8, 16, 16

    key = jax.random.PRNGKey(0)
    kx, kw1, kb1, kw2, kb2 = jax.random.split(key, 5)
    x = jax.random.normal(kx, (N, C, H, W), jnp.float32)
    # deterministic synthetic parameters (HWIO layout, 2C output channels)
    w1 = 0.1 * jax.random.normal(kw1, (KH, KW, C, 2 * C), jnp.float32)
    b1 = 0.1 * jax.random.normal(kb1, (2 * C,), jnp.float32)
    w2 = 0.1 * jax.random.normal(kw2, (KH, KW, C, 2 * C), jnp.float32)
    b2 = 0.1 * jax.random.normal(kb2, (2 * C,), jnp.float32)

    out = jax.block_until_ready(resblock_pallas(x, w1, b1, w2, b2))
    ref = jax.block_until_ready(resblock_ref(x, w1, b1, w2, b2))

    assert out.shape == (N, C, H, W) and out.dtype == jnp.float32
    assert jnp.allclose(out, ref, rtol=1e-4, atol=1e-4), "mismatch vs reference"
    print("KERNEL_OK")
</pallas_src>

<mosaic_0001>
module attributes {stable_mosaic.version = 11 : i64} {
  func.func @resblock_kernel(%arg0: i32, %arg1: memref<1x16x16x8xf32, #tpu.memory_space<vmem>>, %arg2: memref<72x16xf32, #tpu.memory_space<vmem>>, %arg3: memref<1x16xf32, #tpu.memory_space<vmem>>, %arg4: memref<72x16xf32, #tpu.memory_space<vmem>>, %arg5: memref<1x16xf32, #tpu.memory_space<vmem>>, %arg6: memref<1x16x16x8xf32, #tpu.memory_space<vmem>>, %arg7: memref<18x18x8xf32, #tpu.memory_space<vmem>>) attributes {dimension_semantics = [#tpu.dimension_semantics<parallel>], iteration_bounds = array<i64: 2>, scalar_prefetch = 0 : i64, scratch_operands = 1 : i64, tpu.core_type = #tpu.core_type<tc>, window_params = [{transform_indices = @transform_0, window_bounds = array<i64: 1, 16, 16, 8>}, {pipeline_mode = #tpu.pipeline_mode<synchronous>, transform_indices = @transform_1, window_bounds = array<i64: 72, 16>}, {pipeline_mode = #tpu.pipeline_mode<synchronous>, transform_indices = @transform_2, window_bounds = array<i64: 1, 16>}, {pipeline_mode = #tpu.pipeline_mode<synchronous>, transform_indices = @transform_3, window_bounds = array<i64: 72, 16>}, {pipeline_mode = #tpu.pipeline_mode<synchronous>, transform_indices = @transform_4, window_bounds = array<i64: 1, 16>}, {transform_indices = @transform_5, window_bounds = array<i64: 1, 16, 16, 8>}]} {
    %cst = arith.constant 0.000000e+00 : f32
    %0 = vector.broadcast %cst : f32 to vector<1x18x8xf32>
    %c0 = arith.constant 0 : index
    %c0_0 = arith.constant 0 : index
    %c0_1 = arith.constant 0 : index
    %1 = vector.load %arg7[%c0, %c0_0, %c0_1] : memref<18x18x8xf32, #tpu.memory_space<vmem>>, vector<1x18x8xf32>
    tpu.vector_store %arg7[%c0, %c0_0, %c0_1], %0 {strides = array<i32>} : memref<18x18x8xf32, #tpu.memory_space<vmem>>, vector<1x18x8xf32>,
    %cst_2 = arith.constant 0.000000e+00 : f32
    %2 = vector.broadcast %cst_2 : f32 to vector<1x18x8xf32>
    %c17 = arith.constant 17 : index
    %c0_3 = arith.constant 0 : index
    %c0_4 = arith.constant 0 : index
    %3 = vector.load %arg7[%c17, %c0_3, %c0_4] : memref<18x18x8xf32, #tpu.memory_space<vmem>>, vector<1x18x8xf32>
    tpu.vector_store %arg7[%c17, %c0_3, %c0_4], %2 {strides = array<i32>} : memref<18x18x8xf32, #tpu.memory_space<vmem>>, vector<1x18x8xf32>,
    %cst_5 = arith.constant 0.000000e+00 : f32
    %4 = vector.broadcast %cst_5 : f32 to vector<18x1x8xf32>
    %c0_6 = arith.constant 0 : index
    %c0_7 = arith.constant 0 : index
    %c0_8 = arith.constant 0 : index
    %5 = vector.load %arg7[%c0_6, %c0_7, %c0_8] : memref<18x18x8xf32, #tpu.memory_space<vmem>>, vector<18x1x8xf32>
    tpu.vector_store %arg7[%c0_6, %c0_7, %c0_8], %4 {strides = array<i32>} : memref<18x18x8xf32, #tpu.memory_space<vmem>>, vector<18x1x8xf32>,
    %cst_9 = arith.constant 0.000000e+00 : f32
    %6 = vector.broadcast %cst_9 : f32 to vector<18x1x8xf32>
    %c0_10 = arith.constant 0 : index
    %c17_11 = arith.constant 17 : index
    %c0_12 = arith.constant 0 : index
    %7 = vector.load %arg7[%c0_10, %c17_11, %c0_12] : memref<18x18x8xf32, #tpu.memory_space<vmem>>, vector<18x1x8xf32>
    tpu.vector_store %arg7[%c0_10, %c17_11, %c0_12], %6 {strides = array<i32>} : memref<18x18x8xf32, #tpu.memory_space<vmem>>, vector<18x1x8xf32>,
    %c0_13 = arith.constant 0 : index
    %c0_14 = arith.constant 0 : index
    %c0_15 = arith.constant 0 : index
    %c0_16 = arith.constant 0 : index
    %8 = vector.load %arg1[%c0_13, %c0_14, %c0_15, %c0_16] : memref<1x16x16x8xf32, #tpu.memory_space<vmem>>, vector<1x16x16x8xf32>
    %9 = vector.shape_cast %8 : vector<1x16x16x8xf32> to vector<16x16x8xf32>
    %c1 = arith.constant 1 : index
    %c1_17 = arith.constant 1 : index
    %c0_18 = arith.constant 0 : index
    %10 = vector.load %arg7[%c1, %c1_17, %c0_18] : memref<18x18x8xf32, #tpu.memory_space<vmem>>, vector<16x16x8xf32>
    tpu.vector_store %arg7[%c1, %c1_17, %c0_18], %9 {strides = array<i32>} : memref<18x18x8xf32, #tpu.memory_space<vmem>>, vector<16x16x8xf32>,
    %c0_19 = arith.constant 0 : index
    %c0_20 = arith.constant 0 : index
    %c0_21 = arith.constant 0 : index
    %11 = vector.load %arg7[%c0_19, %c0_20, %c0_21] : memref<18x18x8xf32, #tpu.memory_space<vmem>>, vector<16x16x8xf32>
    %c0_22 = arith.constant 0 : index
    %c1_23 = arith.constant 1 : index
    %c0_24 = arith.constant 0 : index
    %12 = vector.load %arg7[%c0_22, %c1_23, %c0_24] : memref<18x18x8xf32, #tpu.memory_space<vmem>>, vector<16x16x8xf32>
    %c0_25 = arith.constant 0 : index
    %c2 = arith.constant 2 : index
    %c0_26 = arith.constant 0 : index
    %13 = vector.load %arg7[%c0_25, %c2, %c0_26] : memref<18x18x8xf32, #tpu.memory_space<vmem>>, vector<16x16x8xf32>
    %c1_27 = arith.constant 1 : index
    %c0_28 = arith.constant 0 : index
    %c0_29 = arith.constant 0 : index
    %14 = vector.load %arg7[%c1_27, %c0_28, %c0_29] : memref<18x18x8xf32, #tpu.memory_space<vmem>>, vector<16x16x8xf32>
    %c1_30 = arith.constant 1 : index
    %c1_31 = arith.constant 1 : index
    %c0_32 = arith.constant 0 : index
    %15 = vector.load %arg7[%c1_30, %c1_31, %c0_32] : memref<18x18x8xf32, #tpu.memory_space<vmem>>, vector<16x16x8xf32>
    %c1_33 = arith.constant 1 : index
    %c2_34 = arith.constant 2 : index
    %c0_35 = arith.constant 0 : index
    %16 = vector.load %arg7[%c1_33, %c2_34, %c0_35] : memref<18x18x8xf32, #tpu.memory_space<vmem>>, vector<16x16x8xf32>
    %c2_36 = arith.constant 2 : index
    %c0_37 = arith.constant 0 : index
    %c0_38 = arith.constant 0 : index
    %17 = vector.load %arg7[%c2_36, %c0_37, %c0_38] : memref<18x18x8xf32, #tpu.memory_space<vmem>>, vector<16x16x8xf32>
    %c2_39 = arith.constant 2 : index
    %c1_40 = arith.constant 1 : index
    %c0_41 = arith.constant 0 : index
    %18 = vector.load %arg7[%c2_39, %c1_40, %c0_41] : memref<18x18x8xf32, #tpu.memory_space<vmem>>, vector<16x16x8xf32>
    %c2_42 = arith.constant 2 : index
    %c2_43 = arith.constant 2 : index
    %c0_44 = arith.constant 0 : index
    %19 = vector.load %arg7[%c2_42, %c2_43, %c0_44] : memref<18x18x8xf32, #tpu.memory_space<vmem>>, vector<16x16x8xf32>
    %20 = tpu.concatenate %11, %12, %13, %14, %15, %16, %17, %18, %19 in 2 : vector<16x16x8xf32>, vector<16x16x8xf32>, vector<16x16x8xf32>, vector<16x16x8xf32>, vector<16x16x8xf32>, vector<16x16x8xf32>, vector<16x16x8xf32>, vector<16x16x8xf32>, vector<16x16x8xf32> -> vector<16x16x72xf32>
    %21 = vector.shape_cast %20 : vector<16x16x72xf32> to vector<256x72xf32>
    %c0_45 = arith.constant 0 : index
    %c0_46 = arith.constant 0 : index
    %22 = vector.load %arg2[%c0_45, %c0_46] : memref<72x16xf32, #tpu.memory_space<vmem>>, vector<72x16xf32>
    %cst_47 = arith.constant dense<0.000000e+00> : vector<256x16xf32>
    %23 = tpu.matmul %21, %22, %cst_47 {dimension_numbers = #tpu.dot_dimension_numbers<[1], [0], [0], [1], [0, 0, 1, 1], [], []>} : vector<256x72xf32>, vector<72x16xf32>, vector<256x16xf32> -> vector<256x16xf32>
    %c0_48 = arith.constant 0 : index
    %c0_49 = arith.constant 0 : index
    %24 = vector.load %arg3[%c0_48, %c0_49] : memref<1x16xf32, #tpu.memory_space<vmem>>, vector<1x16xf32>
    %25 = vector.shape_cast %24 : vector<1x16xf32> to vector<16xf32>
    %26 = vector.shape_cast %25 : vector<16xf32> to vector<1x16xf32>
    %27 = vector.broadcast %26 : vector<1x16xf32> to vector<256x16xf32>
    %28 = arith.addf %23, %27 : vector<256x16xf32>
    %29 = vector.extract_strided_slice %28 {offsets = [0, 0], sizes = [256, 8], strides = [1, 1]} : vector<256x16xf32> to vector<256x8xf32>
    %30 = vector.extract_strided_slice %28 {offsets = [0, 8], sizes = [256, 8], strides = [1, 1]} : vector<256x16xf32> to vector<256x8xf32>
    %31 = arith.maximumf %29, %30 : vector<256x8xf32>
    %32 = vector.shape_cast %31 : vector<256x8xf32> to vector<16x16x8xf32>
    %c1_50 = arith.constant 1 : index
    %c1_51 = arith.constant 1 : index
    %c0_52 = arith.constant 0 : index
    %33 = vector.load %arg7[%c1_50, %c1_51, %c0_52] : memref<18x18x8xf32, #tpu.memory_space<vmem>>, vector<16x16x8xf32>
    tpu.vector_store %arg7[%c1_50, %c1_51, %c0_52], %32 {strides = array<i32>} : memref<18x18x8xf32, #tpu.memory_space<vmem>>, vector<16x16x8xf32>,
    %c0_53 = arith.constant 0 : index
    %c0_54 = arith.constant 0 : index
    %c0_55 = arith.constant 0 : index
    %34 = vector.load %arg7[%c0_53, %c0_54, %c0_55] : memref<18x18x8xf32, #tpu.memory_space<vmem>>, vector<16x16x8xf32>
    %c0_56 = arith.constant 0 : index
    %c1_57 = arith.constant 1 : index
    %c0_58 = arith.constant 0 : index
    %35 = vector.load %arg7[%c0_56, %c1_57, %c0_58] : memref<18x18x8xf32, #tpu.memory_space<vmem>>, vector<16x16x8xf32>
    %c0_59 = arith.constant 0 : index
    %c2_60 = arith.constant 2 : index
    %c0_61 = arith.constant 0 : index
    %36 = vector.load %arg7[%c0_59, %c2_60, %c0_61] : memref<18x18x8xf32, #tpu.memory_space<vmem>>, vector<16x16x8xf32>
    %c1_62 = arith.constant 1 : index
    %c0_63 = arith.constant 0 : index
    %c0_64 = arith.constant 0 : index
    %37 = vector.load %arg7[%c1_62, %c0_63, %c0_64] : memref<18x18x8xf32, #tpu.memory_space<vmem>>, vector<16x16x8xf32>
    %c1_65 = arith.constant 1 : index
    %c1_66 = arith.constant 1 : index
    %c0_67 = arith.constant 0 : index
    %38 = vector.load %arg7[%c1_65, %c1_66, %c0_67] : memref<18x18x8xf32, #tpu.memory_space<vmem>>, vector<16x16x8xf32>
    %c1_68 = arith.constant 1 : index
    %c2_69 = arith.constant 2 : index
    %c0_70 = arith.constant 0 : index
    %39 = vector.load %arg7[%c1_68, %c2_69, %c0_70] : memref<18x18x8xf32, #tpu.memory_space<vmem>>, vector<16x16x8xf32>
    %c2_71 = arith.constant 2 : index
    %c0_72 = arith.constant 0 : index
    %c0_73 = arith.constant 0 : index
    %40 = vector.load %arg7[%c2_71, %c0_72, %c0_73] : memref<18x18x8xf32, #tpu.memory_space<vmem>>, vector<16x16x8xf32>
    %c2_74 = arith.constant 2 : index
    %c1_75 = arith.constant 1 : index
    %c0_76 = arith.constant 0 : index
    %41 = vector.load %arg7[%c2_74, %c1_75, %c0_76] : memref<18x18x8xf32, #tpu.memory_space<vmem>>, vector<16x16x8xf32>
    %c2_77 = arith.constant 2 : index
    %c2_78 = arith.constant 2 : index
    %c0_79 = arith.constant 0 : index
    %42 = vector.load %arg7[%c2_77, %c2_78, %c0_79] : memref<18x18x8xf32, #tpu.memory_space<vmem>>, vector<16x16x8xf32>
    %43 = tpu.concatenate %34, %35, %36, %37, %38, %39, %40, %41, %42 in 2 : vector<16x16x8xf32>, vector<16x16x8xf32>, vector<16x16x8xf32>, vector<16x16x8xf32>, vector<16x16x8xf32>, vector<16x16x8xf32>, vector<16x16x8xf32>, vector<16x16x8xf32>, vector<16x16x8xf32> -> vector<16x16x72xf32>
    %44 = vector.shape_cast %43 : vector<16x16x72xf32> to vector<256x72xf32>
    %c0_80 = arith.constant 0 : index
    %c0_81 = arith.constant 0 : index
    %45 = vector.load %arg4[%c0_80, %c0_81] : memref<72x16xf32, #tpu.memory_space<vmem>>, vector<72x16xf32>
    %cst_82 = arith.constant dense<0.000000e+00> : vector<256x16xf32>
    %46 = tpu.matmul %44, %45, %cst_82 {dimension_numbers = #tpu.dot_dimension_numbers<[1], [0], [0], [1], [0, 0, 1, 1], [], []>} : vector<256x72xf32>, vector<72x16xf32>, vector<256x16xf32> -> vector<256x16xf32>
    %c0_83 = arith.constant 0 : index
    %c0_84 = arith.constant 0 : index
    %47 = vector.load %arg5[%c0_83, %c0_84] : memref<1x16xf32, #tpu.memory_space<vmem>>, vector<1x16xf32>
    %48 = vector.shape_cast %47 : vector<1x16xf32> to vector<16xf32>
    %49 = vector.shape_cast %48 : vector<16xf32> to vector<1x16xf32>
    %50 = vector.broadcast %49 : vector<1x16xf32> to vector<256x16xf32>
    %51 = arith.addf %46, %50 : vector<256x16xf32>
    %52 = vector.extract_strided_slice %51 {offsets = [0, 0], sizes = [256, 8], strides = [1, 1]} : vector<256x16xf32> to vector<256x8xf32>
    %53 = vector.extract_strided_slice %51 {offsets = [0, 8], sizes = [256, 8], strides = [1, 1]} : vector<256x16xf32> to vector<256x8xf32>
    %54 = arith.maximumf %52, %53 : vector<256x8xf32>
    %55 = vector.shape_cast %54 : vector<256x8xf32> to vector<16x16x8xf32>
    %56 = arith.addf %55, %9 : vector<16x16x8xf32>
    %c0_85 = arith.constant 0 : index
    %c0_86 = arith.constant 0 : index
    %c0_87 = arith.constant 0 : index
    %c0_88 = arith.constant 0 : index
    %57 = vector.load %arg6[%c0_85, %c0_86, %c0_87, %c0_88] : memref<1x16x16x8xf32, #tpu.memory_space<vmem>>, vector<1x16x16x8xf32>
    %58 = vector.shape_cast %57 : vector<1x16x16x8xf32> to vector<16x16x8xf32>
    %59 = vector.shape_cast %56 : vector<16x16x8xf32> to vector<1x16x16x8xf32>
    tpu.vector_store %arg6[%c0_85, %c0_86, %c0_87, %c0_88], %59 {strides = array<i32>} : memref<1x16x16x8xf32, #tpu.memory_space<vmem>>, vector<1x16x16x8xf32>,
    return
  }
  func.func @transform_0(%arg0: i32) -> (i32, i32, i32, i32) {
    %c0_i32 = arith.constant 0 : i32
    %c0_i32_0 = arith.constant 0 : i32
    %c0_i32_1 = arith.constant 0 : i32
    %c0_i32_2 = arith.constant 0 : i32
    return %arg0, %c0_i32, %c0_i32_0, %c0_i32_1 : i32, i32, i32, i32
  }
  func.func @transform_1(%arg0: i32) -> (i32, i32) {
    %c0_i32 = arith.constant 0 : i32
    %c0_i32_0 = arith.constant 0 : i32
    %c0_i32_1 = arith.constant 0 : i32
    return %c0_i32, %c0_i32_0 : i32, i32
  }
  func.func @transform_2(%arg0: i32) -> (i32, i32) {
    %c0_i32 = arith.constant 0 : i32
    %c0_i32_0 = arith.constant 0 : i32
    %c0_i32_1 = arith.constant 0 : i32
    return %c0_i32, %c0_i32_0 : i32, i32
  }
  func.func @transform_3(%arg0: i32) -> (i32, i32) {
    %c0_i32 = arith.constant 0 : i32
    %c0_i32_0 = arith.constant 0 : i32
    %c0_i32_1 = arith.constant 0 : i32
    return %c0_i32, %c0_i32_0 : i32, i32
  }
  func.func @transform_4(%arg0: i32) -> (i32, i32) {
    %c0_i32 = arith.constant 0 : i32
    %c0_i32_0 = arith.constant 0 : i32
    %c0_i32_1 = arith.constant 0 : i32
    return %c0_i32, %c0_i32_0 : i32, i32
  }
  func.func @transform_5(%arg0: i32) -> (i32, i32, i32, i32) {
    %c0_i32 = arith.constant 0 : i32
    %c0_i32_0 = arith.constant 0 : i32
    %c0_i32_1 = arith.constant 0 : i32
    %c0_i32_2 = arith.constant 0 : i32
    return %arg0, %c0_i32, %c0_i32_0, %c0_i32_1 : i32, i32, i32, i32
  }
}

</mosaic_0001>

<bundles_post_ra>
// kernel: tpu_custom_call.1
= control target key start
LH: loop header
LB: loop body
LE: loop exit
PB: predicated region body
PF: predicated region fallthrough
CT: control target
= control target key end

     0   :  { %s4610_s18 = smov 0   ;;  %s8493_s0 = inlined_call_operand.vmem [shape: f32[2,16,16,8], index: 0, kind: input, shape index: {}]   ;;  %s8494_s1 = inlined_call_operand.vmem [shape: f32[72,16], index: 1, kind: input, shape index: {}]   ;;  %s8495_s2 = inlined_call_operand.vmem [shape: f32[1,16], index: 2, kind: input, shape index: {}]   ;;  %s8496_s3 = inlined_call_operand.vmem [shape: f32[72,16], index: 3, kind: input, shape index: {}]   ;;  %s8497_s4 = inlined_call_operand.vmem [shape: f32[1,16], index: 4, kind: input, shape index: {}]   ;;  %s8498_s5 = inlined_call_operand.vmem [shape: f32[2,16,16,8], index: 5, kind: output, shape index: {}]  }
   0x1 LB: > { %s4396_s19 = sadd.s32 4294967295, %s4568_s18   ;;  %p4400_p0 = scmp.ge.s32.totalorder %s4568_s18, 1  ;;  %s4568_s18 = sphi %s4610_s18, %s15_s18  }
   0x2   : > { %p187_p1 = scmp.lt.s32.totalorder %s4568_s18, 3 }
   0x4   : > { %p188_p2 = pnand %p4400_p0, %p187_p1 }
   0x6   : > { %191 = sbr.rel (%p188_p2) target bundleno = 2140 (0x85c), region = 40 }
   0xb   : > { %vm225_vm0 = vcmask 64512   ;;  %p215_p3 = scmp.lt.s32.totalorder %s4396_s19, 1  ;;  %v4570_v0 = vmov 0.0   ;;  %vm228_vm1 = vcmask 58368   ;;  %s4571_s24 = smov 8   ;;  %vm234_vm2 = vcmask 57344  }
   0xc   : > { %226 = vst.msk [vmem:[#allocation2] sm:$0xff] %vm225_vm0, %v4570_v0  ;;  %s4572_s25 = smov 16   ;;  %s4573_s26 = smov 24   ;;  %vm1681_vm3 = vcmask 130048   ;;  %vm1714_vm4 = vcmask 195584   ;;  %vm1780_vm5 = vcmask 326656  }
   0xd   : > { %227 = vst.msk [vmem:[#allocation2 + $0x8] sm:$0xff] %vm225_vm0, %v4570_v0  ;;  %s9296_s19 = smov (!%p215_p3, %s4396_s19), 1  ;;  %s4574_s27 = smov 32   ;;  %vm1747_vm6 = vcmask 261120   ;;  %vm1813_vm7 = vcmask 392192   ;;  %vm1879_vm8 = vcmask 523264  }
   0xe   : > { %231 = vst.msk [vmem:[#allocation2 + $0x198] sm:$0xff] %vm225_vm0, %v4570_v0  ;;  %s4471_s20 = sshll.u32 %s9296_s19, 8  ;;  %s4575_s28 = smov 40   ;;  %vm1846_vm9 = vcmask 457728   ;;  %vm1925_vm10 = vcmask 588800  }
   0xf   : > { %232 = vst.msk [vmem:[#allocation2 + $0x1a0] sm:$0xff] %vm225_vm0, %v4570_v0  ;;  %s4634_s23 = scalar_lea.vmem %s8493_s0, %s4471_s20  ;;  %s4576_s29 = smov 48  }
  0x10   : > { %229 = vst.msk [vmem:[#allocation2 + $0x10] sm:$0x3] %vm228_vm1, %v4570_v0  ;;  %v4638_v1 = vld [vmem:[%s4634_s23 + $0x10] sm:$0xff]  ;;  %v4641_v2 = vld [vmem:[%s4634_s23] sm:$0xff]  ;;  %v4645_v3 = vld [vmem:[%s4634_s23 + $0x18] sm:$0xff]  ;;  %s4577_s30 = smov 56  }
  0x11   : > { %8579 = vst [vmem:[#allocation3_spill] sm:$0xff] %v4638_v1  ;;  %v4650_v4 = vld [vmem:[%s4634_s23 + $0x8] sm:$0xff]  ;;  %v4655_v5 = vld [vmem:[%s4634_s23 + $0x20] sm:$0xff]  ;;  %v4660_v7 = vld [vmem:[%s4634_s23 + $0x30] sm:$0xff]  ;;  %s4578_s6 = smov 64   ;;  %s4579_s13 = smov 120  }
  0x12   : > { %8580 = vst [vmem:[#allocation4_spill] sm:$0xff] %v4641_v2  ;;  %v4666_v8 = vld [vmem:[%s4634_s23 + $0x28] sm:$0xff]  ;;  %v4671_v9 = vld [vmem:[%s4634_s23 + $0x38] sm:$0xff]  ;;  %v4681_v11 = vld [vmem:[%s4634_s23 + $0x40] sm:$0xff] }
  0x13   : > { %233 = vst.msk [vmem:[#allocation2 + $0x1a8] sm:$0x3] %vm228_vm1, %v4570_v0  ;;  %v4676_v10 = vld [vmem:[%s4634_s23 + $0x48] sm:$0xff]  ;;  %v4688_v13 = vld [vmem:[%s4634_s23 + $0x50] sm:$0xff]  ;;  %v4697_v16 = vld [vmem:[%s4634_s23 + $0x60] sm:$0xff] }
  0x14   : > { %8581 = vst [vmem:[#allocation5_spill] sm:$0xff] %v4645_v3  ;;  %v368_v6 = vld [vmem:[#allocation2 + $0x1] sm:$0xff]  ;;  %v4704_v17 = vld [vmem:[%s4634_s23 + $0x58] sm:$0xff]  ;;  %v4720_v20 = vld [vmem:[%s4634_s23 + $0x70] sm:$0xff] }
  0x15   : > { %306 = vst.msk [vmem:[#allocation2 + $0x31] sm:$0xff] %vm225_vm0, %v4638_v1  ;;  %657 = vrot.lane.b32.xlu0 %v368_v6, %s4571_s24  ;;  %v4709_v18 = vld [vmem:[%s4634_s23 + $0x68] sm:$0xff]  ;;  %v4715_v19 = vld [vmem:[%s4634_s23 + $0x78] sm:$0xff]  ;;  %v4727_v22 = vld [vmem:[%s4634_s23 + $0x80] sm:$0xff] }
  0x16   : > { %8582 = vst [vmem:[#allocation6_spill] sm:$0xff] %v4650_v4  ;;  %v4742_v25 = vld [vmem:[%s4634_s23 + $0x90] sm:$0xff]  ;;  %v4745_v26 = vld [vmem:[%s4634_s23 + $0x88] sm:$0xff]  ;;  %v4754_v27 = vld [vmem:[%s4634_s23 + $0x98] sm:$0xff] }
  0x17   : > { %304 = vst.msk [vmem:[#allocation2 + $0x19] sm:$0xff] %vm225_vm0, %v4641_v2  ;;  %v369_v15 = vld [vmem:[#allocation2 + $0x9] sm:$0xff]  ;;  %v4772_v32 = vld [vmem:[%s4634_s23 + $0xa0] sm:$0xff]  ;;  %v4799_v38 = vld [vmem:[%s4634_s23 + $0xb8] sm:$0xff] }
  0x18   : > { %8583 = vst [vmem:[#allocation7_spill] sm:$0xff] %v4655_v5  ;;  %v4769_v31 = vld [vmem:[%s4634_s23 + $0xa8] sm:$0xff]  ;;  %v4781_v33 = vld [vmem:[%s4634_s23 + $0xb0] sm:$0xff]  ;;  %v4796_v37 = vld [vmem:[%s4634_s23 + $0xc0] sm:$0xff] }
  0x19   : > { %307 = vst.msk [vmem:[#allocation2 + $0x39] sm:$0xff] %vm225_vm0, %v4645_v3  ;;  %v4808_v39 = vld [vmem:[%s4634_s23 + $0xc8] sm:$0xff]  ;;  %v4823_v43 = vld [vmem:[%s4634_s23 + $0xd8] sm:$0xff]  ;;  %v4826_v44 = vld [vmem:[%s4634_s23 + $0xd0] sm:$0xff] }
  0x1a   : > { %8584 = vst [vmem:[#allocation8_spill] sm:$0xff] %v4660_v7  ;;  %v4835_v45 = vld [vmem:[%s4634_s23 + $0xe0] sm:$0xff]  ;;  %v4850_v49 = vld [vmem:[%s4634_s23 + $0xe8] sm:$0xff] }
  0x1b   : > { %305 = vst.msk [vmem:[#allocation2 + $0x21] sm:$0xff] %vm225_vm0, %v4650_v4  ;;  %v400_v62 = vld [vmem:[#allocation2 + $0x2] sm:$0xff] }
  0x1c   : > { %8585 = vst [vmem:[#allocation9_spill] sm:$0xff] %v4666_v8  ;;  %v4683_v12 = vld [vmem:[#allocation2 + $0x31] sm:$0xff] }
  0x1d   : > { %308 = vst.msk [vmem:[#allocation2 + $0x49] sm:$0xff] %vm225_vm0, %v4655_v5  ;;  %665 = vrot.lane.b32.xlu2 %v4683_v12, %s4571_s24  ;;  %659 = vrot.lane.b32.xlu0 %v369_v15, %s4571_s24 }
  0x1e   : > { %8586 = vst [vmem:[#allocation10_spill] sm:$0xff] %v4671_v9  ;;  %v4692_v14 = vld [vmem:[#allocation2 + $0x19] sm:$0xff] }
  0x1f   : > { %310 = vst.msk [vmem:[#allocation2 + $0x61] sm:$0xff] %vm225_vm0, %v4660_v7  ;;  %661 = vrot.lane.b32.xlu1 %v4692_v14, %s4571_s24 }
  0x20   : > { %8587 = vst [vmem:[#allocation11_spill] sm:$0xff] %v4676_v10  ;;  %v4722_v21 = vld [vmem:[#allocation2 + $0x39] sm:$0xff] }
  0x21   : > { %309 = vst.msk [vmem:[#allocation2 + $0x51] sm:$0xff] %vm225_vm0, %v4666_v8 }
  0x22   : > { %8588 = vst [vmem:[#allocation12_spill] sm:$0xff] %v4681_v11  ;;  %v4729_v23 = vld [vmem:[#allocation2 + $0x21] sm:$0xff] }
  0x23   : > { %311 = vst.msk [vmem:[#allocation2 + $0x69] sm:$0xff] %vm225_vm0, %v4671_v9 }
  0x24   : > { %8589 = vst [vmem:[#allocation13_spill] sm:$0xff] %v4688_v13  ;;  %v4737_v24 = vld [vmem:[#allocation2 + $0x49] sm:$0xff] }
  0x25   : > { %313 = vst.msk [vmem:[#allocation2 + $0x81] sm:$0xff] %vm225_vm0, %v4676_v10  ;;  %667 = vrot.lane.b32.xlu2 %v4722_v21, %s4571_s24  ;;  %669 = vrot.lane.b32.xlu0 %v4737_v24, %s4571_s24 }
  0x26   : > { %8590 = vst [vmem:[#allocation14_spill] sm:$0xff] %v4697_v16  ;;  %v4760_v28 = vld [vmem:[#allocation2 + $0x61] sm:$0xff] }
  0x27   : > { %312 = vst.msk [vmem:[#allocation2 + $0x79] sm:$0xff] %vm225_vm0, %v4681_v11  ;;  %663 = vrot.lane.b32.xlu1 %v4729_v23, %s4571_s24 }
  0x28   : > { %8591 = vst [vmem:[#allocation15_spill] sm:$0xff] %v4704_v17  ;;  %v4762_v29 = vld [vmem:[#allocation2 + $0x51] sm:$0xff] }
  0x29   : > { %314 = vst.msk [vmem:[#allocation2 + $0x91] sm:$0xff] %vm225_vm0, %v4688_v13 }
  0x2a   : > { %8592 = vst [vmem:[#allocation16_spill] sm:$0xff] %v4709_v18  ;;  %v4766_v30 = vld [vmem:[#allocation2 + $0x69] sm:$0xff] }
  0x2b   : > { %316 = vst.msk [vmem:[#allocation2 + $0xa9] sm:$0xff] %vm225_vm0, %v4697_v16 }
  0x2c   : > { %8593 = vst [vmem:[#allocation17_spill] sm:$0xff] %v4715_v19  ;;  %v4787_v34 = vld [vmem:[#allocation2 + $0x81] sm:$0xff] }
  0x2d   : > { %315 = vst.msk [vmem:[#allocation2 + $0x99] sm:$0xff] %vm225_vm0, %v4704_v17  ;;  %673 = vrot.lane.b32.xlu2 %v4760_v28, %s4571_s24  ;;  %675 = vrot.lane.b32.xlu0 %v4766_v30, %s4571_s24 }
  0x2e   : > { %8594 = vst [vmem:[#allocation18_spill] sm:$0xff] %v4720_v20  ;;  %v4789_v35 = vld [vmem:[#allocation2 + $0x79] sm:$0xff] }
  0x2f   : > { %317 = vst.msk [vmem:[#allocation2 + $0xb1] sm:$0xff] %vm225_vm0, %v4709_v18  ;;  %671 = vrot.lane.b32.xlu1 %v4762_v29, %s4571_s24 }
  0x30   : > { %8595 = vst [vmem:[#allocation19_spill] sm:$0xff] %v4727_v22  ;;  %v4793_v36 = vld [vmem:[#allocation2 + $0x91] sm:$0xff] }
  0x31   : > { %319 = vst.msk [vmem:[#allocation2 + $0xc9] sm:$0xff] %vm225_vm0, %v4715_v19 }
  0x32   : > { %318 = vst.msk [vmem:[#allocation2 + $0xc1] sm:$0xff] %vm225_vm0, %v4720_v20  ;;  %v4814_v40 = vld [vmem:[#allocation2 + $0xa9] sm:$0xff] }
  0x33   : > { %320 = vst.msk [vmem:[#allocation2 + $0xd9] sm:$0xff] %vm225_vm0, %v4727_v22 }
  0x34   : > { %8596 = vst [vmem:[#allocation20_spill] sm:$0xff] %v4742_v25  ;;  %v4816_v41 = vld [vmem:[#allocation2 + $0x99] sm:$0xff] }
  0x35   : > { %8597 = vst [vmem:[#allocation21_spill] sm:$0xff] %v4745_v26  ;;  %679 = vrot.lane.b32.xlu2 %v4787_v34, %s4571_s24  ;;  %681 = vrot.lane.b32.xlu0 %v4793_v36, %s4571_s24 }
  0x36   : > { %322 = vst.msk [vmem:[#allocation2 + $0xf1] sm:$0xff] %vm225_vm0, %v4742_v25  ;;  %v4820_v42 = vld [vmem:[#allocation2 + $0xb1] sm:$0xff]  ;;  %v5018_v25 = vld [vmem:[#allocation2 + $0x7a] sm:$0xff] }
  0x37   : > { %321 = vst.msk [vmem:[#allocation2 + $0xe1] sm:$0xff] %vm225_vm0, %v4745_v26  ;;  %677 = vrot.lane.b32.xlu1 %v4789_v35, %s4571_s24  ;;  %v5028_v26 = vld [vmem:[#allocation2 + $0x92] sm:$0xff]  ;;  %v5048_v22 = vld [vmem:[#allocation2 + $0xaa] sm:$0xff] }
  0x38   : > { %8598 = vst [vmem:[#allocation22_spill] sm:$0xff] %v4754_v27  ;;  %v4841_v46 = vld [vmem:[#allocation2 + $0xc9] sm:$0xff] }
  0x39   : > { %323 = vst.msk [vmem:[#allocation2 + $0xf9] sm:$0xff] %vm225_vm0, %v4754_v27  ;;  %v4843_v47 = vld [vmem:[#allocation2 + $0xc1] sm:$0xff] }
  0x3a   : > { %8599 = vst [vmem:[#allocation23_spill] sm:$0xff] %v4769_v31  ;;  %v4847_v48 = vld [vmem:[#allocation2 + $0xd9] sm:$0xff]  ;;  %v5052_v17 = vld [vmem:[#allocation2 + $0xc2] sm:$0xff] }
  0x3b   : > { %8600 = vst [vmem:[#allocation24_spill] sm:$0xff] %v4772_v32 }
  0x3c   : > { %325 = vst.msk [vmem:[#allocation2 + $0x111] sm:$0xff] %vm225_vm0, %v4769_v31 }
  0x3d   : > { %324 = vst.msk [vmem:[#allocation2 + $0x109] sm:$0xff] %vm225_vm0, %v4772_v32  ;;  %685 = vrot.lane.b32.xlu2 %v4814_v40, %s4571_s24  ;;  %687 = vrot.lane.b32.xlu0 %v4820_v42, %s4571_s24  ;;  %v4862_v50 = vld [vmem:[#allocation2 + $0xf1] sm:$0xff] }
  0x3e   : > { %8601 = vst [vmem:[#allocation25_spill] sm:$0xff] %v4781_v33  ;;  %v4866_v51 = vld [vmem:[#allocation2 + $0xe1] sm:$0xff] }
  0x3f   : > { %326 = vst.msk [vmem:[#allocation2 + $0x121] sm:$0xff] %vm225_vm0, %v4781_v33  ;;  %683 = vrot.lane.b32.xlu1 %v4816_v41, %s4571_s24  ;;  %v5064_v13 = vld [vmem:[#allocation2 + $0xda] sm:$0xff] }
  0x40   : > { %8602 = vst [vmem:[#allocation26_spill] sm:$0xff] %v4796_v37  ;;  %v4874_v52 = vld [vmem:[#allocation2 + $0xf9] sm:$0xff] }
  0x41   : > { %8603 = vst [vmem:[#allocation27_spill] sm:$0xff] %v4799_v38  ;;  %v5084_v2 = vld [vmem:[#allocation2 + $0xf2] sm:$0xff] }
  0x42   : > { %328 = vst.msk [vmem:[#allocation2 + $0x139] sm:$0xff] %vm225_vm0, %v4796_v37 }
  0x43   : > { %327 = vst.msk [vmem:[#allocation2 + $0x129] sm:$0xff] %vm225_vm0, %v4799_v38  ;;  %v4890_v53 = vld [vmem:[#allocation2 + $0x111] sm:$0xff]  ;;  %v5014_v38 = vld [vmem:[#allocation2 + $0x62] sm:$0xff] }
  0x44   : > { %8604 = vst [vmem:[#allocation28_spill] sm:$0xff] %v4808_v39  ;;  %v4894_v54 = vld [vmem:[#allocation2 + $0x109] sm:$0xff] }
  0x45   : > { %329 = vst.msk [vmem:[#allocation2 + $0x141] sm:$0xff] %vm225_vm0, %v4808_v39  ;;  %691 = vrot.lane.b32.xlu2 %v4841_v46, %s4571_s24  ;;  %693 = vrot.lane.b32.xlu0 %v4847_v48, %s4571_s24  ;;  %v5088_v4 = vld [vmem:[#allocation2 + $0x10a] sm:$0xff] }
  0x46   : > { %8605 = vst [vmem:[#allocation29_spill] sm:$0xff] %v4823_v43  ;;  %v4902_v55 = vld [vmem:[#allocation2 + $0x121] sm:$0xff] }
  0x47   : > { %8606 = vst [vmem:[#allocation30_spill] sm:$0xff] %v4826_v44  ;;  %689 = vrot.lane.b32.xlu1 %v4843_v47, %s4571_s24 }
  0x48   : > { %331 = vst.msk [vmem:[#allocation2 + $0x159] sm:$0xff] %vm225_vm0, %v4823_v43  ;;  %v4986_v43 = vld [vmem:[#allocation2 + $0x1a] sm:$0xff] }
  0x49   : > { %330 = vst.msk [vmem:[#allocation2 + $0x151] sm:$0xff] %vm225_vm0, %v4826_v44  ;;  %v4918_v56 = vld [vmem:[#allocation2 + $0x139] sm:$0xff] }
  0x4a   : > { %8607 = vst [vmem:[#allocation31_spill] sm:$0xff] %v4835_v45  ;;  %v4922_v57 = vld [vmem:[#allocation2 + $0x129] sm:$0xff] }
  0x4b   : > { %332 = vst.msk [vmem:[#allocation2 + $0x169] sm:$0xff] %vm225_vm0, %v4835_v45 }
  0x4c   : > { %8608 = vst [vmem:[#allocation32_spill] sm:$0xff] %v4850_v49  ;;  %v4930_v58 = vld [vmem:[#allocation2 + $0x141] sm:$0xff] }
  0x4d   : > { %333 = vst.msk [vmem:[#allocation2 + $0x171] sm:$0xff] %vm225_vm0, %v4850_v49  ;;  %697 = vrot.lane.b32.xlu2 %v4862_v50, %s4571_s24  ;;  %699 = vrot.lane.b32.xlu0 %v4874_v52, %s4571_s24  ;;  %v4990_v49 = vld [vmem:[#allocation2 + $0x32] sm:$0xff] }
  0x4e   : > { %253 = vst.msk [vmem:[#allocation2 + $0x11] sm:$0x1] %vm234_vm2, %v4570_v0 }
  0x4f   : > { %235 = vst.msk [vmem:[#allocation2] sm:$0x1] %vm234_vm2, %v4570_v0  ;;  %695 = vrot.lane.b32.xlu1 %v4866_v51, %s4571_s24  ;;  %v4946_v59 = vld [vmem:[#allocation2 + $0x159] sm:$0xff] }
  0x50   : > { %236 = vst.msk [vmem:[#allocation2 + $0x18] sm:$0x1] %vm234_vm2, %v4570_v0  ;;  %v4950_v60 = vld [vmem:[#allocation2 + $0x151] sm:$0xff] }
  0x51   : > { %237 = vst.msk [vmem:[#allocation2 + $0x30] sm:$0x1] %vm234_vm2, %v4570_v0 }
  0x52   : > { %238 = vst.msk [vmem:[#allocation2 + $0x48] sm:$0x1] %vm234_vm2, %v4570_v0  ;;  %v4958_v61 = vld [vmem:[#allocation2 + $0x169] sm:$0xff] }
  0x53   : > { %239 = vst.msk [vmem:[#allocation2 + $0x60] sm:$0x1] %vm234_vm2, %v4570_v0 }
  0x54   : > { %240 = vst.msk [vmem:[#allocation2 + $0x78] sm:$0x1] %vm234_vm2, %v4570_v0  ;;  %v4976_v63 = vld [vmem:[#allocation2 + $0x171] sm:$0xff] }
  0x55   : > { %241 = vst.msk [vmem:[#allocation2 + $0x90] sm:$0x1] %vm234_vm2, %v4570_v0  ;;  %703 = vrot.lane.b32.xlu2 %v4890_v53, %s4571_s24  ;;  %705 = vrot.lane.b32.xlu0 %v4902_v55, %s4571_s24  ;;  %v401_v6 = vld [vmem:[#allocation2 + $0xa] sm:$0xff] }
  0x56   : > { %242 = vst.msk [vmem:[#allocation2 + $0xa8] sm:$0x1] %vm234_vm2, %v4570_v0 }
  0x57   : > { %243 = vst.msk [vmem:[#allocation2 + $0xc0] sm:$0x1] %vm234_vm2, %v4570_v0  ;;  %701 = vrot.lane.b32.xlu1 %v4894_v54, %s4571_s24 }
  0x58   : > { %244 = vst.msk [vmem:[#allocation2 + $0xd8] sm:$0x1] %vm234_vm2, %v4570_v0 }
  0x59   : > { %245 = vst.msk [vmem:[#allocation2 + $0xf0] sm:$0x1] %vm234_vm2, %v4570_v0 }
  0x5a   : > { %246 = vst.msk [vmem:[#allocation2 + $0x108] sm:$0x1] %vm234_vm2, %v4570_v0 }
  0x5b   : > { %247 = vst.msk [vmem:[#allocation2 + $0x120] sm:$0x1] %vm234_vm2, %v4570_v0 }
  0x5c   : > { %248 = vst.msk [vmem:[#allocation2 + $0x138] sm:$0x1] %vm234_vm2, %v4570_v0 }
  0x5d   : > { %249 = vst.msk [vmem:[#allocation2 + $0x150] sm:$0x1] %vm234_vm2, %v4570_v0  ;;  %709 = vrot.lane.b32.xlu2 %v4918_v56, %s4571_s24  ;;  %711 = vrot.lane.b32.xlu0 %v4930_v58, %s4571_s24 }
  0x5e   : > { %250 = vst.msk [vmem:[#allocation2 + $0x168] sm:$0x1] %vm234_vm2, %v4570_v0 }
  0x5f   : > { %251 = vst.msk [vmem:[#allocation2 + $0x180] sm:$0x1] %vm234_vm2, %v4570_v0  ;;  %707 = vrot.lane.b32.xlu1 %v4922_v57, %s4571_s24 }
  0x60   : > { %252 = vst.msk [vmem:[#allocation2 + $0x198] sm:$0x1] %vm234_vm2, %v4570_v0 }
  0x61   : > { %254 = vst.msk [vmem:[#allocation2 + $0x29] sm:$0x1] %vm234_vm2, %v4570_v0 }
  0x62   : > { %255 = vst.msk [vmem:[#allocation2 + $0x41] sm:$0x1] %vm234_vm2, %v4570_v0 }
  0x63   : > { %256 = vst.msk [vmem:[#allocation2 + $0x59] sm:$0x1] %vm234_vm2, %v4570_v0 }
  0x64   : > { %257 = vst.msk [vmem:[#allocation2 + $0x71] sm:$0x1] %vm234_vm2, %v4570_v0 }
  0x65   : > { %258 = vst.msk [vmem:[#allocation2 + $0x89] sm:$0x1] %vm234_vm2, %v4570_v0  ;;  %715 = vrot.lane.b32.xlu2 %v4946_v59, %s4571_s24  ;;  %717 = vrot.lane.b32.xlu0 %v4958_v61, %s4571_s24 }
  0x66   : > { %259 = vst.msk [vmem:[#allocation2 + $0xa1] sm:$0x1] %vm234_vm2, %v4570_v0 }
  0x67   : > { %260 = vst.msk [vmem:[#allocation2 + $0xb9] sm:$0x1] %vm234_vm2, %v4570_v0  ;;  %713 = vrot.lane.b32.xlu1 %v4950_v60, %s4571_s24 }
  0x68   : > { %261 = vst.msk [vmem:[#allocation2 + $0xd1] sm:$0x1] %vm234_vm2, %v4570_v0  ;;  %v4984_v15 = vld [vmem:[#allocation2 + $0x22] sm:$0xff] }
  0x69   : > { %262 = vst.msk [vmem:[#allocation2 + $0xe9] sm:$0x1] %vm234_vm2, %v4570_v0 }
  0x6a   : > { %263 = vst.msk [vmem:[#allocation2 + $0x101] sm:$0x1] %vm234_vm2, %v4570_v0  ;;  %v5004_v37 = vld [vmem:[#allocation2 + $0x52] sm:$0xff] }
  0x6b   : > { %264 = vst.msk [vmem:[#allocation2 + $0x119] sm:$0x1] %vm234_vm2, %v4570_v0  ;;  %v5012_v31 = vld [vmem:[#allocation2 + $0x6a] sm:$0xff] }
  0x6c   : > { %265 = vst.msk [vmem:[#allocation2 + $0x131] sm:$0x1] %vm234_vm2, %v4570_v0  ;;  %v5030_v20 = vld [vmem:[#allocation2 + $0x82] sm:$0xff] }
  0x6d   : > { %266 = vst.msk [vmem:[#allocation2 + $0x149] sm:$0x1] %vm234_vm2, %v4570_v0  ;;  %785 = vrot.lane.b32.xlu2 %v400_v62, %s4572_s25  ;;  %787 = vrot.lane.b32.xlu0 %v401_v6, %s4572_s25  ;;  %v4998_v62 = vld [vmem:[#allocation2 + $0x4a] sm:$0xff]  ;;  %v5000_v6 = vld [vmem:[#allocation2 + $0x3a] sm:$0xff] }
  0x6e   : > { %267 = vst.msk [vmem:[#allocation2 + $0x161] sm:$0x1] %vm234_vm2, %v4570_v0  ;;  %v5034_v45 = vld [vmem:[#allocation2 + $0x9a] sm:$0xff]  ;;  %v5046_v16 = vld [vmem:[#allocation2 + $0xb2] sm:$0xff] }
  0x6f   : > { %268 = vst.msk [vmem:[#allocation2 + $0x179] sm:$0x1] %vm234_vm2, %v4570_v0  ;;  %719 = vrot.lane.b32.xlu1 %v4976_v63, %s4571_s24  ;;  %v5066_v7 = vld [vmem:[#allocation2 + $0xca] sm:$0xff] }
  0x70   : > { %269 = vst.msk [vmem:[#allocation2 + $0x191] sm:$0x1] %vm234_vm2, %v4570_v0  ;;  %v5070_v8 = vld [vmem:[#allocation2 + $0xe2] sm:$0xff] }
  0x71   : > { %270 = vst.msk [vmem:[#allocation2 + $0x1a9] sm:$0x1] %vm234_vm2, %v4570_v0  ;;  %v5082_v5 = vld [vmem:[#allocation2 + $0xfa] sm:$0xff] }
  0x75   : > { %791 = vrot.lane.b32.xlu2 %v4984_v15, %s4572_s25  ;;  %793 = vrot.lane.b32.xlu0 %v4990_v49, %s4572_s25 }
  0x77   : > { %789 = vrot.lane.b32.xlu1 %v4986_v43, %s4572_s25  ;;  %v4994_v0 = vpop.permute.xlu2 %665 }
  0x78   : > { %8609 = vst [vmem:[#allocation33_spill] sm:$0xff] %v4994_v0  ;;  %v5124_v0 = vld [vmem:[#allocation2 + $0x152] sm:$0xff] }
  0x79   : > { %8629 = vst [vmem:[#allocation53_spill] sm:$0xff] %v5124_v0 }
  0x7d   : > { %797 = vrot.lane.b32.xlu2 %v4998_v62, %s4572_s25  ;;  %799 = vrot.lane.b32.xlu0 %v5004_v37, %s4572_s25 }
  0x7f   : > { %795 = vrot.lane.b32.xlu1 %v5000_v6, %s4572_s25  ;;  %v5008_v44 = vpop.permute.xlu2 %667 }
  0x80   : > { %8610 = vst [vmem:[#allocation34_spill] sm:$0xff] %v5008_v44  ;;  %v5120_v44 = vld [vmem:[#allocation2 + $0x13a] sm:$0xff] }
  0x85   : > { %803 = vrot.lane.b32.xlu2 %v5012_v31, %s4572_s25  ;;  %805 = vrot.lane.b32.xlu0 %v5018_v25, %s4572_s25 }
  0x87   : > { %801 = vrot.lane.b32.xlu1 %v5014_v38, %s4572_s25  ;;  %v5022_v32 = vpop.permute.xlu2 %673  ;;  %v5026_v19 = vpop.permute.xlu0 %657 }
  0x88   : > { %8611 = vst [vmem:[#allocation35_spill] sm:$0xff] %v5022_v32  ;;  %v5100_v32 = vld [vmem:[#allocation2 + $0x122] sm:$0xff] }
  0x89   : > { %8612 = vst [vmem:[#allocation36_spill] sm:$0xff] %v5026_v19  ;;  %v339_v19 = vld [vmem:[#allocation2 + $0x20] sm:$0xff] }
  0x8d   : > { %809 = vrot.lane.b32.xlu2 %v5028_v26, %s4572_s25  ;;  %811 = vrot.lane.b32.xlu0 %v5034_v45, %s4572_s25 }
  0x8f   : > { %807 = vrot.lane.b32.xlu1 %v5030_v20, %s4572_s25  ;;  %v5038_v39 = vpop.permute.xlu2 %679  ;;  %v5044_v27 = vpop.permute.xlu0 %659 }
  0x90   : > { %8613 = vst [vmem:[#allocation37_spill] sm:$0xff] %v5038_v39 }
  0x91   : > { %v5042_v33 = vpop.permute.xlu1 %661  ;;  %8615 = vst [vmem:[#allocation39_spill] sm:$0xff] %v5044_v27  ;;  %v5142_v27 = vld [vmem:[#allocation2 + $0x172] sm:$0xff] }
  0x92   : > { %8614 = vst [vmem:[#allocation38_spill] sm:$0xff] %v5042_v33  ;;  %v5138_v33 = vld [vmem:[#allocation2 + $0x15a] sm:$0xff] }
  0x93   : > { %8634 = vst [vmem:[#allocation58_spill] sm:$0xff] %v5138_v33 }
  0x94   : > { %8635 = vst [vmem:[#allocation59_spill] sm:$0xff] %v5142_v27 }
  0x95   : > { %815 = vrot.lane.b32.xlu2 %v5046_v16, %s4572_s25  ;;  %817 = vrot.lane.b32.xlu0 %v5052_v17, %s4572_s25 }
  0x97   : > { %813 = vrot.lane.b32.xlu1 %v5048_v22, %s4572_s25  ;;  %v5056_v18 = vpop.permute.xlu2 %685  ;;  %v5062_v11 = vpop.permute.xlu0 %669 }
  0x98   : > { %8616 = vst [vmem:[#allocation40_spill] sm:$0xff] %v5056_v18 }
  0x99   : > { %v5060_v10 = vpop.permute.xlu1 %663  ;;  %8618 = vst [vmem:[#allocation42_spill] sm:$0xff] %v5062_v11  ;;  %v5118_v11 = vld [vmem:[#allocation2 + $0x142] sm:$0xff] }
  0x9a   : > { %8617 = vst [vmem:[#allocation41_spill] sm:$0xff] %v5060_v10  ;;  %v5136_v10 = vld [vmem:[#allocation2 + $0x16a] sm:$0xff] }
  0x9b   : > { %8628 = vst [vmem:[#allocation52_spill] sm:$0xff] %v5118_v11 }
  0x9c   : > { %8633 = vst [vmem:[#allocation57_spill] sm:$0xff] %v5136_v10 }
  0x9d   : > { %821 = vrot.lane.b32.xlu2 %v5064_v13, %s4572_s25  ;;  %823 = vrot.lane.b32.xlu0 %v5070_v8, %s4572_s25 }
  0x9f   : > { %819 = vrot.lane.b32.xlu1 %v5066_v7, %s4572_s25  ;;  %v5074_v9 = vpop.permute.xlu2 %691  ;;  %v5080_v1 = vpop.permute.xlu0 %675 }
  0xa0   : > { %8619 = vst [vmem:[#allocation43_spill] sm:$0xff] %v5074_v9  ;;  %v5106_v9 = vld [vmem:[#allocation2 + $0x12a] sm:$0xff] }
  0xa1   : > { %v5078_v3 = vpop.permute.xlu1 %671  ;;  %8621 = vst [vmem:[#allocation45_spill] sm:$0xff] %v5080_v1 }
  0xa2   : > { %8620 = vst [vmem:[#allocation44_spill] sm:$0xff] %v5078_v3  ;;  %v5102_v3 = vld [vmem:[#allocation2 + $0x112] sm:$0xff] }
  0xa5   : > { %827 = vrot.lane.b32.xlu2 %v5082_v5, %s4572_s25  ;;  %829 = vrot.lane.b32.xlu0 %v5088_v4, %s4572_s25 }
  0xa7   : > { %825 = vrot.lane.b32.xlu1 %v5084_v2, %s4572_s25  ;;  %v5092_v18 = vpop.permute.xlu2 %697  ;;  %v5098_v1 = vpop.permute.xlu0 %681 }
  0xa8   : > { %8622 = vst [vmem:[#allocation46_spill] sm:$0xff] %v5092_v18 }
  0xa9   : > { %v5096_v39 = vpop.permute.xlu1 %677  ;;  %8624 = vst [vmem:[#allocation48_spill] sm:$0xff] %v5098_v1 }
  0xaa   : > { %8623 = vst [vmem:[#allocation47_spill] sm:$0xff] %v5096_v39 }
  0xad   : > { %833 = vrot.lane.b32.xlu2 %v5100_v32, %s4572_s25  ;;  %835 = vrot.lane.b32.xlu0 %v5106_v9, %s4572_s25 }
  0xaf   : > { %831 = vrot.lane.b32.xlu1 %v5102_v3, %s4572_s25  ;;  %v5110_v18 = vpop.permute.xlu2 %703  ;;  %v5116_v1 = vpop.permute.xlu0 %687 }
  0xb0   : > { %8625 = vst [vmem:[#allocation49_spill] sm:$0xff] %v5110_v18 }
  0xb1   : > { %v5114_v39 = vpop.permute.xlu1 %683  ;;  %8627 = vst [vmem:[#allocation51_spill] sm:$0xff] %v5116_v1 }
  0xb2   : > { %8626 = vst [vmem:[#allocation50_spill] sm:$0xff] %v5114_v39 }
  0xb5   : > { %839 = vrot.lane.b32.xlu2 %v5118_v11, %s4572_s25  ;;  %841 = vrot.lane.b32.xlu0 %v5124_v0, %s4572_s25  ;;  %v338_v0 = vld [vmem:[#allocation2 + $0x18] sm:$0xff] }
  0xb7   : > { %837 = vrot.lane.b32.xlu1 %v5120_v44, %s4572_s25  ;;  %v5128_v18 = vpop.permute.xlu2 %709  ;;  %v5134_v1 = vpop.permute.xlu0 %693 }
  0xb8   : > { %8630 = vst [vmem:[#allocation54_spill] sm:$0xff] %v5128_v18 }
  0xb9   : > { %v5132_v39 = vpop.permute.xlu1 %689  ;;  %8632 = vst [vmem:[#allocation56_spill] sm:$0xff] %v5134_v1 }
  0xba   : > { %8631 = vst [vmem:[#allocation55_spill] sm:$0xff] %v5132_v39 }
  0xbd   : > { %845 = vrot.lane.b32.xlu2 %v5136_v10, %s4572_s25  ;;  %847 = vrot.lane.b32.xlu0 %v5142_v27, %s4572_s25  ;;  %v340_v10 = vld [vmem:[#allocation2 + $0x30] sm:$0xff]  ;;  %v5163_v27 = vld [vmem:[#allocation2 + $0x48] sm:$0xff] }
  0xbf   : > { %843 = vrot.lane.b32.xlu1 %v5138_v33, %s4572_s25  ;;  %v5146_v18 = vpop.permute.xlu2 %715  ;;  %v5152_v1 = vpop.permute.xlu0 %699 }
  0xc0   : > { %8636 = vst [vmem:[#allocation60_spill] sm:$0xff] %v5146_v18 }
  0xc1   : > { %v5150_v39 = vpop.permute.xlu1 %695  ;;  %8638 = vst [vmem:[#allocation62_spill] sm:$0xff] %v5152_v1  ;;  %v344_v1 = vld [vmem:[#allocation2 + $0x60] sm:$0xff] }
  0xc2   : > { %8637 = vst [vmem:[#allocation61_spill] sm:$0xff] %v5150_v39  ;;  %v341_v39 = vld [vmem:[#allocation2 + $0x38] sm:$0xff] }
  0xc5   : > { %915 = vrot.lane.b32.xlu2 %v339_v19, %s4573_s26  ;;  %917 = vrot.lane.b32.xlu0 %v340_v10, %s4573_s26  ;;  %v5168_v19 = vld [vmem:[#allocation2 + $0x50] sm:$0xff] }
  0xc6   : > { %8642 = vst [vmem:[#allocation66_spill] sm:$0xff] %v5168_v19 }
  0xc7   : > { %913 = vrot.lane.b32.xlu1 %v338_v0, %s4573_s26  ;;  %v5156_v11 = vpop.permute.xlu2 %785  ;;  %v5161_v33 = vpop.permute.xlu0 %705 }
  0xc8   : > { %8639 = vst [vmem:[#allocation63_spill] sm:$0xff] %v5156_v11 }
  0xc9   : > { %v5159_v18 = vpop.permute.xlu1 %701  ;;  %8641 = vst [vmem:[#allocation65_spill] sm:$0xff] %v5161_v33  ;;  %v5178_v33 = vld [vmem:[#allocation2 + $0x68] sm:$0xff] }
  0xca   : > { %8640 = vst [vmem:[#allocation64_spill] sm:$0xff] %v5159_v18 }
  0xcb   : > { %8646 = vst [vmem:[#allocation70_spill] sm:$0xff] %v5178_v33 }
  0xcd   : > { %921 = vrot.lane.b32.xlu2 %v5163_v27, %s4573_s26  ;;  %923 = vrot.lane.b32.xlu0 %v5168_v19, %s4573_s26  ;;  %v347_v19 = vld [vmem:[#allocation2 + $0x80] sm:$0xff] }
  0xcf   : > { %919 = vrot.lane.b32.xlu1 %v341_v39, %s4573_s26  ;;  %v5170_v0 = vpop.permute.xlu2 %791  ;;  %v5176_v18 = vpop.permute.xlu0 %711  ;;  %v5183_v39 = vld [vmem:[#allocation2 + $0x78] sm:$0xff] }
  0xd0   : > { %8643 = vst [vmem:[#allocation67_spill] sm:$0xff] %v5170_v0 }
  0xd1   : > { %v5174_v10 = vpop.permute.xlu1 %707  ;;  %8645 = vst [vmem:[#allocation69_spill] sm:$0xff] %v5176_v18  ;;  %v5193_v18 = vld [vmem:[#allocation2 + $0x90] sm:$0xff] }
  0xd2   : > { %8644 = vst [vmem:[#allocation68_spill] sm:$0xff] %v5174_v10 }
  0xd3   : > { %8647 = vst [vmem:[#allocation71_spill] sm:$0xff] %v5183_v39 }
  0xd4   : > { %8651 = vst [vmem:[#allocation75_spill] sm:$0xff] %v5193_v18 }
  0xd5   : > { %927 = vrot.lane.b32.xlu2 %v5178_v33, %s4573_s26  ;;  %929 = vrot.lane.b32.xlu0 %v5183_v39, %s4573_s26  ;;  %v350_v39 = vld [vmem:[#allocation2 + $0xa8] sm:$0xff] }
  0xd7   : > { %925 = vrot.lane.b32.xlu1 %v344_v1, %s4573_s26  ;;  %v5185_v11 = vpop.permute.xlu2 %797  ;;  %v5191_v10 = vpop.permute.xlu0 %717  ;;  %v5198_v1 = vld [vmem:[#allocation2 + $0x98] sm:$0xff] }
  0xd8   : > { %8648 = vst [vmem:[#allocation72_spill] sm:$0xff] %v5185_v11  ;;  %v5208_v11 = vld [vmem:[#allocation2 + $0xb0] sm:$0xff] }
  0xd9   : > { %v5189_v0 = vpop.permute.xlu1 %713  ;;  %8650 = vst [vmem:[#allocation74_spill] sm:$0xff] %v5191_v10 }
  0xda   : > { %8649 = vst [vmem:[#allocation73_spill] sm:$0xff] %v5189_v0 }
  0xdb   : > { %8652 = vst [vmem:[#allocation76_spill] sm:$0xff] %v5198_v1 }
  0xdc   : > { %8656 = vst [vmem:[#allocation80_spill] sm:$0xff] %v5208_v11 }
  0xdd   : > { %933 = vrot.lane.b32.xlu2 %v5193_v18, %s4573_s26  ;;  %935 = vrot.lane.b32.xlu0 %v5198_v1, %s4573_s26  ;;  %v353_v18 = vld [vmem:[#allocation2 + $0xc8] sm:$0xff] }
  0xdf   : > { %931 = vrot.lane.b32.xlu1 %v347_v19, %s4573_s26  ;;  %v5200_v33 = vpop.permute.xlu2 %803  ;;  %v5206_v10 = vpop.permute.xlu0 %787  ;;  %v5213_v19 = vld [vmem:[#allocation2 + $0xc0] sm:$0xff] }
  0xe0   : > { %8653 = vst [vmem:[#allocation77_spill] sm:$0xff] %v5200_v33 }
  0xe1   : > { %v5204_v0 = vpop.permute.xlu1 %719  ;;  %8655 = vst [vmem:[#allocation79_spill] sm:$0xff] %v5206_v10  ;;  %v5223_v10 = vld [vmem:[#allocation2 + $0xd8] sm:$0xff] }
  0xe2   : > { %8654 = vst [vmem:[#allocation78_spill] sm:$0xff] %v5204_v0 }
  0xe3   : > { %8657 = vst [vmem:[#allocation81_spill] sm:$0xff] %v5213_v19 }
  0xe4   : > { %8661 = vst [vmem:[#allocation85_spill] sm:$0xff] %v5223_v10 }
  0xe5   : > { %939 = vrot.lane.b32.xlu2 %v5208_v11, %s4573_s26  ;;  %941 = vrot.lane.b32.xlu0 %v5213_v19, %s4573_s26  ;;  %v5228_v11 = vld [vmem:[%s4634_s23 + $0xf0] sm:$0xff]  ;;  %v5248_v19 = vld [vmem:[#allocation2 + $0xf8] sm:$0xff] }
  0xe6   : > { %8662 = vst [vmem:[#allocation86_spill] sm:$0xff] %v5228_v11 }
  0xe7   : > { %937 = vrot.lane.b32.xlu1 %v350_v39, %s4573_s26  ;;  %v5215_v33 = vpop.permute.xlu2 %809  ;;  %v5221_v0 = vpop.permute.xlu0 %793  ;;  %v5231_v39 = vld [vmem:[%s4634_s23 + $0xf8] sm:$0xff]  ;;  %334 = vst.msk [vmem:[#allocation2 + $0x181] sm:$0xff] %vm225_vm0, %v5228_v11  ;;  %v5253_v11 = vld [vmem:[#allocation2 + $0x108] sm:$0xff] }
  0xe8   : > { %8658 = vst [vmem:[#allocation82_spill] sm:$0xff] %v5215_v33  ;;  %v5236_v33 = vld [vmem:[#allocation2 + $0xe0] sm:$0xff] }
  0xe9   : > { %v5219_v1 = vpop.permute.xlu1 %789  ;;  %8660 = vst [vmem:[#allocation84_spill] sm:$0xff] %v5221_v0 }
  0xea   : > { %8659 = vst [vmem:[#allocation83_spill] sm:$0xff] %v5219_v1 }
  0xeb   : > { %8663 = vst [vmem:[#allocation87_spill] sm:$0xff] %v5231_v39 }
  0xec   : > { %8664 = vst [vmem:[#allocation88_spill] sm:$0xff] %v5236_v33 }
  0xed   : > { %945 = vrot.lane.b32.xlu2 %v5223_v10, %s4573_s26  ;;  %335 = vst.msk [vmem:[#allocation2 + $0x189] sm:$0xff] %vm225_vm0, %v5231_v39  ;;  %947 = vrot.lane.b32.xlu0 %v5236_v33, %s4573_s26  ;;  %v359_v33 = vld [vmem:[#allocation2 + $0x110] sm:$0xff] }
  0xee   : > { %8668 = vst [vmem:[#allocation92_spill] sm:$0xff] %v5248_v19 }
  0xef   : > { %943 = vrot.lane.b32.xlu1 %v353_v18, %s4573_s26  ;;  %v5238_v1 = vpop.permute.xlu2 %815  ;;  %v5246_v10 = vpop.permute.xlu0 %799  ;;  %v356_v18 = vld [vmem:[#allocation2 + $0xf0] sm:$0xff]  ;;  %8669 = vst [vmem:[#allocation93_spill] sm:$0xff] %v5253_v11 }
  0xf0   : > { %8665 = vst [vmem:[#allocation89_spill] sm:$0xff] %v5238_v1 }
  0xf1   : > { %v5244_v0 = vpop.permute.xlu1 %795  ;;  %8667 = vst [vmem:[#allocation91_spill] sm:$0xff] %v5246_v10  ;;  %v5263_v10 = vld [vmem:[#allocation2 + $0x120] sm:$0xff] }
  0xf2   : > { %8666 = vst [vmem:[#allocation90_spill] sm:$0xff] %v5244_v0 }
  0xf3   : > { %8673 = vst [vmem:[#allocation97_spill] sm:$0xff] %v5263_v10 }
  0xf5   : > { %951 = vrot.lane.b32.xlu2 %v5248_v19, %s4573_s26  ;;  %953 = vrot.lane.b32.xlu0 %v5253_v11, %s4573_s26  ;;  %v5280_v11 = vld [vmem:[#allocation2 + $0x138] sm:$0xff] }
  0xf6   : > { %8679 = vst [vmem:[#allocation103_spill] sm:$0xff] %v5280_v11 }
  0xf7   : > { %949 = vrot.lane.b32.xlu1 %v356_v18, %s4573_s26  ;;  %v5255_v1 = vpop.permute.xlu2 %821  ;;  %v5261_v0 = vpop.permute.xlu0 %805  ;;  %v5268_v18 = vld [vmem:[#allocation2 + $0x128] sm:$0xff] }
  0xf8   : > { %8670 = vst [vmem:[#allocation94_spill] sm:$0xff] %v5255_v1 }
  0xf9   : > { %v5259_v39 = vpop.permute.xlu1 %801  ;;  %8672 = vst [vmem:[#allocation96_spill] sm:$0xff] %v5261_v0  ;;  %v5278_v0 = vld [vmem:[#allocation2 + $0x140] sm:$0xff] }
  0xfa   : > { %8671 = vst [vmem:[#allocation95_spill] sm:$0xff] %v5259_v39 }
  0xfb   : > { %8674 = vst [vmem:[#allocation98_spill] sm:$0xff] %v5268_v18 }
  0xfc   : > { %8678 = vst [vmem:[#allocation102_spill] sm:$0xff] %v5278_v0 }
  0xfd   : > { %957 = vrot.lane.b32.xlu2 %v5263_v10, %s4573_s26  ;;  %959 = vrot.lane.b32.xlu0 %v5268_v18, %s4573_s26  ;;  %v5296_v18 = vld [vmem:[#allocation2 + $0x168] sm:$0xff]  ;;  %v5298_v10 = vld [vmem:[#allocation2 + $0x158] sm:$0xff] }
  0xfe   : > { %8684 = vst [vmem:[#allocation108_spill] sm:$0xff] %v5296_v18 }
  0xff   : > { %955 = vrot.lane.b32.xlu1 %v359_v33, %s4573_s26  ;;  %v5270_v19 = vpop.permute.xlu2 %827  ;;  %v5276_v39 = vpop.permute.xlu0 %811  ;;  %v5286_v33 = vld [vmem:[#allocation2 + $0x150] sm:$0xff] }
 0x100   : > { %8675 = vst [vmem:[#allocation99_spill] sm:$0xff] %v5270_v19 }
 0x101   : > { %v5274_v1 = vpop.permute.xlu1 %807  ;;  %8677 = vst [vmem:[#allocation101_spill] sm:$0xff] %v5276_v39 }
 0x102   : > { %8676 = vst [vmem:[#allocation100_spill] sm:$0xff] %v5274_v1 }
 0x103   : > { %8680 = vst [vmem:[#allocation104_spill] sm:$0xff] %v5286_v33 }
 0x105   : > { %963 = vrot.lane.b32.xlu2 %v5278_v0, %s4573_s26  ;;  %965 = vrot.lane.b32.xlu0 %v5286_v33, %s4573_s26  ;;  %v5304_v0 = vld [vmem:[#allocation2 + $0x170] sm:$0xff]  ;;  %v5314_v33 = vld [vmem:[#allocation2 + $0x188] sm:$0xff] }
 0x106   : > { %8688 = vst [vmem:[#allocation112_spill] sm:$0xff] %v5314_v33 }
 0x107   : > { %961 = vrot.lane.b32.xlu1 %v5280_v11, %s4573_s26  ;;  %v5288_v19 = vpop.permute.xlu2 %833  ;;  %v5294_v39 = vpop.permute.xlu0 %817  ;;  %v5316_v11 = vld [vmem:[#allocation2 + $0x180] sm:$0xff] }
 0x108   : > { %8681 = vst [vmem:[#allocation105_spill] sm:$0xff] %v5288_v19 }
 0x109   : > { %v5292_v1 = vpop.permute.xlu1 %813  ;;  %8683 = vst [vmem:[#allocation107_spill] sm:$0xff] %v5294_v39 }
 0x10a   : > { %8682 = vst [vmem:[#allocation106_spill] sm:$0xff] %v5292_v1 }
 0x10d   : > { %969 = vrot.lane.b32.xlu2 %v5296_v18, %s4573_s26  ;;  %971 = vrot.lane.b32.xlu0 %v5304_v0, %s4573_s26 }
 0x10f   : > { %967 = vrot.lane.b32.xlu1 %v5298_v10, %s4573_s26  ;;  %v5306_v19 = vpop.permute.xlu2 %839  ;;  %v5312_v39 = vpop.permute.xlu0 %823 }
 0x110   : > { %8685 = vst [vmem:[#allocation109_spill] sm:$0xff] %v5306_v19 }
 0x111   : > { %v5310_v1 = vpop.permute.xlu1 %819  ;;  %8687 = vst [vmem:[#allocation111_spill] sm:$0xff] %v5312_v39 }
 0x112   : > { %8686 = vst [vmem:[#allocation110_spill] sm:$0xff] %v5310_v1 }
 0x115   : > { %975 = vrot.lane.b32.xlu2 %v5314_v33, %s4573_s26  ;;  %1041 = vrot.lane.b32.xlu0 %v4692_v14, %s4574_s27 }
 0x117   : > { %973 = vrot.lane.b32.xlu1 %v5316_v11, %s4573_s26  ;;  %v5322_v18 = vpop.permute.xlu2 %845  ;;  %v5328_v1 = vpop.permute.xlu0 %829 }
 0x118   : > { %8689 = vst [vmem:[#allocation113_spill] sm:$0xff] %v5322_v18 }
 0x119   : > { %v5326_v19 = vpop.permute.xlu1 %825  ;;  %8691 = vst [vmem:[#allocation115_spill] sm:$0xff] %v5328_v1 }
 0x11a   : > { %8690 = vst [vmem:[#allocation114_spill] sm:$0xff] %v5326_v19  ;;  %v583_v19 = vld [vmem:[#allocation2 + $0x139] sm:$0xff] }
 0x11d   : > { %1045 = vrot.lane.b32.xlu2 %v4683_v12, %s4574_s27  ;;  %1047 = vrot.lane.b32.xlu0 %v4722_v21, %s4574_s27 }
 0x11f   : > { %1043 = vrot.lane.b32.xlu1 %v4729_v23, %s4574_s27  ;;  %v5334_v39 = vpop.permute.xlu2 %915  ;;  %v5340_v33 = vpop.permute.xlu0 %835 }
 0x120   : > { %8693 = vst [vmem:[#allocation117_spill] sm:$0xff] %v5340_v33  ;;  %v8739_v33 = vld [vmem:[#allocation66_spill] sm:$0xff] }
 0x121   : > { %v5338_v18 = vpop.permute.xlu1 %831 }
 0x122   : > { %8692 = vst [vmem:[#allocation116_spill] sm:$0xff] %v5338_v18 }
 0x125   : > { %1051 = vrot.lane.b32.xlu2 %v4762_v29, %s4574_s27  ;;  %1053 = vrot.lane.b32.xlu0 %v4760_v28, %s4574_s27 }
 0x127   : > { %1049 = vrot.lane.b32.xlu1 %v4737_v24, %s4574_s27  ;;  %v5346_v14 = vpop.permute.xlu2 %921  ;;  %v5352_v23 = vpop.permute.xlu0 %841 }
 0x128   : > { %8695 = vst [vmem:[#allocation119_spill] sm:$0xff] %v5352_v23 }
 0x129   : > { %v5350_v12 = vpop.permute.xlu1 %837 }
 0x12a   : > { %8694 = vst [vmem:[#allocation118_spill] sm:$0xff] %v5350_v12  ;;  %v530_v12 = vld [vmem:[#allocation2 + $0x38] sm:$0xff] }
 0x12d   : > { %1057 = vrot.lane.b32.xlu2 %v4789_v35, %s4574_s27  ;;  %1059 = vrot.lane.b32.xlu0 %v4787_v34, %s4574_s27 }
 0x12f   : > { %1055 = vrot.lane.b32.xlu1 %v4766_v30, %s4574_s27  ;;  %v5358_v21 = vpop.permute.xlu2 %927  ;;  %v5364_v29 = vpop.permute.xlu0 %847 }
 0x130   : > { %8697 = vst [vmem:[#allocation121_spill] sm:$0xff] %v5364_v29  ;;  %v5452_v29 = vld [vmem:[#allocation2 + $0x189] sm:$0xff] }
 0x131   : > { %v5362_v24 = vpop.permute.xlu1 %843 }
 0x132   : > { %8696 = vst [vmem:[#allocation120_spill] sm:$0xff] %v5362_v24 }
 0x135   : > { %1063 = vrot.lane.b32.xlu2 %v4816_v41, %s4574_s27  ;;  %1065 = vrot.lane.b32.xlu0 %v4814_v40, %s4574_s27 }
 0x137   : > { %1061 = vrot.lane.b32.xlu1 %v4793_v36, %s4574_s27  ;;  %v5370_v28 = vpop.permute.xlu2 %933  ;;  %v5376_v35 = vpop.permute.xlu0 %917 }
 0x138   : > { %8698 = vst [vmem:[#allocation122_spill] sm:$0xff] %v5370_v28 }
 0x139   : > { %v5374_v30 = vpop.permute.xlu1 %913 }
 0x13d   : > { %1069 = vrot.lane.b32.xlu2 %v4843_v47, %s4574_s27  ;;  %1071 = vrot.lane.b32.xlu0 %v4841_v46, %s4574_s27 }
 0x13f   : > { %1067 = vrot.lane.b32.xlu1 %v4820_v42, %s4574_s27  ;;  %v5382_v34 = vpop.permute.xlu2 %939  ;;  %v5388_v41 = vpop.permute.xlu0 %923 }
 0x140   : > { %8699 = vst [vmem:[#allocation123_spill] sm:$0xff] %v5382_v34 }
 0x141   : > { %v5386_v36 = vpop.permute.xlu1 %919 }
 0x145   : > { %1075 = vrot.lane.b32.xlu2 %v4866_v51, %s4574_s27  ;;  %1077 = vrot.lane.b32.xlu0 %v4862_v50, %s4574_s27 }
 0x147   : > { %1073 = vrot.lane.b32.xlu1 %v4847_v48, %s4574_s27  ;;  %v5394_v40 = vpop.permute.xlu2 %945  ;;  %v5400_v47 = vpop.permute.xlu0 %929 }
 0x149   : > { %v5398_v42 = vpop.permute.xlu1 %925 }
 0x14d   : > { %1081 = vrot.lane.b32.xlu2 %v4894_v54, %s4574_s27  ;;  %1083 = vrot.lane.b32.xlu0 %v4890_v53, %s4574_s27 }
 0x14f   : > { %1079 = vrot.lane.b32.xlu1 %v4874_v52, %s4574_s27  ;;  %v5406_v46 = vpop.permute.xlu2 %951  ;;  %v5412_v51 = vpop.permute.xlu0 %935 }
 0x150   : > { %8700 = vst [vmem:[#allocation124_spill] sm:$0xff] %v5406_v46 }
 0x151   : > { %v5410_v48 = vpop.permute.xlu1 %931  ;;  %8702 = vst [vmem:[#allocation126_spill] sm:$0xff] %v5412_v51  ;;  %v568_v51 = vld [vmem:[#allocation2 + $0x81] sm:$0xff] }
 0x152   : > { %8701 = vst [vmem:[#allocation125_spill] sm:$0xff] %v5410_v48  ;;  %v607_v48 = vld [vmem:[#allocation2 + $0xda] sm:$0xff] }
 0x155   : > { %1087 = vrot.lane.b32.xlu2 %v4922_v57, %s4574_s27  ;;  %1089 = vrot.lane.b32.xlu0 %v4918_v56, %s4574_s27  ;;  %v5440_v56 = vld [vmem:[#allocation2 + $0x181] sm:$0xff] }
 0x157   : > { %1085 = vrot.lane.b32.xlu1 %v4902_v55, %s4574_s27  ;;  %v5418_v50 = vpop.permute.xlu2 %957  ;;  %v5424_v54 = vpop.permute.xlu0 %941 }
 0x158   : > { %8703 = vst [vmem:[#allocation127_spill] sm:$0xff] %v5418_v50 }
 0x159   : > { %v5422_v52 = vpop.permute.xlu1 %937  ;;  %8705 = vst [vmem:[#allocation129_spill] sm:$0xff] %v5424_v54 }
 0x15a   : > { %8704 = vst [vmem:[#allocation128_spill] sm:$0xff] %v5422_v52 }
 0x15d   : > { %1093 = vrot.lane.b32.xlu2 %v4950_v60, %s4574_s27  ;;  %1095 = vrot.lane.b32.xlu0 %v4946_v59, %s4574_s27 }
 0x15f   : > { %1091 = vrot.lane.b32.xlu1 %v4930_v58, %s4574_s27  ;;  %v5430_v53 = vpop.permute.xlu2 %963  ;;  %v5436_v57 = vpop.permute.xlu0 %947 }
 0x160   : > { %8706 = vst [vmem:[#allocation130_spill] sm:$0xff] %v5430_v53  ;;  %v533_v53 = vld [vmem:[#allocation2 + $0x60] sm:$0xff] }
 0x161   : > { %v5434_v55 = vpop.permute.xlu1 %943 }
 0x162   : > { %8707 = vst [vmem:[#allocation131_spill] sm:$0xff] %v5434_v55 }
 0x165   : > { %1099 = vrot.lane.b32.xlu2 %v4976_v63, %s4574_s27  ;;  %1101 = vrot.lane.b32.xlu0 %v5440_v56, %s4574_s27 }
 0x167   : > { %1097 = vrot.lane.b32.xlu1 %v4958_v61, %s4574_s27  ;;  %v5444_v60 = vpop.permute.xlu2 %969  ;;  %v5450_v59 = vpop.permute.xlu0 %953 }
 0x168   : > { %8708 = vst [vmem:[#allocation132_spill] sm:$0xff] %v5444_v60 }
 0x169   : > { %v5448_v58 = vpop.permute.xlu1 %949  ;;  %8709 = vst [vmem:[#allocation133_spill] sm:$0xff] %v5450_v59  ;;  %v582_v59 = vld [vmem:[#allocation2 + $0x129] sm:$0xff] }
 0x16d   : > { %1169 = vrot.lane.b32.xlu2 %v4986_v43, %s4575_s28  ;;  %1171 = vrot.lane.b32.xlu0 %v4984_v15, %s4575_s28 }
 0x16f   : > { %1103 = vrot.lane.b32.xlu1 %v5452_v29, %s4574_s27  ;;  %v5458_v63 = vpop.permute.xlu2 %975  ;;  %v5464_v24 = vpop.permute.xlu0 %959 }
 0x170   : > { %8710 = vst [vmem:[#allocation134_spill] sm:$0xff] %v5458_v63 }
 0x171   : > { %v5462_v61 = vpop.permute.xlu1 %955  ;;  %8712 = vst [vmem:[#allocation136_spill] sm:$0xff] %v5464_v24 }
 0x172   : > { %8711 = vst [vmem:[#allocation135_spill] sm:$0xff] %v5462_v61 }
 0x175   : > { %1175 = vrot.lane.b32.xlu2 %v5000_v6, %s4575_s28  ;;  %1177 = vrot.lane.b32.xlu0 %v4998_v62, %s4575_s28 }
 0x177   : > { %1173 = vrot.lane.b32.xlu1 %v4990_v49, %s4575_s28  ;;  %v5470_v60 = vpop.permute.xlu2 %1045  ;;  %v5476_v63 = vpop.permute.xlu0 %965 }
 0x178   : > { %8714 = vst [vmem:[#allocation138_spill] sm:$0xff] %v5476_v63  ;;  %v5578_v63 = vld [vmem:[#allocation2 + $0x18a] sm:$0xff] }
 0x179   : > { %v5474_v43 = vpop.permute.xlu1 %961 }
 0x17a   : > { %8713 = vst [vmem:[#allocation137_spill] sm:$0xff] %v5474_v43 }
 0x17d   : > { %1181 = vrot.lane.b32.xlu2 %v5014_v38, %s4575_s28  ;;  %1183 = vrot.lane.b32.xlu0 %v5012_v31, %s4575_s28 }
 0x17f   : > { %1179 = vrot.lane.b32.xlu1 %v5004_v37, %s4575_s28  ;;  %v5482_v15 = vpop.permute.xlu2 %1051  ;;  %v5488_v6 = vpop.permute.xlu0 %971 }
 0x180   : > { %8716 = vst [vmem:[#allocation140_spill] sm:$0xff] %v5488_v6  ;;  %v8729_v6 = vld [vmem:[#allocation53_spill] sm:$0xff] }
 0x181   : > { %v5486_v49 = vpop.permute.xlu1 %967 }
 0x182   : > { %8715 = vst [vmem:[#allocation139_spill] sm:$0xff] %v5486_v49 }
 0x185   : > { %1187 = vrot.lane.b32.xlu2 %v5030_v20, %s4575_s28  ;;  %1189 = vrot.lane.b32.xlu0 %v5028_v26, %s4575_s28 }
 0x187   : > { %1185 = vrot.lane.b32.xlu1 %v5018_v25, %s4575_s28  ;;  %v5494_v62 = vpop.permute.xlu2 %1057  ;;  %v5500_v38 = vpop.permute.xlu0 %1041 }
 0x189   : > { %v5498_v37 = vpop.permute.xlu1 %973 }
 0x18a   : > { %8717 = vst [vmem:[#allocation141_spill] sm:$0xff] %v5498_v37 }
 0x18d   : > { %1193 = vrot.lane.b32.xlu2 %v5048_v22, %s4575_s28  ;;  %1195 = vrot.lane.b32.xlu0 %v5046_v16, %s4575_s28 }
 0x18f   : > { %1191 = vrot.lane.b32.xlu1 %v5034_v45, %s4575_s28  ;;  %v5506_v31 = vpop.permute.xlu2 %1063  ;;  %v5512_v25 = vpop.permute.xlu0 %1047 }
 0x190   : > { %8718 = vst [vmem:[#allocation142_spill] sm:$0xff] %v5506_v31  ;;  %v565_v31 = vld [vmem:[#allocation2 + $0x61] sm:$0xff] }
 0x191   : > { %v5510_v20 = vpop.permute.xlu1 %1043 }
 0x195   : > { %1199 = vrot.lane.b32.xlu2 %v5066_v7, %s4575_s28  ;;  %1201 = vrot.lane.b32.xlu0 %v5064_v13, %s4575_s28 }
 0x197   : > { %1197 = vrot.lane.b32.xlu1 %v5052_v17, %s4575_s28  ;;  %v5518_v26 = vpop.permute.xlu2 %1069  ;;  %v5524_v45 = vpop.permute.xlu0 %1053 }
 0x198   : > { %8719 = vst [vmem:[#allocation143_spill] sm:$0xff] %v5518_v26 }
 0x199   : > { %v5522_v22 = vpop.permute.xlu1 %1049 }
 0x19d   : > { %1205 = vrot.lane.b32.xlu2 %v5084_v2, %s4575_s28  ;;  %1207 = vrot.lane.b32.xlu0 %v5082_v5, %s4575_s28 }
 0x19f   : > { %1203 = vrot.lane.b32.xlu1 %v5070_v8, %s4575_s28  ;;  %v5530_v16 = vpop.permute.xlu2 %1075  ;;  %v5536_v17 = vpop.permute.xlu0 %1059 }
 0x1a0   : > { %8720 = vst [vmem:[#allocation144_spill] sm:$0xff] %v5536_v17  ;;  %v604_v17 = vld [vmem:[#allocation2 + $0xb2] sm:$0xff] }
 0x1a1   : > { %v5534_v7 = vpop.permute.xlu1 %1055 }
 0x1a5   : > { %1211 = vrot.lane.b32.xlu2 %v5102_v3, %s4575_s28  ;;  %1213 = vrot.lane.b32.xlu0 %v5100_v32, %s4575_s28  ;;  %v8725_v3 = vld [vmem:[#allocation52_spill] sm:$0xff]  ;;  %v8728_v32 = vld [vmem:[#allocation58_spill] sm:$0xff] }
 0x1a7   : > { %1209 = vrot.lane.b32.xlu1 %v5088_v4, %s4575_s28  ;;  %v5542_v13 = vpop.permute.xlu2 %1081  ;;  %v5548_v8 = vpop.permute.xlu0 %1065 }
 0x1a8   : > { %8721 = vst [vmem:[#allocation145_spill] sm:$0xff] %v5542_v13 }
 0x1a9   : > { %v5546_v2 = vpop.permute.xlu1 %1061  ;;  %8723 = vst [vmem:[#allocation147_spill] sm:$0xff] %v5548_v8  ;;  %v8763_v8 = vld [vmem:[#allocation98_spill] sm:$0xff] }
 0x1aa   : > { %8722 = vst [vmem:[#allocation146_spill] sm:$0xff] %v5546_v2  ;;  %v579_v2 = vld [vmem:[#allocation2 + $0x109] sm:$0xff] }
 0x1ad   : > { %1217 = vrot.lane.b32.xlu2 %v5120_v44, %s4575_s28  ;;  %1219 = vrot.lane.b32.xlu0 %v8725_v3, %s4575_s28  ;;  %v8731_v44 = vld [vmem:[#allocation57_spill] sm:$0xff] }
 0x1ae   : > { %v5574_v3 = vld [vmem:[#allocation2 + $0x182] sm:$0xff] }
 0x1af   : > { %1215 = vrot.lane.b32.xlu1 %v5106_v9, %s4575_s28  ;;  %v5554_v5 = vpop.permute.xlu2 %1087  ;;  %v5560_v37 = vpop.permute.xlu0 %1071 }
 0x1b0   : > { %8724 = vst [vmem:[#allocation148_spill] sm:$0xff] %v5554_v5 }
 0x1b1   : > { %v5558_v4 = vpop.permute.xlu1 %1067  ;;  %8727 = vst [vmem:[#allocation149_spill] sm:$0xff] %v5560_v37  ;;  %v529_v37 = vld [vmem:[#allocation2 + $0x30] sm:$0xff] }
 0x1b2   : > { %8726 = vst [vmem:[#allocation52_spill] sm:$0xff] %v5558_v4 }
 0x1b5   : > { %1223 = vrot.lane.b32.xlu2 %v8728_v32, %s4575_s28  ;;  %1225 = vrot.lane.b32.xlu0 %v8731_v44, %s4575_s28  ;;  %v8733_v32 = vld [vmem:[#allocation59_spill] sm:$0xff] }
 0x1b7   : > { %1221 = vrot.lane.b32.xlu1 %v8729_v6, %s4575_s28  ;;  %v5566_v23 = vpop.permute.xlu2 %1093  ;;  %v5572_v49 = vpop.permute.xlu0 %1077 }
 0x1b8   : > { %8730 = vst [vmem:[#allocation58_spill] sm:$0xff] %v5566_v23 }
 0x1b9   : > { %v5570_v9 = vpop.permute.xlu1 %1073  ;;  %8732 = vst [vmem:[#allocation53_spill] sm:$0xff] %v5572_v49  ;;  %v616_v49 = vld [vmem:[#allocation2 + $0x142] sm:$0xff] }
 0x1bd   : > { %1229 = vrot.lane.b32.xlu2 %v5574_v3, %s4575_s28  ;;  %1231 = vrot.lane.b32.xlu0 %v5578_v63, %s4575_s28 }
 0x1bf   : > { %1227 = vrot.lane.b32.xlu1 %v8733_v32, %s4575_s28  ;;  %v5582_v6 = vpop.permute.xlu2 %1099  ;;  %v5588_v23 = vpop.permute.xlu0 %1083 }
 0x1c0   : > { %8734 = vst [vmem:[#allocation57_spill] sm:$0xff] %v5582_v6 }
 0x1c1   : > { %v5586_v44 = vpop.permute.xlu1 %1079  ;;  %8736 = vst [vmem:[#allocation150_spill] sm:$0xff] %v5588_v23  ;;  %v564_v23 = vld [vmem:[#allocation2 + $0x51] sm:$0xff] }
 0x1c2   : > { %8735 = vst [vmem:[#allocation59_spill] sm:$0xff] %v5586_v44  ;;  %v601_v44 = vld [vmem:[#allocation2 + $0x92] sm:$0xff] }
 0x1c5   : > { %1299 = vrot.lane.b32.xlu2 %v530_v12, %s4576_s29  ;;  %1301 = vrot.lane.b32.xlu0 %v5163_v27, %s4576_s29  ;;  %v8740_v12 = vld [vmem:[#allocation70_spill] sm:$0xff]  ;;  %v536_v27 = vld [vmem:[#allocation2 + $0x80] sm:$0xff] }
 0x1c7   : > { %1297 = vrot.lane.b32.xlu1 %v529_v37, %s4576_s29  ;;  %v5592_v55 = vpop.permute.xlu2 %1169  ;;  %v5598_v6 = vpop.permute.xlu0 %1089 }
 0x1c8   : > { %8738 = vst [vmem:[#allocation152_spill] sm:$0xff] %v5598_v6  ;;  %v8743_v6 = vld [vmem:[#allocation71_spill] sm:$0xff] }
 0x1c9   : > { %v5596_v32 = vpop.permute.xlu1 %1085 }
 0x1ca   : > { %8737 = vst [vmem:[#allocation151_spill] sm:$0xff] %v5596_v32 }
 0x1cd   : > { %1305 = vrot.lane.b32.xlu2 %v533_v53, %s4576_s29  ;;  %1307 = vrot.lane.b32.xlu0 %v8740_v12, %s4576_s29  ;;  %v8744_v53 = vld [vmem:[#allocation75_spill] sm:$0xff]  ;;  %v539_v12 = vld [vmem:[#allocation2 + $0xa8] sm:$0xff] }
 0x1cf   : > { %1303 = vrot.lane.b32.xlu1 %v8739_v33, %s4576_s29  ;;  %v5603_v26 = vpop.permute.xlu2 %1175  ;;  %v5609_v43 = vpop.permute.xlu0 %1095 }
 0x1d0   : > { %8742 = vst [vmem:[#allocation70_spill] sm:$0xff] %v5609_v43  ;;  %v8747_v43 = vld [vmem:[#allocation76_spill] sm:$0xff] }
 0x1d1   : > { %v5607_v37 = vpop.permute.xlu1 %1091 }
 0x1d2   : > { %8741 = vst [vmem:[#allocation66_spill] sm:$0xff] %v5607_v37 }
 0x1d5   : > { %1311 = vrot.lane.b32.xlu2 %v536_v27, %s4576_s29  ;;  %1313 = vrot.lane.b32.xlu0 %v8744_v53, %s4576_s29  ;;  %v8749_v27 = vld [vmem:[#allocation80_spill] sm:$0xff]  ;;  %v542_v53 = vld [vmem:[#allocation2 + $0xc8] sm:$0xff] }
 0x1d7   : > { %1309 = vrot.lane.b32.xlu1 %v8743_v6, %s4576_s29  ;;  %v5614_v54 = vpop.permute.xlu2 %1181  ;;  %v5620_v4 = vpop.permute.xlu0 %1101 }
 0x1d8   : > { %8746 = vst [vmem:[#allocation75_spill] sm:$0xff] %v5620_v4  ;;  %v8751_v4 = vld [vmem:[#allocation81_spill] sm:$0xff] }
 0x1d9   : > { %v5618_v33 = vpop.permute.xlu1 %1097 }
 0x1da   : > { %8745 = vst [vmem:[#allocation71_spill] sm:$0xff] %v5618_v33 }
 0x1dd   : > { %1317 = vrot.lane.b32.xlu2 %v539_v12, %s4576_s29  ;;  %1319 = vrot.lane.b32.xlu0 %v8749_v27, %s4576_s29  ;;  %v8753_v12 = vld [vmem:[#allocation85_spill] sm:$0xff]  ;;  %v545_v27 = vld [vmem:[#allocation2 + $0xf0] sm:$0xff] }
 0x1df   : > { %1315 = vrot.lane.b32.xlu1 %v8747_v43, %s4576_s29  ;;  %v5625_v37 = vpop.permute.xlu2 %1187  ;;  %v5631_v5 = vpop.permute.xlu0 %1171 }
 0x1e0   : > { %8748 = vst [vmem:[#allocation76_spill] sm:$0xff] %v5625_v37 }
 0x1e1   : > { %v5629_v6 = vpop.permute.xlu1 %1103 }
 0x1e2   : > { %8750 = vst [vmem:[#allocation80_spill] sm:$0xff] %v5629_v6  ;;  %v8754_v6 = vld [vmem:[#allocation88_spill] sm:$0xff] }
 0x1e5   : > { %1323 = vrot.lane.b32.xlu2 %v542_v53, %s4576_s29  ;;  %1325 = vrot.lane.b32.xlu0 %v8753_v12, %s4576_s29  ;;  %v8756_v53 = vld [vmem:[#allocation92_spill] sm:$0xff]  ;;  %v548_v12 = vld [vmem:[#allocation2 + $0x110] sm:$0xff] }
 0x1e7   : > { %1321 = vrot.lane.b32.xlu1 %v8751_v4, %s4576_s29  ;;  %v5636_v33 = vpop.permute.xlu2 %1193  ;;  %v5642_v24 = vpop.permute.xlu0 %1177 }
 0x1e8   : > { %8752 = vst [vmem:[#allocation81_spill] sm:$0xff] %v5636_v33  ;;  %v8757_v33 = vld [vmem:[#allocation93_spill] sm:$0xff] }
 0x1e9   : > { %v5640_v43 = vpop.permute.xlu1 %1173 }
 0x1ed   : > { %1329 = vrot.lane.b32.xlu2 %v545_v27, %s4576_s29  ;;  %1331 = vrot.lane.b32.xlu0 %v8756_v53, %s4576_s29  ;;  %v8759_v27 = vld [vmem:[#allocation97_spill] sm:$0xff]  ;;  %v8762_v53 = vld [vmem:[#allocation103_spill] sm:$0xff] }
 0x1ef   : > { %1327 = vrot.lane.b32.xlu1 %v8754_v6, %s4576_s29  ;;  %v5647_v34 = vpop.permute.xlu2 %1199  ;;  %v5653_v18 = vpop.permute.xlu0 %1183 }
 0x1f0   : > { %8755 = vst [vmem:[#allocation85_spill] sm:$0xff] %v5647_v34 }
 0x1f1   : > { %v5651_v4 = vpop.permute.xlu1 %1179 }
 0x1f5   : > { %1335 = vrot.lane.b32.xlu2 %v548_v12, %s4576_s29  ;;  %1337 = vrot.lane.b32.xlu0 %v8759_v27, %s4576_s29  ;;  %v8765_v12 = vld [vmem:[#allocation102_spill] sm:$0xff]  ;;  %v8768_v27 = vld [vmem:[#allocation104_spill] sm:$0xff] }
 0x1f7   : > { %1333 = vrot.lane.b32.xlu1 %v8757_v33, %s4576_s29  ;;  %v5658_v32 = vpop.permute.xlu2 %1205  ;;  %v5664_v34 = vpop.permute.xlu0 %1189 }
 0x1f8   : > { %8758 = vst [vmem:[#allocation88_spill] sm:$0xff] %v5658_v32  ;;  %v1912_v32 = vld [vmem:[%s8494_s1] sm:$0xff] }
 0x1f9   : > { %v5662_v6 = vpop.permute.xlu1 %1185  ;;  %8761 = vst [vmem:[#allocation93_spill] sm:$0xff] %v5664_v34  ;;  %v574_v34 = vld [vmem:[#allocation2 + $0xc9] sm:$0xff] }
 0x1fa   : > { %8760 = vst [vmem:[#allocation92_spill] sm:$0xff] %v5662_v6  ;;  %v1913_v6 = vld [vmem:[%s8494_s1 + $0x8] sm:$0xff] }
 0x1fd   : > { %1341 = vrot.lane.b32.xlu2 %v8762_v53, %s4576_s29  ;;  %1343 = vrot.lane.b32.xlu0 %v8765_v12, %s4576_s29  ;;  %v8770_v53 = vld [vmem:[#allocation108_spill] sm:$0xff] }
 0x1ff   : > { %1339 = vrot.lane.b32.xlu1 %v8763_v8, %s4576_s29  ;;  %v5670_v52 = vpop.permute.xlu2 %1211  ;;  %v5676_v50 = vpop.permute.xlu0 %1195 }
 0x200   : > { %8764 = vst [vmem:[#allocation97_spill] sm:$0xff] %v5670_v52 }
 0x201   : > { %v5674_v33 = vpop.permute.xlu1 %1191  ;;  %8767 = vst [vmem:[#allocation98_spill] sm:$0xff] %v5676_v50  ;;  %v559_v50 = vld [vmem:[#allocation2 + $0x198] sm:$0xff] }
 0x202   : > { %8766 = vst [vmem:[#allocation103_spill] sm:$0xff] %v5674_v33  ;;  %v562_v33 = vld [vmem:[#allocation2 + $0x39] sm:$0xff] }
 0x205   : > { %1347 = vrot.lane.b32.xlu2 %v5298_v10, %s4576_s29  ;;  %1349 = vrot.lane.b32.xlu0 %v8770_v53, %s4576_s29  ;;  %v8773_v10 = vld [vmem:[#allocation112_spill] sm:$0xff]  ;;  %v560_v53 = vld [vmem:[#allocation2 + $0x1a0] sm:$0xff] }
 0x207   : > { %1345 = vrot.lane.b32.xlu1 %v8768_v27, %s4576_s29  ;;  %v5682_v1 = vpop.permute.xlu2 %1217  ;;  %v5688_v52 = vpop.permute.xlu0 %1201 }
 0x208   : > { %8769 = vst [vmem:[#allocation102_spill] sm:$0xff] %v5682_v1 }
 0x209   : > { %v5686_v8 = vpop.permute.xlu1 %1197 }
 0x20a   : > { %8771 = vst [vmem:[#allocation104_spill] sm:$0xff] %v5686_v8  ;;  %v561_v8 = vld [vmem:[#allocation2 + $0x31] sm:$0xff] }
 0x20d   : > { %1353 = vrot.lane.b32.xlu2 %v5316_v11, %s4576_s29  ;;  %1355 = vrot.lane.b32.xlu0 %v8773_v10, %s4576_s29  ;;  %v563_v10 = vld [vmem:[#allocation2 + $0x49] sm:$0xff] }
 0x20f   : > { %1351 = vrot.lane.b32.xlu1 %v5304_v0, %s4576_s29  ;;  %v5694_v12 = vpop.permute.xlu2 %1223  ;;  %v5700_v1 = vpop.permute.xlu0 %1207 }
 0x210   : > { %8772 = vst [vmem:[#allocation108_spill] sm:$0xff] %v5694_v12 }
 0x211   : > { %v5698_v27 = vpop.permute.xlu1 %1203  ;;  %8774 = vst [vmem:[#allocation112_spill] sm:$0xff] %v5700_v1  ;;  %v585_v1 = vld [vmem:[#allocation2 + $0x151] sm:$0xff] }
 0x215   : > { %1359 = vrot.lane.b32.xlu2 %v560_v53, %s4576_s29  ;;  %1425 = vrot.lane.b32.xlu0 %v561_v8, %s4577_s30  ;;  %v566_v8 = vld [vmem:[#allocation2 + $0x69] sm:$0xff] }
 0x217   : > { %1357 = vrot.lane.b32.xlu1 %v559_v50, %s4576_s29  ;;  %v5704_v11 = vpop.permute.xlu2 %1229  ;;  %v5709_v12 = vpop.permute.xlu0 %1213 }
 0x218   : > { %8775 = vst [vmem:[#allocation153_spill] sm:$0xff] %v5704_v11 }
 0x219   : > { %v5707_v0 = vpop.permute.xlu1 %1209  ;;  %8777 = vst [vmem:[#allocation155_spill] sm:$0xff] %v5709_v12  ;;  %v567_v12 = vld [vmem:[#allocation2 + $0x79] sm:$0xff] }
 0x21a   : > { %8776 = vst [vmem:[#allocation154_spill] sm:$0xff] %v5707_v0  ;;  %v571_v0 = vld [vmem:[#allocation2 + $0xa9] sm:$0xff] }
 0x21d   : > { %1429 = vrot.lane.b32.xlu2 %v563_v10, %s4577_s30  ;;  %1431 = vrot.lane.b32.xlu0 %v564_v23, %s4577_s30  ;;  %v569_v23 = vld [vmem:[#allocation2 + $0x91] sm:$0xff] }
 0x21f   : > { %1427 = vrot.lane.b32.xlu1 %v562_v33, %s4577_s30  ;;  %v5713_v53 = vpop.permute.xlu2 %1299  ;;  %v5718_v11 = vpop.permute.xlu0 %1219 }
 0x220   : > { %8779 = vst [vmem:[#allocation157_spill] sm:$0xff] %v5718_v11  ;;  %v570_v11 = vld [vmem:[#allocation2 + $0x99] sm:$0xff] }
 0x221   : > { %v5716_v50 = vpop.permute.xlu1 %1215 }
 0x222   : > { %8778 = vst [vmem:[#allocation156_spill] sm:$0xff] %v5716_v50 }
 0x225   : > { %1435 = vrot.lane.b32.xlu2 %v566_v8, %s4577_s30  ;;  %1437 = vrot.lane.b32.xlu0 %v567_v12, %s4577_s30  ;;  %v572_v12 = vld [vmem:[#allocation2 + $0xb1] sm:$0xff] }
 0x227   : > { %1433 = vrot.lane.b32.xlu1 %v565_v31, %s4577_s30  ;;  %v5722_v61 = vpop.permute.xlu2 %1305  ;;  %v5727_v10 = vpop.permute.xlu0 %1225 }
 0x228   : > { %8781 = vst [vmem:[#allocation159_spill] sm:$0xff] %v5727_v10  ;;  %v573_v10 = vld [vmem:[#allocation2 + $0xc1] sm:$0xff] }
 0x229   : > { %v5725_v33 = vpop.permute.xlu1 %1221 }
 0x22a   : > { %8780 = vst [vmem:[#allocation158_spill] sm:$0xff] %v5725_v33 }
 0x22d   : > { %1441 = vrot.lane.b32.xlu2 %v569_v23, %s4577_s30  ;;  %1443 = vrot.lane.b32.xlu0 %v570_v11, %s4577_s30  ;;  %v575_v11 = vld [vmem:[#allocation2 + $0xd9] sm:$0xff] }
 0x22f   : > { %1439 = vrot.lane.b32.xlu1 %v568_v51, %s4577_s30  ;;  %v5731_v50 = vpop.permute.xlu2 %1311  ;;  %v5736_v8 = vpop.permute.xlu0 %1231 }
 0x230   : > { %8783 = vst [vmem:[#allocation161_spill] sm:$0xff] %v5736_v8  ;;  %v576_v8 = vld [vmem:[#allocation2 + $0xe1] sm:$0xff] }
 0x231   : > { %v5734_v31 = vpop.permute.xlu1 %1227 }
 0x232   : > { %8782 = vst [vmem:[#allocation160_spill] sm:$0xff] %v5734_v31 }
 0x235   : > { %1447 = vrot.lane.b32.xlu2 %v572_v12, %s4577_s30  ;;  %1449 = vrot.lane.b32.xlu0 %v573_v10, %s4577_s30  ;;  %v578_v10 = vld [vmem:[#allocation2 + $0xf9] sm:$0xff] }
 0x237   : > { %1445 = vrot.lane.b32.xlu1 %v571_v0, %s4577_s30  ;;  %v5740_v33 = vpop.permute.xlu2 %1317  ;;  %v5745_v23 = vpop.permute.xlu0 %1301 }
 0x238   : > { %8784 = vst [vmem:[#allocation162_spill] sm:$0xff] %v5740_v33  ;;  %v577_v33 = vld [vmem:[#allocation2 + $0xf1] sm:$0xff] }
 0x239   : > { %v5743_v51 = vpop.permute.xlu1 %1297 }
 0x23d   : > { %1453 = vrot.lane.b32.xlu2 %v575_v11, %s4577_s30  ;;  %1455 = vrot.lane.b32.xlu0 %v576_v8, %s4577_s30  ;;  %v581_v8 = vld [vmem:[#allocation2 + $0x121] sm:$0xff] }
 0x23f   : > { %1451 = vrot.lane.b32.xlu1 %v574_v34, %s4577_s30  ;;  %v5749_v31 = vpop.permute.xlu2 %1323  ;;  %v5754_v12 = vpop.permute.xlu0 %1307 }
 0x240   : > { %8785 = vst [vmem:[#allocation163_spill] sm:$0xff] %v5749_v31  ;;  %v580_v31 = vld [vmem:[#allocation2 + $0x111] sm:$0xff] }
 0x241   : > { %v5752_v0 = vpop.permute.xlu1 %1303 }
 0x245   : > { %1459 = vrot.lane.b32.xlu2 %v578_v10, %s4577_s30  ;;  %1461 = vrot.lane.b32.xlu0 %v579_v2, %s4577_s30  ;;  %v584_v2 = vld [vmem:[#allocation2 + $0x141] sm:$0xff] }
 0x247   : > { %1457 = vrot.lane.b32.xlu1 %v577_v33, %s4577_s30  ;;  %v5758_v13 = vpop.permute.xlu2 %1329  ;;  %v5763_v11 = vpop.permute.xlu0 %1313 }
 0x248   : > { %8786 = vst [vmem:[#allocation164_spill] sm:$0xff] %v5763_v11  ;;  %v613_v11 = vld [vmem:[#allocation2 + $0x122] sm:$0xff] }
 0x249   : > { %v5761_v34 = vpop.permute.xlu1 %1309 }
 0x24d   : > { %1465 = vrot.lane.b32.xlu2 %v581_v8, %s4577_s30  ;;  %1467 = vrot.lane.b32.xlu0 %v582_v59, %s4577_s30  ;;  %v587_v59 = vld [vmem:[#allocation2 + $0x169] sm:$0xff] }
 0x24f   : > { %1463 = vrot.lane.b32.xlu1 %v580_v31, %s4577_s30  ;;  %v5767_v28 = vpop.permute.xlu2 %1335  ;;  %v5772_v10 = vpop.permute.xlu0 %1319 }
 0x250   : > { %8787 = vst [vmem:[#allocation165_spill] sm:$0xff] %v5767_v28  ;;  %v586_v28 = vld [vmem:[#allocation2 + $0x159] sm:$0xff] }
 0x251   : > { %v5770_v33 = vpop.permute.xlu1 %1315  ;;  %8789 = vst [vmem:[#allocation167_spill] sm:$0xff] %v5772_v10  ;;  %v588_v10 = vld [vmem:[#allocation2 + $0x171] sm:$0xff] }
 0x252   : > { %8788 = vst [vmem:[#allocation166_spill] sm:$0xff] %v5770_v33 }
 0x255   : > { %1471 = vrot.lane.b32.xlu2 %v584_v2, %s4577_s30  ;;  %1473 = vrot.lane.b32.xlu0 %v585_v1, %s4577_s30  ;;  %v591_v1 = vld [vmem:[#allocation2 + $0x199] sm:$0xff] }
 0x257   : > { %1469 = vrot.lane.b32.xlu1 %v583_v19, %s4577_s30  ;;  %v5776_v37 = vpop.permute.xlu2 %1341  ;;  %v5781_v8 = vpop.permute.xlu0 %1325 }
 0x258   : > { %8790 = vst [vmem:[#allocation168_spill] sm:$0xff] %v5776_v37  ;;  %v597_v37 = vld [vmem:[#allocation2 + $0x62] sm:$0xff] }
 0x259   : > { %v5779_v31 = vpop.permute.xlu1 %1321  ;;  %8792 = vst [vmem:[#allocation170_spill] sm:$0xff] %v5781_v8 }
 0x25a   : > { %8791 = vst [vmem:[#allocation169_spill] sm:$0xff] %v5779_v31  ;;  %v595_v31 = vld [vmem:[#allocation2 + $0x4a] sm:$0xff] }
 0x25d   : > { %1477 = vrot.lane.b32.xlu2 %v587_v59, %s4577_s30  ;;  %1479 = vrot.lane.b32.xlu0 %v588_v10, %s4577_s30  ;;  %v593_v10 = vld [vmem:[#allocation2 + $0x32] sm:$0xff] }
 0x25f   : > { %1475 = vrot.lane.b32.xlu1 %v586_v28, %s4577_s30  ;;  %v5785_v33 = vpop.permute.xlu2 %1347  ;;  %v5790_v2 = vpop.permute.xlu0 %1331 }
 0x260   : > { %8793 = vst [vmem:[#allocation171_spill] sm:$0xff] %v5785_v33  ;;  %v592_v33 = vld [vmem:[#allocation2 + $0x1a1] sm:$0xff] }
 0x261   : > { %v5788_v19 = vpop.permute.xlu1 %1327 }
 0x262   : > { %8794 = vst [vmem:[#allocation172_spill] sm:$0xff] %v5788_v19  ;;  %v594_v19 = vld [vmem:[#allocation2 + $0x3a] sm:$0xff] }
 0x265   : > { %1483 = vrot.lane.b32.xlu2 %v5452_v29, %s4577_s30  ;;  %1485 = vrot.lane.b32.xlu0 %v591_v1, %s4577_s30  ;;  %v596_v1 = vld [vmem:[#allocation2 + $0x52] sm:$0xff] }
 0x267   : > { %1481 = vrot.lane.b32.xlu1 %v5440_v56, %s4577_s30  ;;  %v5796_v8 = vpop.permute.xlu2 %1353  ;;  %v5801_v59 = vpop.permute.xlu0 %1337 }
 0x268   : > { %8795 = vst [vmem:[#allocation173_spill] sm:$0xff] %v5796_v8 }
 0x269   : > { %v5799_v28 = vpop.permute.xlu1 %1333  ;;  %8797 = vst [vmem:[#allocation175_spill] sm:$0xff] %v5801_v59 }
 0x26a   : > { %8796 = vst [vmem:[#allocation174_spill] sm:$0xff] %v5799_v28 }
 0x26d   : > { %1553 = vrot.lane.b32.xlu2 %v593_v10, %s4578_s6  ;;  %1555 = vrot.lane.b32.xlu0 %v594_v19, %s4578_s6  ;;  %v599_v19 = vld [vmem:[#allocation2 + $0x7a] sm:$0xff] }
 0x26f   : > { %1487 = vrot.lane.b32.xlu1 %v592_v33, %s4577_s30  ;;  %v5805_v29 = vpop.permute.xlu2 %1359  ;;  %v5810_v8 = vpop.permute.xlu0 %1343 }
 0x270   : > { %8798 = vst [vmem:[#allocation176_spill] sm:$0xff] %v5805_v29  ;;  %v598_v29 = vld [vmem:[#allocation2 + $0x6a] sm:$0xff] }
 0x271   : > { %v5808_v56 = vpop.permute.xlu1 %1339  ;;  %8800 = vst [vmem:[#allocation178_spill] sm:$0xff] %v5810_v8  ;;  %v600_v8 = vld [vmem:[#allocation2 + $0x82] sm:$0xff] }
 0x272   : > { %8799 = vst [vmem:[#allocation177_spill] sm:$0xff] %v5808_v56 }
 0x275   : > { %1559 = vrot.lane.b32.xlu2 %v596_v1, %s4578_s6  ;;  %1561 = vrot.lane.b32.xlu0 %v597_v37, %s4578_s6  ;;  %v602_v37 = vld [vmem:[#allocation2 + $0x9a] sm:$0xff] }
 0x277   : > { %1557 = vrot.lane.b32.xlu1 %v595_v31, %s4578_s6  ;;  %v5814_v59 = vpop.permute.xlu2 %1429  ;;  %v5819_v10 = vpop.permute.xlu0 %1349 }
 0x278   : > { %8802 = vst [vmem:[#allocation180_spill] sm:$0xff] %v5819_v10  ;;  %v603_v10 = vld [vmem:[#allocation2 + $0xaa] sm:$0xff] }
 0x279   : > { %v5817_v33 = vpop.permute.xlu1 %1345 }
 0x27a   : > { %8801 = vst [vmem:[#allocation179_spill] sm:$0xff] %v5817_v33 }
 0x27d   : > { %1565 = vrot.lane.b32.xlu2 %v599_v19, %s4578_s6  ;;  %1567 = vrot.lane.b32.xlu0 %v600_v8, %s4578_s6  ;;  %v605_v8 = vld [vmem:[#allocation2 + $0xc2] sm:$0xff] }
 0x27f   : > { %1563 = vrot.lane.b32.xlu1 %v598_v29, %s4578_s6  ;;  %v5823_v56 = vpop.permute.xlu2 %1435  ;;  %v5828_v1 = vpop.permute.xlu0 %1355 }
 0x280   : > { %8804 = vst [vmem:[#allocation182_spill] sm:$0xff] %v5828_v1  ;;  %v606_v1 = vld [vmem:[#allocation2 + $0xca] sm:$0xff] }
 0x281   : > { %v5826_v31 = vpop.permute.xlu1 %1351 }
 0x282   : > { %8803 = vst [vmem:[#allocation181_spill] sm:$0xff] %v5826_v31 }
 0x285   : > { %1571 = vrot.lane.b32.xlu2 %v602_v37, %s4578_s6  ;;  %1573 = vrot.lane.b32.xlu0 %v603_v10, %s4578_s6  ;;  %v608_v10 = vld [vmem:[#allocation2 + $0xe2] sm:$0xff] }
 0x287   : > { %1569 = vrot.lane.b32.xlu1 %v601_v44, %s4578_s6  ;;  %v5832_v33 = vpop.permute.xlu2 %1441  ;;  %v5837_v19 = vpop.permute.xlu0 %1425 }
 0x288   : > { %8805 = vst [vmem:[#allocation183_spill] sm:$0xff] %v5832_v33 }
 0x289   : > { %v5835_v29 = vpop.permute.xlu1 %1357 }
 0x28a   : > { %8806 = vst [vmem:[#allocation184_spill] sm:$0xff] %v5835_v29  ;;  %v609_v29 = vld [vmem:[#allocation2 + $0xf2] sm:$0xff] }
 0x28d   : > { %1577 = vrot.lane.b32.xlu2 %v605_v8, %s4578_s6  ;;  %1579 = vrot.lane.b32.xlu0 %v606_v1, %s4578_s6  ;;  %v1920_v1 = vld [vmem:[%s8494_s1 + $0x40] sm:$0xff] }
 0x28e   : > { %2029 = vmatpush.msra.mxu0 %v1920_v1  ;;  %4473 = vmatpush.msra.mxu2 %v1920_v1  ;;  %v1917_v1 = vld [vmem:[%s8494_s1 + $0x28] sm:$0xff] }
 0x28f   : > { %1575 = vrot.lane.b32.xlu1 %v604_v17, %s4578_s6  ;;  %v5841_v31 = vpop.permute.xlu2 %1447  ;;  %v5846_v37 = vpop.permute.xlu0 %1431 }
 0x290   : > { %8807 = vst [vmem:[#allocation185_spill] sm:$0xff] %v5841_v31  ;;  %v611_v31 = vld [vmem:[#allocation2 + $0x10a] sm:$0xff] }
 0x291   : > { %v5844_v44 = vpop.permute.xlu1 %1427 }
 0x295   : > { %1583 = vrot.lane.b32.xlu2 %v608_v10, %s4578_s6  ;;  %1585 = vrot.lane.b32.xlu0 %v609_v29, %s4578_s6  ;;  %v1919_v10 = vld [vmem:[%s8494_s1 + $0x38] sm:$0xff]  ;;  %v1918_v29 = vld [vmem:[%s8494_s1 + $0x30] sm:$0xff] }
 0x296   : > { %2030 = vmatpush.msra.mxu0 %v1919_v10  ;;  %4474 = vmatpush.msra.mxu2 %v1919_v10 }
 0x297   : > { %1581 = vrot.lane.b32.xlu1 %v607_v48, %s4578_s6  ;;  %v5850_v46 = vpop.permute.xlu2 %1453  ;;  %v5858_v8 = vpop.permute.xlu0 %1437  ;;  %v610_v48 = vld [vmem:[#allocation2 + $0xfa] sm:$0xff] }
 0x298   : > { %8808 = vst [vmem:[#allocation186_spill] sm:$0xff] %v5850_v46  ;;  %v612_v46 = vld [vmem:[#allocation2 + $0x112] sm:$0xff]  ;;  %2031 = vmatpush.msra.mxu0 %v1918_v29  ;;  %4475 = vmatpush.msra.mxu2 %v1918_v29 }
 0x299   : > { %v5853_v17 = vpop.permute.xlu1 %1433  ;;  %v1915_v29 = vld [vmem:[%s8494_s1 + $0x18] sm:$0xff] }
 0x29a   : > { %2032 = vmatpush.msra.mxu0 %v1917_v1  ;;  %4476 = vmatpush.msra.mxu2 %v1917_v1  ;;  %v615_v1 = vld [vmem:[#allocation2 + $0x13a] sm:$0xff] }
 0x29d   : > { %1589 = vrot.lane.b32.xlu2 %v611_v31, %s4578_s6  ;;  %1591 = vrot.lane.b32.xlu0 %v612_v46, %s4578_s6  ;;  %v1916_v31 = vld [vmem:[%s8494_s1 + $0x20] sm:$0xff]  ;;  %v1914_v46 = vld [vmem:[%s8494_s1 + $0x10] sm:$0xff] }
 0x29e   : > { %2033 = vmatpush.msra.mxu0 %v1916_v31  ;;  %4477 = vmatpush.msra.mxu2 %v1916_v31 }
 0x29f   : > { %1587 = vrot.lane.b32.xlu1 %v610_v48, %s4578_s6  ;;  %v5871_v33 = vpop.permute.xlu2 %1459  ;;  %v5879_v10 = vpop.permute.xlu0 %1443  ;;  %v614_v48 = vld [vmem:[#allocation2 + $0x12a] sm:$0xff] }
 0x2a0   : > { %8809 = vst [vmem:[#allocation187_spill] sm:$0xff] %v5879_v10  ;;  %2034 = vmatpush.msra.mxu0 %v1915_v29  ;;  %4478 = vmatpush.msra.mxu2 %v1915_v29 }
 0x2a1   : > { %v5874_v28 = vpop.permute.xlu1 %1439 }
 0x2a2   : > { %2035 = vmatpush.msra.mxu0 %v1914_v46  ;;  %4479 = vmatpush.msra.mxu2 %v1914_v46 }
 0x2a4   : > { %2036 = vmatpush.msra.mxu0 %v1913_v6  ;;  %4480 = vmatpush.msra.mxu2 %v1913_v6  ;;  %v620_v6 = vld [vmem:[#allocation2 + $0x172] sm:$0xff] }
 0x2a5   : > { %1595 = vrot.lane.b32.xlu2 %v614_v48, %s4578_s6  ;;  %1597 = vrot.lane.b32.xlu0 %v615_v1, %s4578_s6  ;;  %v617_v48 = vld [vmem:[#allocation2 + $0x152] sm:$0xff] }
 0x2a6   : > { %2037 = vmatpush.msra.mxu0 %v1912_v32  ;;  %4481 = vmatpush.msra.mxu2 %v1912_v32 }
 0x2a7   : > { %1593 = vrot.lane.b32.xlu1 %v613_v11, %s4578_s6  ;;  %v5892_v10 = vpop.permute.xlu2 %1465  ;;  %v5900_v29 = vpop.permute.xlu0 %1449  ;;  %v618_v11 = vld [vmem:[#allocation2 + $0x15a] sm:$0xff] }
 0x2a8   : > { %8810 = vst [vmem:[#allocation188_spill] sm:$0xff] %v5892_v10  ;;  %v619_v10 = vld [vmem:[#allocation2 + $0x16a] sm:$0xff] }
 0x2a9   : > { %v5895_v31 = vpop.permute.xlu1 %1445  ;;  %8812 = vst [vmem:[#allocation190_spill] sm:$0xff] %v5900_v29 }
 0x2aa   : > { %8811 = vst [vmem:[#allocation189_spill] sm:$0xff] %v5895_v31 }
 0x2ad   : > { %1601 = vrot.lane.b32.xlu2 %v617_v48, %s4578_s6  ;;  %1603 = vrot.lane.b32.xlu0 %v618_v11, %s4578_s6  ;;  %v623_v11 = vld [vmem:[#allocation2 + $0x19a] sm:$0xff] }
 0x2af   : > { %1599 = vrot.lane.b32.xlu1 %v616_v49, %s4578_s6  ;;  %v5904_v46 = vpop.permute.xlu2 %1471  ;;  %v5909_v31 = vpop.permute.xlu0 %1455 }
 0x2b0   : > { %8813 = vst [vmem:[#allocation191_spill] sm:$0xff] %v5904_v46  ;;  %v8819_v46 = vld [vmem:[#allocation63_spill] sm:$0xff] }
 0x2b1   : > { %v5907_v1 = vpop.permute.xlu1 %1451  ;;  %8815 = vst [vmem:[#allocation193_spill] sm:$0xff] %v5909_v31  ;;  %v336_v31 = vld [vmem:[#allocation2] sm:$0xff] }
 0x2b2   : > { %8814 = vst [vmem:[#allocation192_spill] sm:$0xff] %v5907_v1  ;;  %v624_v1 = vld [vmem:[#allocation2 + $0x1a2] sm:$0xff] }
 0x2b5   : > { %1607 = vrot.lane.b32.xlu2 %v620_v6, %s4578_s6  ;;  %1609 = vrot.lane.b32.xlu0 %v5574_v3, %s4578_s6  ;;  %v8818_v3 = vld [vmem:[#allocation36_spill] sm:$0xff] }
 0x2b7   : > { %1605 = vrot.lane.b32.xlu1 %v619_v10, %s4578_s6  ;;  %v5913_v32 = vpop.permute.xlu2 %1477  ;;  %v5919_v48 = vpop.permute.xlu0 %1461 }
 0x2b8   : > { %8816 = vst [vmem:[#allocation194_spill] sm:$0xff] %v5913_v32  ;;  %v1649_v32 = vsel %vm225_vm0, %v336_v31, %v8818_v3 }
 0x2b9   : > { %v5917_v49 = vpop.permute.xlu1 %1457  ;;  %v1682_v29 = vsel %vm1681_vm3, %v1649_v32, %v8819_v46 }
 0x2bd   : > { %1613 = vrot.lane.b32.xlu2 %v623_v11, %s4578_s6  ;;  %1615 = vrot.lane.b32.xlu0 %v624_v1, %s4578_s6 }
 0x2bf   : > { %1611 = vrot.lane.b32.xlu1 %v5578_v63, %s4578_s6  ;;  %v5924_v6 = vpop.permute.xlu2 %1483  ;;  %v5933_v11 = vpop.permute.xlu0 %1467  ;;  %v1715_v63 = vsel %vm1714_vm4, %v1682_v29, %v5374_v30 }
 0x2c0   : > { %8817 = vst [vmem:[#allocation195_spill] sm:$0xff] %v5924_v6  ;;  %v1748_v6 = vsel %vm1747_vm6, %v1715_v63, %v5500_v38 }
 0x2c1   : > { %v5927_v10 = vpop.permute.xlu1 %1463  ;;  %v1781_v1 = vsel %vm1780_vm5, %v1748_v6, %v5592_v55 }
 0x2c2   : > { %v1814_v31 = vsel %vm1813_vm7, %v1781_v1, %v5743_v51  ;;  %v337_v51 = vld [vmem:[#allocation2 + $0x8] sm:$0xff]  ;;  %v8824_v1 = vld [vmem:[#allocation39_spill] sm:$0xff] }
 0x2c3   : > { %v1847_v46 = vsel %vm1846_vm9, %v1814_v31, %v5837_v19  ;;  %v1650_v19 = vsel %vm225_vm0, %v337_v51, %v8824_v1  ;;  %v8825_v31 = vld [vmem:[#allocation79_spill] sm:$0xff] }
 0x2c7   : > { %v1554_v32 = vpop.permute.xlu2 %1553  ;;  %v5949_v38 = vpop.permute.xlu0 %1473 }
 0x2c8   : > { %v1880_v30 = vsel %vm1879_vm8, %v1847_v46, %v1554_v32 }
 0x2c9   : > { %v5945_v3 = vpop.permute.xlu1 %1469  ;;  %4405 = vmatmul.msk.f32.vlgmr.msra.gmra.mxu0 %vm1925_vm10, %v1880_v30 }
 0x2ca   : > { %8820 = vst [vmem:[#allocation36_spill] sm:$0xff] %v5945_v3  ;;  %v1683_v3 = vsel %vm1681_vm3, %v1650_v19, %v8825_v31  ;;  %v4511_v31 = vld [vmem:[#allocation2 + $0x18] sm:$0xff] }
 0x2cb   : > { %v1716_v46 = vsel %vm1714_vm4, %v1683_v3, %v5334_v39 }
 0x2cc   : > { %v1749_v32 = vsel %vm1747_vm6, %v1716_v46, %v5510_v20  ;;  %v8827_v20 = vld [vmem:[#allocation83_spill] sm:$0xff] }
 0x2cd   : > { %v1782_v30 = vsel %vm1780_vm5, %v1749_v32, %v5631_v5 }
 0x2cf   : > { %v5953_v29 = vpop.permute.xlu0 %1479  ;;  %v1560_v46 = vpop.permute.xlu2 %1559 }
 0x2d0   : > { %8821 = vst [vmem:[#allocation63_spill] sm:$0xff] %v5953_v29 }
 0x2d1   : > { %v5951_v55 = vpop.permute.xlu1 %1475 }
 0x2d7   : > { %v5957_v63 = vpop.permute.xlu0 %1485 }
 0x2d8   : > { %8823 = vst [vmem:[#allocation197_spill] sm:$0xff] %v5957_v63  ;;  %v1815_v63 = vsel %vm1813_vm7, %v1782_v30, %v5713_v53 }
 0x2d9   : > { %v5955_v6 = vpop.permute.xlu1 %1481  ;;  %v1848_v51 = vsel %vm1846_vm9, %v1815_v63, %v5844_v44 }
 0x2da   : > { %8822 = vst [vmem:[#allocation196_spill] sm:$0xff] %v5955_v6  ;;  %v8826_v6 = vld [vmem:[#allocation38_spill] sm:$0xff] }
 0x2db   : > { %v1651_v39 = vsel %vm225_vm0, %v4511_v31, %v8826_v6 }
 0x2dc   : > { %v1684_v5 = vsel %vm1681_vm3, %v1651_v39, %v8827_v20  ;;  %v1566_v39 = vpop.permute.xlu2 %1565 }
 0x2dd   : > { %v1717_v3 = vsel %vm1714_vm4, %v1684_v5, %v5376_v35 }
 0x2de   : > { %v1750_v53 = vsel %vm1747_vm6, %v1717_v3, %v5470_v60  ;;  %v8829_v60 = vld [vmem:[#allocation67_spill] sm:$0xff] }
 0x2df   : > { %v1556_v1 = vpop.permute.xlu0 %1555  ;;  %v1783_v44 = vsel %vm1780_vm5, %v1750_v53, %v5640_v43 }
 0x2e0   : > { %v1881_v19 = vsel %vm1879_vm8, %v1848_v51, %v1556_v1  ;;  %v1816_v32 = vsel %vm1813_vm7, %v1783_v44, %v5745_v23  ;;  %v4512_v1 = vld [vmem:[#allocation2 + $0x20] sm:$0xff] }
 0x2e1   : > { %v5969_v29 = vpop.permute.xlu1 %1487  ;;  %4406 = vmatmul.msk.f32.gmra.mxu0 %vm1925_vm10, %v1881_v19  ;;  %v1849_v6 = vsel %vm1846_vm9, %v1816_v32, %v5814_v59  ;;  %v8828_v19 = vld [vmem:[#allocation41_spill] sm:$0xff] }
 0x2e2   : > { %v1652_v35 = vsel %vm225_vm0, %v4512_v1, %v8828_v19 }
 0x2e3   : > { %v1685_v31 = vsel %vm1681_vm3, %v1652_v35, %v8829_v60  ;;  %v4514_v60 = vld [vmem:[#allocation2 + $0x38] sm:$0xff] }
 0x2e4   : > { %v1718_v43 = vsel %vm1714_vm4, %v1685_v31, %v5386_v36  ;;  %v8830_v36 = vld [vmem:[#allocation33_spill] sm:$0xff]  ;;  %v6027_v19 = vpop.permute.xlu2 %1571  ;;  %v8832_v31 = vld [vmem:[#allocation34_spill] sm:$0xff] }
 0x2e5   : > { %v1751_v23 = vsel %vm1747_vm6, %v1718_v43, %v5512_v25  ;;  %v8831_v25 = vld [vmem:[#allocation84_spill] sm:$0xff] }
 0x2e6   : > { %v1784_v59 = vsel %vm1780_vm5, %v1751_v23, %v5603_v26 }
 0x2e7   : > { %v1562_v30 = vpop.permute.xlu0 %1561  ;;  %v1817_v5 = vsel %vm1813_vm7, %v1784_v59, %v5752_v0 }
 0x2e8   : > { %v1850_v3 = vsel %vm1846_vm9, %v1817_v5, %v5846_v37 }
 0x2e9   : > { %v1558_v63 = vpop.permute.xlu1 %1557  ;;  %v1883_v44 = vsel %vm1879_vm8, %v1850_v3, %v1560_v46 }
 0x2ea   : > { %v1882_v51 = vsel %vm1879_vm8, %v1849_v6, %v1558_v63  ;;  %v4513_v63 = vld [vmem:[#allocation2 + $0x30] sm:$0xff] }
 0x2eb   : > { %4407 = vmatmul.msk.f32.gmra.mxu0 %vm1925_vm10, %v1882_v51  ;;  %v1653_v32 = vsel %vm225_vm0, %v4513_v63, %v8830_v36  ;;  %v4515_v63 = vld [vmem:[#allocation2 + $0x48] sm:$0xff] }
 0x2ec   : > { %v1686_v26 = vsel %vm1681_vm3, %v1653_v32, %v8831_v25  ;;  %v8835_v32 = vld [vmem:[#allocation55_spill] sm:$0xff]  ;;  %v6056_v25 = vpop.permute.xlu2 %1577 }
 0x2ed   : > { %v1719_v6 = vsel %vm1714_vm4, %v1686_v26, %v5346_v14 }
 0x2ee   : > { %v1752_v0 = vsel %vm1747_vm6, %v1719_v6, %v5522_v22  ;;  %v1654_v22 = vsel %vm225_vm0, %v4514_v60, %v8832_v31 }
 0x2ef   : > { %v6007_v53 = vpop.permute.xlu0 %1567  ;;  %v1785_v37 = vsel %vm1780_vm5, %v1752_v0, %v5642_v24  ;;  %v8833_v24 = vld [vmem:[#allocation90_spill] sm:$0xff] }
 0x2f0   : > { %v1818_v46 = vsel %vm1813_vm7, %v1785_v37, %v5722_v61  ;;  %v1687_v43 = vsel %vm1681_vm3, %v1654_v22, %v8833_v24  ;;  %v8838_v24 = vld [vmem:[#allocation43_spill] sm:$0xff] }
 0x2f1   : > { %v1564_v20 = vpop.permute.xlu1 %1563  ;;  %v1851_v1 = vsel %vm1846_vm9, %v1818_v46, %v5853_v17  ;;  %v1720_v61 = vsel %vm1714_vm4, %v1687_v43, %v5388_v41  ;;  %v8834_v41 = vld [vmem:[#allocation42_spill] sm:$0xff] }
 0x2f2   : > { %v1884_v14 = vsel %vm1879_vm8, %v1851_v1, %v1562_v30  ;;  %v1753_v17 = vsel %vm1747_vm6, %v1720_v61, %v5482_v15  ;;  %v1655_v36 = vsel %vm225_vm0, %v4515_v63, %v8834_v41  ;;  %v4516_v15 = vld [vmem:[#allocation2 + $0xc0] sm:$0xff]  ;;  %v4518_v61 = vld [vmem:[#allocation2 + $0x50] sm:$0xff] }
 0x2f3   : > { %4408 = vmatmul.msk.f32.gmra.mxu0 %vm1925_vm10, %v1883_v44  ;;  %v1786_v23 = vsel %vm1780_vm5, %v1753_v17, %v5651_v4  ;;  %v1665_v4 = vsel %vm225_vm0, %v4516_v15, %v8835_v32 }
 0x2f4   : > { %v1819_v30 = vsel %vm1813_vm7, %v1786_v23, %v5754_v12  ;;  %v8836_v12 = vld [vmem:[#allocation72_spill] sm:$0xff] }
 0x2f5   : > { %v1852_v5 = vsel %vm1846_vm9, %v1819_v30, %v5823_v56  ;;  %v1688_v26 = vsel %vm1681_vm3, %v1655_v36, %v8836_v12  ;;  %v8837_v56 = vld [vmem:[#allocation107_spill] sm:$0xff] }
 0x2f6   : > { %v1885_v44 = vsel %vm1879_vm8, %v1852_v5, %v1564_v20  ;;  %v1698_v6 = vsel %vm1681_vm3, %v1665_v4, %v8837_v56  ;;  %v1721_v0 = vsel %vm1714_vm4, %v1688_v26, %v5398_v42  ;;  %v6101_v5 = vpop.permute.xlu2 %1583  ;;  %v4519_v4 = vld [vmem:[#allocation2 + $0x60] sm:$0xff]  ;;  %v4520_v26 = vld [vmem:[#allocation2 + $0xd8] sm:$0xff] }
 0x2f7   : > { %v6029_v35 = vpop.permute.xlu0 %1573  ;;  %v1731_v20 = vsel %vm1714_vm4, %v1698_v6, %v5394_v40  ;;  %v1754_v37 = vsel %vm1747_vm6, %v1721_v0, %v5524_v45 }
 0x2f8   : > { %v1764_v46 = vsel %vm1747_vm6, %v1731_v20, %v5570_v9  ;;  %v1787_v1 = vsel %vm1780_vm5, %v1754_v37, %v5614_v54  ;;  %v8846_v37 = vld [vmem:[#allocation53_spill] sm:$0xff] }
 0x2f9   : > { %v6021_v51 = vpop.permute.xlu1 %1569  ;;  %v1820_v42 = vsel %vm1813_vm7, %v1787_v1, %v5761_v34  ;;  %v8840_v34 = vld [vmem:[#allocation91_spill] sm:$0xff]  ;;  %v8847_v1 = vld [vmem:[#allocation88_spill] sm:$0xff] }
 0x2fa   : > { %v1853_v45 = vsel %vm1846_vm9, %v1820_v42, %v5858_v8 }
 0x2fb   : > { %4409 = vmatmul.msk.f32.gmra.mxu0 %vm1925_vm10, %v1884_v14  ;;  %v1797_v14 = vsel %vm1780_vm5, %v1764_v46, %v5688_v52  ;;  %v1886_v54 = vsel %vm1879_vm8, %v1853_v45, %v1566_v39  ;;  %v4517_v52 = vld [vmem:[#allocation2 + $0xc8] sm:$0xff] }
 0x2fc   : > { %v1830_v40 = vsel %vm1813_vm7, %v1797_v14, %v5758_v13  ;;  %v1666_v43 = vsel %vm225_vm0, %v4517_v52, %v8838_v24  ;;  %v8839_v13 = vld [vmem:[#allocation44_spill] sm:$0xff] }
 0x2fd   : > { %v1863_v9 = vsel %vm1846_vm9, %v1830_v40, %v5917_v49  ;;  %v1656_v17 = vsel %vm225_vm0, %v4518_v61, %v8839_v13  ;;  %v8841_v49 = vld [vmem:[#allocation110_spill] sm:$0xff]  ;;  %v8848_v40 = vld [vmem:[#allocation92_spill] sm:$0xff]  ;;  %v8852_v61 = vld [vmem:[#allocation45_spill] sm:$0xff] }
 0x2fe   : > { %v1689_v8 = vsel %vm1681_vm3, %v1656_v17, %v8840_v34  ;;  %v1699_v39 = vsel %vm1681_vm3, %v1666_v43, %v8841_v49  ;;  %v1590_v45 = vpop.permute.xlu2 %1589  ;;  %v4521_v43 = vld [vmem:[#allocation2 + $0x68] sm:$0xff]  ;;  %v4522_v17 = vld [vmem:[#allocation2 + $0xe0] sm:$0xff] }
 0x2ff   : > { %v6049_v3 = vpop.permute.xlu0 %1579  ;;  %v1722_v23 = vsel %vm1714_vm4, %v1689_v8, %v5358_v21  ;;  %v1732_v30 = vsel %vm1714_vm4, %v1699_v39, %v5436_v57  ;;  %v1658_v13 = vsel %vm225_vm0, %v4521_v43, %v8852_v61  ;;  %v8853_v34 = vld [vmem:[#allocation61_spill] sm:$0xff]  ;;  %v8855_v39 = vld [vmem:[#allocation111_spill] sm:$0xff]  ;;  %v8875_v61 = vld [vmem:[#allocation162_spill] sm:$0xff] }
 0x300   : > { %v1755_v63 = vsel %vm1747_vm6, %v1722_v23, %v5534_v7  ;;  %v1668_v8 = vsel %vm225_vm0, %v4522_v17, %v8853_v34  ;;  %v8854_v49 = vld [vmem:[#allocation77_spill] sm:$0xff]  ;;  %v8856_v23 = vld [vmem:[#allocation124_spill] sm:$0xff]  ;;  %v8876_v17 = vld [vmem:[#allocation175_spill] sm:$0xff] }
 0x301   : > { %v6043_v59 = vpop.permute.xlu1 %1575  ;;  %v1788_v41 = vsel %vm1780_vm5, %v1755_v63, %v5653_v18 }
 0x302   : > { %v1821_v21 = vsel %vm1813_vm7, %v1788_v41, %v5731_v50  ;;  %v8843_v50 = vld [vmem:[#allocation56_spill] sm:$0xff] }
 0x303   : > { %4410 = vmatmul.msk.f32.gmra.mxu0 %vm1925_vm10, %v1885_v44  ;;  %v1765_v44 = vsel %vm1747_vm6, %v1732_v30, %v5530_v16  ;;  %v1854_v16 = vsel %vm1846_vm9, %v1821_v21, %v5874_v28  ;;  %v1667_v56 = vsel %vm225_vm0, %v4520_v26, %v8843_v50  ;;  %v8858_v41 = vld [vmem:[#allocation144_spill] sm:$0xff]  ;;  %v8864_v50 = vld [vmem:[#allocation187_spill] sm:$0xff] }
 0x304   : > { %v1798_v36 = vsel %vm1780_vm5, %v1765_v44, %v5698_v27  ;;  %v1887_v7 = vsel %vm1879_vm8, %v1854_v16, %v6007_v53  ;;  %v8842_v27 = vld [vmem:[#allocation35_spill] sm:$0xff]  ;;  %v8857_v44 = vld [vmem:[#allocation125_spill] sm:$0xff]  ;;  %v8861_v16 = vld [vmem:[#allocation112_spill] sm:$0xff] }
 0x305   : > { %v1831_v57 = vsel %vm1813_vm7, %v1798_v36, %v5790_v2  ;;  %v1657_v12 = vsel %vm225_vm0, %v4519_v4, %v8842_v27  ;;  %v8844_v2 = vld [vmem:[#allocation94_spill] sm:$0xff]  ;;  %v8862_v4 = vld [vmem:[#allocation165_spill] sm:$0xff] }
 0x306   : > { %v1864_v32 = vsel %vm1846_vm9, %v1831_v57, %v5871_v33  ;;  %v1700_v28 = vsel %vm1681_vm3, %v1667_v56, %v8844_v2  ;;  %v8845_v33 = vld [vmem:[#allocation95_spill] sm:$0xff]  ;;  %v8860_v57 = vld [vmem:[#allocation76_spill] sm:$0xff] }
 0x307   : > { %v1586_v31 = vpop.permute.xlu0 %1585  ;;  %v1690_v53 = vsel %vm1681_vm3, %v1657_v12, %v8845_v33  ;;  %v1733_v20 = vsel %vm1714_vm4, %v1700_v28, %v5448_v58  ;;  %v8851_v58 = vld [vmem:[#allocation183_spill] sm:$0xff]  ;;  %v8863_v12 = vld [vmem:[#allocation166_spill] sm:$0xff] }
 0x308   : > { %v1896_v22 = vsel %vm1879_vm8, %v1863_v9, %v1586_v31  ;;  %v1723_v6 = vsel %vm1714_vm4, %v1690_v53, %v5400_v47  ;;  %v1766_v46 = vsel %vm1747_vm6, %v1733_v20, %v8846_v37  ;;  %v8849_v9 = vld [vmem:[#allocation164_spill] sm:$0xff]  ;;  %v8850_v47 = vld [vmem:[#allocation174_spill] sm:$0xff]  ;;  %v4523_v53 = vld [vmem:[#allocation2 + $0xf0] sm:$0xff] }
 0x309   : > { %v6075_v60 = vpop.permute.xlu1 %1581  ;;  %4421 = vmatmul.msk.f32.vlgmr.msra.gmra.mxu2 %vm1925_vm10, %v1896_v22  ;;  %v1756_v0 = vsel %vm1747_vm6, %v1723_v6, %v5494_v62  ;;  %v1799_v14 = vsel %vm1780_vm5, %v1766_v46, %v8847_v1  ;;  %v8865_v6 = vld [vmem:[#allocation46_spill] sm:$0xff]  ;;  %v8866_v37 = vld [vmem:[#allocation47_spill] sm:$0xff]  ;;  %v8867_v1 = vld [vmem:[#allocation96_spill] sm:$0xff] }
 0x30a   : > { %v1789_v42 = vsel %vm1780_vm5, %v1756_v0, %v8848_v40  ;;  %v1669_v20 = vsel %vm225_vm0, %v4523_v53, %v8865_v6  ;;  %v4524_v0 = vld [vmem:[#allocation2 + $0x78] sm:$0xff]  ;;  %v8869_v40 = vld [vmem:[#allocation122_spill] sm:$0xff]  ;;  %v1596_v53 = vpop.permute.xlu2 %1595  ;;  %v8889_v6 = vld [vmem:[#allocation167_spill] sm:$0xff] }
 0x30b   : > { %4411 = vmatmul.msk.f32.gmra.mxu0 %vm1925_vm10, %v1886_v54  ;;  %v1822_v31 = vsel %vm1813_vm7, %v1789_v42, %v8849_v9  ;;  %v1832_v54 = vsel %vm1813_vm7, %v1799_v14, %v8850_v47  ;;  %v1659_v46 = vsel %vm225_vm0, %v4524_v0, %v8866_v37  ;;  %v8868_v14 = vld [vmem:[#allocation114_spill] sm:$0xff]  ;;  %v8890_v0 = vld [vmem:[#allocation177_spill] sm:$0xff] }
 0x30c   : > { %v1855_v22 = vsel %vm1846_vm9, %v1822_v31, %v8851_v58  ;;  %v1865_v62 = vsel %vm1846_vm9, %v1832_v54, %v5919_v48  ;;  %v1691_v48 = vsel %vm1681_vm3, %v1658_v13, %v8854_v49  ;;  %v8871_v31 = vld [vmem:[#allocation145_spill] sm:$0xff]  ;;  %v8872_v54 = vld [vmem:[#allocation146_spill] sm:$0xff] }
 0x30d   : > { %v1888_v52 = vsel %vm1879_vm8, %v1855_v22, %v6021_v51  ;;  %v1898_v24 = vsel %vm1879_vm8, %v1865_v62, %v1590_v45  ;;  %v1701_v51 = vsel %vm1681_vm3, %v1668_v8, %v8855_v39  ;;  %v1724_v63 = vsel %vm1714_vm4, %v1691_v48, %v8857_v44  ;;  %v8870_v45 = vld [vmem:[#allocation133_spill] sm:$0xff]  ;;  %v8877_v8 = vld [vmem:[#allocation188_spill] sm:$0xff] }
 0x30e   : > { %v1734_v30 = vsel %vm1714_vm4, %v1701_v51, %v8856_v23  ;;  %v1757_v36 = vsel %vm1747_vm6, %v1724_v63, %v8858_v41  ;;  %v8873_v22 = vld [vmem:[#allocation93_spill] sm:$0xff]  ;;  %v4526_v41 = vld [vmem:[#allocation2 + $0xf8] sm:$0xff] }
 0x30f   : > { %v8878_v48 = vld [vmem:[#allocation189_spill] sm:$0xff] }
 0x310   : > { %v8879_v44 = vld [vmem:[#allocation37_spill] sm:$0xff] }
 0x311   : > { %v1588_v15 = vpop.permute.xlu1 %1587 }
 0x312   : > { %v1897_v18 = vsel %vm1879_vm8, %v1864_v32, %v1588_v15  ;;  %v8859_v15 = vld [vmem:[#allocation59_spill] sm:$0xff]  ;;  %v1790_v32 = vsel %vm1780_vm5, %v1757_v36, %v8860_v57  ;;  %v8880_v36 = vld [vmem:[#allocation62_spill] sm:$0xff] }
 0x313   : > { %4412 = vmatmul.msk.f32.gmra.mxu0 %vm1925_vm10, %v1887_v7  ;;  %4422 = vmatmul.msk.f32.gmra.mxu2 %vm1925_vm10, %v1897_v18  ;;  %v1767_v21 = vsel %vm1747_vm6, %v1734_v30, %v8859_v15  ;;  %v1592_v18 = vpop.permute.xlu0 %1591  ;;  %v1823_v26 = vsel %vm1813_vm7, %v1790_v32, %v8863_v12  ;;  %v4525_v30 = vld [vmem:[#allocation2 + $0x80] sm:$0xff]  ;;  %v1670_v15 = vsel %vm225_vm0, %v4526_v41, %v8880_v36  ;;  %v8882_v32 = vld [vmem:[#allocation100_spill] sm:$0xff] }
 0x314   : > { %v1800_v7 = vsel %vm1780_vm5, %v1767_v21, %v8861_v16  ;;  %v1856_v56 = vsel %vm1846_vm9, %v1823_v26, %v8864_v50  ;;  %v1660_v63 = vsel %vm225_vm0, %v4525_v30, %v8879_v44  ;;  %v8881_v21 = vld [vmem:[#allocation99_spill] sm:$0xff]  ;;  %v8883_v16 = vld [vmem:[#allocation126_spill] sm:$0xff]  ;;  %v8903_v30 = vld [vmem:[#allocation169_spill] sm:$0xff] }
 0x315   : > { %v1833_v27 = vsel %vm1813_vm7, %v1800_v7, %v8862_v4  ;;  %v1889_v28 = vsel %vm1879_vm8, %v1856_v56, %v6027_v19  ;;  %v1702_v19 = vsel %vm1681_vm3, %v1669_v20, %v8868_v14  ;;  %v1703_v57 = vsel %vm1681_vm3, %v1670_v15, %v8881_v21  ;;  %v8886_v26 = vld [vmem:[#allocation150_spill] sm:$0xff]  ;;  %v8887_v56 = vld [vmem:[#allocation97_spill] sm:$0xff]  ;;  %v8905_v36 = vld [vmem:[#allocation36_spill] sm:$0xff] }
 0x316   : > { %v1866_v2 = vsel %vm1846_vm9, %v1833_v27, %v5927_v10  ;;  %v1692_v10 = vsel %vm1681_vm3, %v1659_v46, %v8867_v1  ;;  %v1735_v9 = vsel %vm1714_vm4, %v1702_v19, %v8870_v45  ;;  %v8885_v27 = vld [vmem:[#allocation142_spill] sm:$0xff]  ;;  %v8891_v46 = vld [vmem:[#allocation185_spill] sm:$0xff] }
 0x317   : > { %v1899_v33 = vsel %vm1879_vm8, %v1866_v2, %v1592_v18  ;;  %v1725_v42 = vsel %vm1714_vm4, %v1692_v10, %v8869_v40  ;;  %v1768_v47 = vsel %vm1747_vm6, %v1735_v9, %v8871_v31  ;;  %v8884_v18 = vld [vmem:[#allocation135_spill] sm:$0xff]  ;;  %v4528_v9 = vld [vmem:[#allocation2 + $0x108] sm:$0xff]  ;;  %v8893_v31 = vld [vmem:[#allocation64_spill] sm:$0xff] }
 0x318   : > { %v1758_v58 = vsel %vm1747_vm6, %v1725_v42, %v8872_v54  ;;  %v1736_v4 = vsel %vm1714_vm4, %v1703_v57, %v8884_v18  ;;  %v4527_v40 = vld [vmem:[#allocation2 + $0x90] sm:$0xff]  ;;  %v8892_v42 = vld [vmem:[#allocation48_spill] sm:$0xff]  ;;  %v8894_v54 = vld [vmem:[#allocation82_spill] sm:$0xff] }
 0x319   : > { %v1791_v62 = vsel %vm1780_vm5, %v1758_v58, %v8873_v22  ;;  %v1594_v43 = vpop.permute.xlu1 %1593  ;;  %v1769_v50 = vsel %vm1747_vm6, %v1736_v4, %v8886_v26  ;;  %v1661_v45 = vsel %vm225_vm0, %v4527_v40, %v8892_v42  ;;  %v8895_v58 = vld [vmem:[#allocation115_spill] sm:$0xff]  ;;  %v8907_v18 = vld [vmem:[#allocation50_spill] sm:$0xff]  ;;  %v8909_v26 = vld [vmem:[#allocation116_spill] sm:$0xff] }
 0x31a   : > { %v1824_v13 = vsel %vm1813_vm7, %v1791_v62, %v8875_v61  ;;  %v1802_v2 = vsel %vm1780_vm5, %v1769_v50, %v8887_v56  ;;  %v8896_v22 = vld [vmem:[#allocation127_spill] sm:$0xff]  ;;  %v8917_v40 = vld [vmem:[#allocation178_spill] sm:$0xff] }
 0x31b   : > { %4413 = vmatmul.msk.f32.gmra.mxu0 %vm1925_vm10, %v1888_v52  ;;  %4423 = vmatmul.msk.f32.gmra.mxu2 %vm1925_vm10, %v1898_v24  ;;  %v8874_v52 = vld [vmem:[#allocation154_spill] sm:$0xff]  ;;  %v1857_v39 = vsel %vm1846_vm9, %v1824_v13, %v8878_v48  ;;  %v1835_v37 = vsel %vm1813_vm7, %v1802_v2, %v8890_v0  ;;  %v8899_v13 = vld [vmem:[#allocation151_spill] sm:$0xff]  ;;  %v8911_v2 = vld [vmem:[#allocation136_spill] sm:$0xff] }
 0x31c   : > { %v1801_v24 = vsel %vm1780_vm5, %v1768_v47, %v8874_v52  ;;  %v1890_v51 = vsel %vm1879_vm8, %v1857_v39, %v6029_v35  ;;  %v1693_v35 = vsel %vm1681_vm3, %v1660_v63, %v8882_v32  ;;  %v1868_v10 = vsel %vm1846_vm9, %v1835_v37, %v5933_v11  ;;  %v8897_v52 = vld [vmem:[#allocation128_spill] sm:$0xff]  ;;  %v1598_v39 = vpop.permute.xlu0 %1597  ;;  %v8904_v63 = vld [vmem:[#allocation190_spill] sm:$0xff]  ;;  %v4529_v32 = vld [vmem:[#allocation2 + $0x110] sm:$0xff] }
 0x31d   : > { %v1834_v34 = vsel %vm1813_vm7, %v1801_v24, %v8876_v17  ;;  %v1726_v7 = vsel %vm1714_vm4, %v1693_v35, %v8883_v16  ;;  %v1901_v19 = vsel %vm1879_vm8, %v1868_v10, %v1596_v53  ;;  %v1671_v47 = vsel %vm225_vm0, %v4528_v9, %v8893_v31  ;;  %v8906_v35 = vld [vmem:[#allocation49_spill] sm:$0xff]  ;;  %v8910_v50 = vld [vmem:[#allocation123_spill] sm:$0xff]  ;;  %v8914_v0 = vld [vmem:[#allocation98_spill] sm:$0xff] }
 0x31e   : > { %v1867_v49 = vsel %vm1846_vm9, %v1834_v34, %v8877_v8  ;;  %v1759_v12 = vsel %vm1747_vm6, %v1726_v7, %v8885_v27  ;;  %v1694_v11 = vsel %vm1681_vm3, %v1661_v45, %v8894_v54  ;;  %v8900_v34 = vld [vmem:[#allocation81_spill] sm:$0xff]  ;;  %v1672_v16 = vsel %vm225_vm0, %v4529_v32, %v8906_v35  ;;  %v4530_v7 = vld [vmem:[#allocation2 + $0x98] sm:$0xff]  ;;  %v8918_v45 = vld [vmem:[#allocation191_spill] sm:$0xff] }
 0x31f   : > { %v1900_v23 = vsel %vm1879_vm8, %v1867_v49, %v1594_v43  ;;  %v1727_v24 = vsel %vm1714_vm4, %v1694_v11, %v8897_v52  ;;  %v8898_v43 = vld [vmem:[#allocation147_spill] sm:$0xff]  ;;  %v1662_v4 = vsel %vm225_vm0, %v4530_v7, %v8907_v18  ;;  %v8908_v27 = vld [vmem:[#allocation101_spill] sm:$0xff]  ;;  %v8919_v31 = vld [vmem:[#allocation192_spill] sm:$0xff] }
 0x320   : > { %v1760_v61 = vsel %vm1747_vm6, %v1727_v24, %v8898_v43  ;;  %v8901_v49 = vld [vmem:[#allocation155_spill] sm:$0xff]  ;;  %v4532_v52 = vld [vmem:[#allocation2 + $0x120] sm:$0xff]  ;;  %v8930_v32 = vld [vmem:[#allocation170_spill] sm:$0xff] }
 0x321   : > { %v1793_v8 = vsel %vm1780_vm5, %v1760_v61, %v8900_v34  ;;  %v1600_v10 = vpop.permute.xlu1 %1599  ;;  %v8921_v24 = vld [vmem:[#allocation65_spill] sm:$0xff]  ;;  %v8932_v18 = vld [vmem:[#allocation186_spill] sm:$0xff] }
 0x322   : > { %v1826_v44 = vsel %vm1813_vm7, %v1793_v8, %v8903_v30  ;;  %v1673_v43 = vsel %vm225_vm0, %v4532_v52, %v8921_v24  ;;  %v8924_v34 = vld [vmem:[#allocation129_spill] sm:$0xff]  ;;  %v8927_v30 = vld [vmem:[#allocation152_spill] sm:$0xff] }
 0x323   : > { %4414 = vmatmul.msk.f32.gmra.mxu0 %vm1925_vm10, %v1889_v28  ;;  %4424 = vmatmul.msk.f32.gmra.mxu2 %vm1925_vm10, %v1899_v33  ;;  %v8888_v28 = vld [vmem:[#allocation103_spill] sm:$0xff]  ;;  %v1859_v41 = vsel %vm1846_vm9, %v1826_v44, %v8904_v63 }
 0x324   : > { %v1792_v33 = vsel %vm1780_vm5, %v1759_v12, %v8888_v28  ;;  %v1892_v21 = vsel %vm1879_vm8, %v1859_v41, %v6056_v25  ;;  %v1695_v12 = vsel %vm1681_vm3, %v1662_v4, %v8908_v27  ;;  %v1705_v25 = vsel %vm1681_vm3, %v1672_v16, %v8909_v26  ;;  %v8928_v41 = vld [vmem:[#allocation102_spill] sm:$0xff]  ;;  %v8931_v16 = vld [vmem:[#allocation179_spill] sm:$0xff] }
 0x325   : > { %v1825_v20 = vsel %vm1813_vm7, %v1792_v33, %v8889_v6  ;;  %v1728_v56 = vsel %vm1714_vm4, %v1695_v12, %v8910_v50  ;;  %v1738_v28 = vsel %vm1714_vm4, %v1705_v25, %v8911_v2  ;;  %v8912_v33 = vld [vmem:[#allocation148_spill] sm:$0xff]  ;;  %v4533_v25 = vld [vmem:[#allocation2 + $0xb0] sm:$0xff]  ;;  %v4534_v2 = vld [vmem:[#allocation2 + $0x128] sm:$0xff] }
 0x326   : > { %v1858_v1 = vsel %vm1846_vm9, %v1825_v20, %v8891_v46  ;;  %v1771_v53 = vsel %vm1747_vm6, %v1738_v28, %v8912_v33  ;;  %v8913_v6 = vld [vmem:[#allocation52_spill] sm:$0xff]  ;;  %v8933_v50 = vld [vmem:[#allocation51_spill] sm:$0xff] }
 0x327   : > { %v1891_v14 = vsel %vm1879_vm8, %v1858_v1, %v6043_v59  ;;  %v1704_v59 = vsel %vm1681_vm3, %v1671_v47, %v8895_v58  ;;  %v1761_v20 = vsel %vm1747_vm6, %v1728_v56, %v8913_v6  ;;  %v8915_v46 = vld [vmem:[#allocation156_spill] sm:$0xff]  ;;  %v6323_v58 = vld [vmem:[%s8495_s2] ss:$0 sm:$0xff]  ;;  %v1664_v56 = vsel %vm225_vm0, %v4533_v25, %v8933_v50 }
 0x328   : > { %v1737_v62 = vsel %vm1714_vm4, %v1704_v59, %v8896_v22  ;;  %v1794_v37 = vsel %vm1780_vm5, %v1761_v20, %v8914_v0  ;;  %v1804_v1 = vsel %vm1780_vm5, %v1771_v53, %v8915_v46  ;;  %v4531_v59 = vld [vmem:[#allocation2 + $0xa8] sm:$0xff]  ;;  %v8920_v22 = vld [vmem:[#allocation40_spill] sm:$0xff]  ;;  %v8935_v53 = vld [vmem:[#allocation89_spill] sm:$0xff] }
 0x329   : > { %v1770_v17 = vsel %vm1747_vm6, %v1737_v62, %v8899_v13  ;;  %v1837_v42 = vsel %vm1813_vm7, %v1804_v1, %v8917_v40  ;;  %v1663_v62 = vsel %vm225_vm0, %v4531_v59, %v8920_v22  ;;  %v8923_v13 = vld [vmem:[#allocation106_spill] sm:$0xff]  ;;  %v8934_v28 = vld [vmem:[#allocation68_spill] sm:$0xff]  ;;  %v8936_v6 = vld [vmem:[#allocation117_spill] sm:$0xff] }
 0x32a   : > { %v1803_v48 = vsel %vm1780_vm5, %v1770_v17, %v8901_v49  ;;  %v1870_v9 = vsel %vm1846_vm9, %v1837_v42, %v8918_v45  ;;  %v1696_v17 = vsel %vm1681_vm3, %v1663_v62, %v8923_v13  ;;  %v8925_v49 = vld [vmem:[#allocation137_spill] sm:$0xff]  ;;  %v1674_v33 = vsel %vm225_vm0, %v4534_v2, %v8934_v28  ;;  %v8937_v20 = vld [vmem:[#allocation130_spill] sm:$0xff]  ;;  %v8959_v2 = vld [vmem:[#allocation63_spill] sm:$0xff] }
 0x32b   : > { %4415 = vmatmul.msk.f32.gmra.mxu0 %vm1925_vm10, %v1890_v51  ;;  %4425 = vmatmul.msk.f32.gmra.mxu2 %vm1925_vm10, %v1900_v23  ;;  %v8902_v51 = vld [vmem:[#allocation168_spill] sm:$0xff]  ;;  %v1903_v11 = vsel %vm1879_vm8, %v1870_v9, %v1600_v10  ;;  %v1729_v8 = vsel %vm1714_vm4, %v1696_v17, %v8924_v34  ;;  %v8939_v1 = vld [vmem:[#allocation149_spill] sm:$0xff]  ;;  %v8947_v17 = vld [vmem:[#allocation118_spill] sm:$0xff] }
 0x32c   : > { %v1836_v23 = vsel %vm1813_vm7, %v1803_v48, %v8902_v51  ;;  %v8926_v51 = vld [vmem:[#allocation143_spill] sm:$0xff]  ;;  %v8941_v40 = vld [vmem:[#allocation85_spill] sm:$0xff] }
 0x32d   : > { %v1869_v15 = vsel %vm1846_vm9, %v1836_v23, %v8905_v36  ;;  %v1762_v23 = vsel %vm1747_vm6, %v1729_v8, %v8926_v51  ;;  %v8942_v45 = vld [vmem:[#allocation157_spill] sm:$0xff]  ;;  %v8948_v8 = vld [vmem:[#allocation138_spill] sm:$0xff]  ;;  %v1606_v51 = vpop.permute.xlu1 %1605 }
 0x32e   : > { %v1902_v57 = vsel %vm1879_vm8, %v1869_v15, %v1598_v39  ;;  %v8929_v15 = vld [vmem:[#allocation104_spill] sm:$0xff]  ;;  %v8945_v22 = vld [vmem:[#allocation193_spill] sm:$0xff] }
 0x32f   : > { %v8958_v25 = vld [vmem:[#allocation181_spill] sm:$0xff] }
 0x333   : > { %4416 = vmatmul.msk.f32.gmra.mxu0 %vm1925_vm10, %v1891_v14  ;;  %4426 = vmatmul.msk.f32.gmra.mxu2 %vm1925_vm10, %v1901_v19  ;;  %v8916_v14 = vld [vmem:[#allocation163_spill] sm:$0xff] }
 0x334   : > { %v1827_v19 = vsel %vm1813_vm7, %v1794_v37, %v8916_v14  ;;  %v8938_v37 = vld [vmem:[#allocation131_spill] sm:$0xff]  ;;  %v8940_v14 = vld [vmem:[#allocation66_spill] sm:$0xff] }
 0x335   : > { %v1860_v47 = vsel %vm1846_vm9, %v1827_v19, %v8919_v31  ;;  %v1604_v31 = vpop.permute.xlu0 %1603 }
 0x336   : > { %v1893_v54 = vsel %vm1879_vm8, %v1860_v47, %v6049_v3  ;;  %v8922_v3 = vld [vmem:[#allocation105_spill] sm:$0xff]  ;;  %v8943_v47 = vld [vmem:[#allocation171_spill] sm:$0xff] }
 0x337   : > { %v1706_v61 = vsel %vm1681_vm3, %v1673_v43, %v8922_v3  ;;  %v4535_v3 = vld [vmem:[#allocation2 + $0x138] sm:$0xff] }
 0x338   : > { %v1739_v48 = vsel %vm1714_vm4, %v1706_v61, %v8925_v49  ;;  %v8946_v61 = vld [vmem:[#allocation54_spill] sm:$0xff] }
 0x339   : > { %v1772_v44 = vsel %vm1747_vm6, %v1739_v48, %v8927_v30  ;;  %v1675_v13 = vsel %vm225_vm0, %v4535_v3, %v8946_v61  ;;  %v8970_v61 = vld [vmem:[#allocation57_spill] sm:$0xff] }
 0x33a   : > { %v1805_v36 = vsel %vm1780_vm5, %v1772_v44, %v8928_v41  ;;  %v1708_v34 = vsel %vm1681_vm3, %v1675_v13, %v8947_v17  ;;  %v8952_v44 = vld [vmem:[#allocation194_spill] sm:$0xff]  ;;  %v8971_v17 = vld [vmem:[#allocation160_spill] sm:$0xff] }
 0x33b   : > { %4417 = vmatmul.msk.f32.gmra.mxu0 %vm1925_vm10, %v1892_v21  ;;  %4427 = vmatmul.msk.f32.gmra.mxu2 %vm1925_vm10, %v1902_v57  ;;  %v1795_v21 = vsel %vm1780_vm5, %v1762_v23, %v8929_v15  ;;  %v1602_v57 = vpop.permute.xlu2 %1601  ;;  %v1838_v7 = vsel %vm1813_vm7, %v1805_v36, %v8931_v16  ;;  %v1741_v49 = vsel %vm1714_vm4, %v1708_v34, %v8948_v8  ;;  %v8951_v23 = vld [vmem:[#allocation180_spill] sm:$0xff]  ;;  %v4536_v15 = vld [vmem:[#allocation2 + $0x140] sm:$0xff]  ;;  %v8955_v16 = vld [vmem:[#allocation139_spill] sm:$0xff]  ;;  %v1612_v8 = vpop.permute.xlu1 %1611 }
 0x33c   : > { %v1828_v35 = vsel %vm1813_vm7, %v1795_v21, %v8930_v32  ;;  %v1871_v27 = vsel %vm1846_vm9, %v1838_v7, %v5949_v38  ;;  %v1697_v38 = vsel %vm1681_vm3, %v1664_v56, %v8935_v53  ;;  %v8953_v21 = vld [vmem:[#allocation69_spill] sm:$0xff] }
 0x33d   : > { %v1861_v4 = vsel %vm1846_vm9, %v1828_v35, %v8932_v18  ;;  %v1904_v26 = vsel %vm1879_vm8, %v1871_v27, %v1602_v57  ;;  %v1730_v46 = vsel %vm1714_vm4, %v1697_v38, %v8938_v37  ;;  %v1676_v57 = vsel %vm225_vm0, %v4536_v15, %v8953_v21  ;;  %v8954_v32 = vld [vmem:[#allocation109_spill] sm:$0xff]  ;;  %v8956_v18 = vld [vmem:[#allocation70_spill] sm:$0xff]  ;;  %v8957_v27 = vld [vmem:[#allocation108_spill] sm:$0xff] }
 0x33e   : > { %v1894_v12 = vsel %vm1879_vm8, %v1861_v4, %v6075_v60  ;;  %v1707_v60 = vsel %vm1681_vm3, %v1674_v33, %v8936_v6  ;;  %v1763_v10 = vsel %vm1747_vm6, %v1730_v46, %v8939_v1  ;;  %v1709_v35 = vsel %vm1681_vm3, %v1676_v57, %v8954_v32  ;;  %v4537_v38 = vld [vmem:[#allocation2 + $0x150] sm:$0xff]  ;;  %v8960_v6 = vld [vmem:[#allocation73_spill] sm:$0xff]  ;;  %v8962_v37 = vld [vmem:[#allocation132_spill] sm:$0xff] }
 0x33f   : > { %v1740_v0 = vsel %vm1714_vm4, %v1707_v60, %v8937_v20  ;;  %v1796_v42 = vsel %vm1780_vm5, %v1763_v10, %v8941_v40  ;;  %v1742_v7 = vsel %vm1714_vm4, %v1709_v35, %v8955_v16  ;;  %v1677_v60 = vsel %vm225_vm0, %v4537_v38, %v8960_v6  ;;  %v8961_v20 = vld [vmem:[#allocation119_spill] sm:$0xff]  ;;  %v1610_v40 = vpop.permute.xlu0 %1609  ;;  %v8976_v21 = vld [vmem:[#allocation141_spill] sm:$0xff] }
 0x340   : > { %v1773_v19 = vsel %vm1747_vm6, %v1740_v0, %v8940_v14  ;;  %v1775_v4 = vsel %vm1747_vm6, %v1742_v7, %v8956_v18  ;;  %v1710_v0 = vsel %vm1681_vm3, %v1677_v60, %v8961_v20  ;;  %v8963_v1 = vld [vmem:[#allocation71_spill] sm:$0xff]  ;;  %v8978_v16 = vld [vmem:[#allocation153_spill] sm:$0xff]  ;;  %v8983_v60 = vld [vmem:[#allocation134_spill] sm:$0xff] }
 0x341   : > { %v1806_v9 = vsel %vm1780_vm5, %v1773_v19, %v8942_v45  ;;  %v1743_v46 = vsel %vm1714_vm4, %v1710_v0, %v8962_v37  ;;  %v8964_v14 = vld [vmem:[#allocation159_spill] sm:$0xff]  ;;  %v8982_v38 = vld [vmem:[#allocation121_spill] sm:$0xff]  ;;  %v8984_v0 = vld [vmem:[#allocation80_spill] sm:$0xff] }
 0x342   : > { %v1776_v10 = vsel %vm1747_vm6, %v1743_v46, %v8963_v1  ;;  %v8977_v32 = vld [vmem:[#allocation75_spill] sm:$0xff]  ;;  %v8985_v46 = vld [vmem:[#allocation161_spill] sm:$0xff] }
 0x343   : > { %4418 = vmatmul.msk.f32.gmra.mxu0 %vm1925_vm10, %v1893_v54  ;;  %4428 = vmatmul.msk.f32.gmra.mxu2 %vm1925_vm10, %v1903_v11  ;;  %v1839_v54 = vsel %vm1813_vm7, %v1806_v9, %v8943_v47  ;;  %v8944_v11 = vld [vmem:[#allocation172_spill] sm:$0xff]  ;;  %v1809_v19 = vsel %vm1780_vm5, %v1776_v10, %v8964_v14 }
 0x344   : > { %v1829_v59 = vsel %vm1813_vm7, %v1796_v42, %v8944_v11  ;;  %v1872_v52 = vsel %vm1846_vm9, %v1839_v54, %v5951_v55  ;;  %v8949_v55 = vld [vmem:[#allocation58_spill] sm:$0xff]  ;;  %v8965_v42 = vld [vmem:[#allocation173_spill] sm:$0xff]  ;;  %v8986_v14 = vld [vmem:[#allocation176_spill] sm:$0xff] }
 0x345   : > { %v1862_v62 = vsel %vm1846_vm9, %v1829_v59, %v8945_v22  ;;  %v1905_v43 = vsel %vm1879_vm8, %v1872_v52, %v1604_v31  ;;  %v1774_v48 = vsel %vm1747_vm6, %v1741_v49, %v8949_v55  ;;  %v1842_v45 = vsel %vm1813_vm7, %v1809_v19, %v8965_v42  ;;  %v8966_v31 = vld [vmem:[#allocation196_spill] sm:$0xff]  ;;  %v8972_v49 = vld [vmem:[#allocation182_spill] sm:$0xff] }
 0x346   : > { %v2039_v39 = vpop.f32.mrf.mxu0  ;;  %v1895_v24 = vsel %vm1879_vm8, %v1862_v62, %v6101_v5  ;;  %v8950_v5 = vld [vmem:[#allocation158_spill] sm:$0xff]  ;;  %v1875_v47 = vsel %vm1846_vm9, %v1842_v45, %v8966_v31  ;;  %v4538_v59 = vld [vmem:[#allocation2 + $0x158] sm:$0xff] }
 0x347   : > { %v6344_v63 = vadd.f32 %v6323_v58, %v2039_v39  ;;  %v1807_v39 = vsel %vm1780_vm5, %v1774_v48, %v8950_v5  ;;  %v1908_v11 = vsel %vm1879_vm8, %v1875_v47, %v1610_v40  ;;  %v8967_v22 = vld [vmem:[#allocation60_spill] sm:$0xff]  ;;  %v8973_v5 = vld [vmem:[#allocation195_spill] sm:$0xff]  ;;  %v1616_v10 = vpop.permute.xlu0 %1615 }
 0x348   : > { %v1840_v30 = vsel %vm1813_vm7, %v1807_v39, %v8951_v23  ;;  %v1678_v62 = vsel %vm225_vm0, %v4538_v59, %v8967_v22  ;;  %v8968_v52 = vld [vmem:[#allocation120_spill] sm:$0xff] }
 0x349   : > { %2167 = vrot.lane.b32.xlu1 %v6344_v63, %s4579_s13  ;;  %v1873_v41 = vsel %vm1846_vm9, %v1840_v30, %v8952_v44  ;;  %v4539_v30 = vld [vmem:[#allocation2 + $0x168] sm:$0xff] }
 0x34a   : > { %v1906_v36 = vsel %vm1879_vm8, %v1873_v41, %v1606_v51  ;;  %v8974_v44 = vld [vmem:[#allocation74_spill] sm:$0xff] }
 0x34b   : > { %4419 = vmatmul.msk.f32.gmra.mxu0 %vm1925_vm10, %v1894_v12  ;;  %4429 = vmatmul.msk.f32.gmra.mxu2 %vm1925_vm10, %v1904_v26  ;;  %v1808_v12 = vsel %vm1780_vm5, %v1775_v4, %v8957_v27  ;;  %v1608_v26 = vpop.permute.xlu2 %1607  ;;  %v1679_v41 = vsel %vm225_vm0, %v4539_v30, %v8974_v44  ;;  %v8979_v4 = vld [vmem:[#allocation184_spill] sm:$0xff] }
 0x34c   : > { %v1841_v50 = vsel %vm1813_vm7, %v1808_v12, %v8958_v25 }
 0x34d   : > { %v1874_v28 = vsel %vm1846_vm9, %v1841_v50, %v8959_v2  ;;  %v4540_v2 = vld [vmem:[#allocation2 + $0x170] sm:$0xff] }
 0x34e   : > { %v1907_v53 = vsel %vm1879_vm8, %v1874_v28, %v1608_v26  ;;  %v8980_v26 = vld [vmem:[#allocation197_spill] sm:$0xff]  ;;  %v8981_v28 = vld [vmem:[#allocation78_spill] sm:$0xff] }
 0x353   : > { %4420 = vmatmul.msk.f32.gmra.mxu0 %vm1925_vm10, %v1895_v24  ;;  %4430 = vmatmul.msk.f32.gmra.mxu2 %vm1925_vm10, %v1905_v43  ;;  %v1711_v24 = vsel %vm1681_vm3, %v1678_v62, %v8968_v52  ;;  %v8969_v43 = vld [vmem:[#allocation140_spill] sm:$0xff]  ;;  %v1614_v18 = vpop.permute.xlu2 %1613 }
 0x354   : > { %v1744_v3 = vsel %vm1714_vm4, %v1711_v24, %v8969_v43 }
 0x355   : > { %v1777_v13 = vsel %vm1747_vm6, %v1744_v3, %v8970_v61 }
 0x356   : > { %v1810_v34 = vsel %vm1780_vm5, %v1777_v13, %v8971_v17 }
 0x357   : > { %v1843_v55 = vsel %vm1813_vm7, %v1810_v34, %v8972_v49 }
 0x358   : > { %v1876_v39 = vsel %vm1846_vm9, %v1843_v55, %v8973_v5 }
 0x359   : > { %v1909_v23 = vsel %vm1879_vm8, %v1876_v39, %v1612_v8 }
 0x35b   : > { %4431 = vmatmul.msk.f32.gmra.mxu2 %vm1925_vm10, %v1906_v36  ;;  %v8975_v36 = vld [vmem:[#allocation113_spill] sm:$0xff] }
 0x35c   : > { %v1712_v15 = vsel %vm1681_vm3, %v1679_v41, %v8975_v36 }
 0x35d   : > { %v1745_v57 = vsel %vm1714_vm4, %v1712_v15, %v8976_v21 }
 0x35e   : > { %v2042_v56 = vpop.f32.mrf.mxu0  ;;  %v1778_v35 = vsel %vm1747_vm6, %v1745_v57, %v8977_v32 }
 0x35f   : > { %v6429_v33 = vadd.f32 %v6323_v58, %v2042_v56  ;;  %v1811_v7 = vsel %vm1780_vm5, %v1778_v35, %v8978_v16 }
 0x360   : > { %v1844_v27 = vsel %vm1813_vm7, %v1811_v7, %v8979_v4 }
 0x361   : > { %2169 = vrot.lane.b32.xlu2 %v6429_v33, %s4579_s13  ;;  %v1877_v25 = vsel %vm1846_vm9, %v1844_v27, %v8980_v26 }
 0x362   : > { %v1910_v56 = vsel %vm1879_vm8, %v1877_v25, %v1614_v18 }
 0x363   : > { %4432 = vmatmul.msk.f32.gmra.mxu2 %vm1925_vm10, %v1907_v53  ;;  %v1680_v53 = vsel %vm225_vm0, %v4540_v2, %v8981_v28 }
 0x364   : > { %v1713_v6 = vsel %vm1681_vm3, %v1680_v53, %v8982_v38 }
 0x365   : > { %v1746_v20 = vsel %vm1714_vm4, %v1713_v6, %v8983_v60 }
 0x366   : > { %v1779_v37 = vsel %vm1747_vm6, %v1746_v20, %v8984_v0 }
 0x367   : > { %v1812_v1 = vsel %vm1780_vm5, %v1779_v37, %v8985_v46 }
 0x368   : > { %v2045_v9 = vpop.f32.mrf.mxu0  ;;  %v1845_v19 = vsel %vm1813_vm7, %v1812_v1, %v8986_v14 }
 0x369   : > { %v6450_v54 = vadd.f32 %v6323_v58, %v2045_v9  ;;  %v1878_v42 = vsel %vm1846_vm9, %v1845_v19, %v5969_v29 }
 0x36a   : > { %v1911_v9 = vsel %vm1879_vm8, %v1878_v42, %v1616_v10 }
 0x36b   : > { %4433 = vmatmul.msk.f32.gmra.mxu2 %vm1925_vm10, %v1908_v11  ;;  %2171 = vrot.lane.b32.xlu0 %v6450_v54, %s4579_s13 }
 0x370   : > { %v2048_v48 = vpop.f32.mrf.mxu0 }
 0x371   : > { %v6471_v51 = vadd.f32 %v6323_v58, %v2048_v48 }
 0x373   : > { %4434 = vmatmul.msk.f32.gmra.mxu2 %vm1925_vm10, %v1909_v23  ;;  %2173 = vrot.lane.b32.xlu1 %v6471_v51, %s4579_s13 }
 0x378   : > { %v2051_v12 = vpop.f32.mrf.mxu0 }
 0x379   : > { %v6492_v50 = vadd.f32 %v6323_v58, %v2051_v12 }
 0x37b   : > { %4435 = vmatmul.msk.f32.gmra.mxu2 %vm1925_vm10, %v1910_v56  ;;  %2175 = vrot.lane.b32.xlu2 %v6492_v50, %s4579_s13 }
 0x380   : > { %v2054_v40 = vpop.f32.mrf.mxu0 }
 0x381   : > { %v6513_v45 = vadd.f32 %v6323_v58, %v2054_v40 }
 0x383   : > { %4436 = vmatmul.msk.f32.gmra.mxu2 %vm1925_vm10, %v1911_v9  ;;  %2177 = vrot.lane.b32.xlu0 %v6513_v45, %s4579_s13 }
 0x388   : > { %v2057_v31 = vpop.f32.mrf.mxu0 }
 0x389   : > { %v6520_v47 = vadd.f32 %v6323_v58, %v2057_v31 }
 0x38b   : > { %2179 = vrot.lane.b32.xlu1 %v6520_v47, %s4579_s13 }
 0x38c   : > { %v2087_v11 = vpop.f32.mrf.mxu2 }
 0x38d   : > { %v6564_v57 = vadd.f32 %v6323_v58, %v2087_v11 }
 0x390   : > { %v2060_v59 = vpop.f32.mrf.mxu0 }
 0x391   : > { %v6525_v29 = vadd.f32 %v6323_v58, %v2060_v59 }
 0x393   : > { %2181 = vrot.lane.b32.xlu2 %v6525_v29, %s4579_s13 }
 0x396   : > { %v2090_v22 = vpop.f32.mrf.mxu2 }
 0x397   : > { %v6580_v18 = vadd.f32 %v6323_v58, %v2090_v22 }
 0x398   : > { %v2063_v62 = vpop.f32.mrf.mxu0 }
 0x399   : > { %v6530_v52 = vadd.f32 %v6323_v58, %v2063_v62 }
 0x39b   : > { %2183 = vrot.lane.b32.xlu0 %v6530_v52, %s4579_s13 }
 0x39e   : > { %v2093_v24 = vpop.f32.mrf.mxu2 }
 0x39f   : > { %v6591_v26 = vadd.f32 %v6323_v58, %v2093_v24 }
 0x3a0   : > { %v2066_v43 = vpop.f32.mrf.mxu0 }
 0x3a1   : > { %v6535_v3 = vadd.f32 %v6323_v58, %v2066_v43  ;;  %v2360_v43 = vld [vmem:[#allocation2 + $0x9] sm:$0xff] }
 0x3a3   : > { %2185 = vrot.lane.b32.xlu1 %v6535_v3, %s4579_s13 }
 0x3a6   : > { %v2096_v61 = vpop.f32.mrf.mxu2 }
 0x3a7   : > { %v6574_v16 = vadd.f32 %v6323_v58, %v2096_v61 }
 0x3a8   : > { %v2069_v13 = vpop.f32.mrf.mxu0 }
 0x3a9   : > { %v6540_v17 = vadd.f32 %v6323_v58, %v2069_v13 }
 0x3ab   : > { %2187 = vrot.lane.b32.xlu2 %v6540_v17, %s4579_s13 }
 0x3ae   : > { %v2099_v34 = vpop.f32.mrf.mxu2 }
 0x3af   : > { %v6597_v56 = vadd.f32 %v6323_v58, %v2099_v34 }
 0x3b0   : > { %v2072_v8 = vpop.f32.mrf.mxu0 }
 0x3b1   : > { %v6545_v49 = vadd.f32 %v6323_v58, %v2072_v8 }
 0x3b3   : > { %2189 = vrot.lane.b32.xlu0 %v6545_v49, %s4579_s13 }
 0x3b6   : > { %v2102_v55 = vpop.f32.mrf.mxu2 }
 0x3b7   : > { %v6608_v53 = vadd.f32 %v6323_v58, %v2102_v55 }
 0x3b8   : > { %v2075_v48 = vpop.f32.mrf.mxu0 }
 0x3b9   : > { %v6550_v5 = vadd.f32 %v6323_v58, %v2075_v48 }
 0x3bb   : > { %v2168_v39 = vpop.permute.xlu1 %2167  ;;  %2191 = vrot.lane.b32.xlu1 %v6550_v5, %s4579_s13  ;;  %v2170_v30 = vpop.permute.xlu2 %2169 }
 0x3bc   : > { %v2263_v23 = vmax.f32 %v6344_v63, %v2168_v39  ;;  %v2264_v44 = vmax.f32 %v6429_v33, %v2170_v30 }
 0x3be   : > { %2295 = vst.msk [vmem:[#allocation2 + $0x19] sm:$0xff] %vm225_vm0, %v2263_v23  ;;  %v2105_v41 = vpop.f32.mrf.mxu2 }
 0x3bf   : > { %2296 = vst.msk [vmem:[#allocation2 + $0x21] sm:$0xff] %vm225_vm0, %v2264_v44  ;;  %v6594_v25 = vadd.f32 %v6323_v58, %v2105_v41 }
 0x3c0   : > { %v2078_v36 = vpop.f32.mrf.mxu0 }
 0x3c1   : > { %v6559_v15 = vadd.f32 %v6323_v58, %v2078_v36 }
 0x3c3   : > { %2193 = vrot.lane.b32.xlu2 %v6559_v15, %s4579_s13 }
 0x3c5   : > { %v6675_v34 = vld [vmem:[#allocation2 + $0x19] sm:$0xff] }
 0x3c6   : > { %v2108_v21 = vpop.f32.mrf.mxu2 }
 0x3c7   : > { %v6614_v6 = vadd.f32 %v6323_v58, %v2108_v21 }
 0x3c8   : > { %v2081_v63 = vpop.f32.mrf.mxu0 }
 0x3c9   : > { %v6567_v32 = vadd.f32 %v6323_v58, %v2081_v63 }
 0x3cb   : > { %2199 = vrot.lane.b32.xlu2 %v6564_v57, %s4579_s13  ;;  %2195 = vrot.lane.b32.xlu0 %v6567_v32, %s4579_s13 }
 0x3ce   : > { %v2111_v33 = vpop.f32.mrf.mxu2 }
 0x3cf   : > { %v6625_v0 = vadd.f32 %v6323_v58, %v2111_v33 }
 0x3d0   : > { %v2084_v35 = vpop.f32.mrf.mxu0 }
 0x3d1   : > { %v6577_v7 = vadd.f32 %v6323_v58, %v2084_v35 }
 0x3d3   : > { %2205 = vrot.lane.b32.xlu2 %v6574_v16, %s4579_s13  ;;  %2197 = vrot.lane.b32.xlu1 %v6577_v7, %s4579_s13 }
 0x3d4   : > { %2201 = vrot.lane.b32.xlu0 %v6580_v18, %s4579_s13 }
 0x3d5   : > { %v2176_v4 = vpop.permute.xlu2 %2175 }
 0x3d6   : > { %v2267_v27 = vmax.f32 %v6492_v50, %v2176_v4  ;;  %v2114_v12 = vpop.f32.mrf.mxu2 }
 0x3d7   : > { %v6611_v38 = vadd.f32 %v6323_v58, %v2114_v12 }
 0x3d8   : > { %2299 = vst.msk [vmem:[#allocation2 + $0x49] sm:$0xff] %vm225_vm0, %v2267_v27 }
 0x3db   : > { %2211 = vrot.lane.b32.xlu2 %v6594_v25, %s4579_s13  ;;  %2203 = vrot.lane.b32.xlu1 %v6591_v26, %s4579_s13 }
 0x3dc   : > { %2207 = vrot.lane.b32.xlu0 %v6597_v56, %s4579_s13 }
 0x3dd   : > { %v2172_v50 = vpop.permute.xlu0 %2171 }
 0x3de   : > { %v2265_v2 = vmax.f32 %v6450_v54, %v2172_v50  ;;  %v2117_v28 = vpop.f32.mrf.mxu2 }
 0x3df   : > { %v6628_v37 = vadd.f32 %v6323_v58, %v2117_v28  ;;  %v6681_v8 = vld [vmem:[#allocation2 + $0x49] sm:$0xff] }
 0x3e0   : > { %2297 = vst.msk [vmem:[#allocation2 + $0x31] sm:$0xff] %vm225_vm0, %v2265_v2 }
 0x3e3   : > { %2217 = vrot.lane.b32.xlu2 %v6611_v38, %s4579_s13  ;;  %2209 = vrot.lane.b32.xlu1 %v6608_v53, %s4579_s13 }
 0x3e4   : > { %2213 = vrot.lane.b32.xlu0 %v6614_v6, %s4579_s13 }
 0x3e5   : > { %v2174_v54 = vpop.permute.xlu1 %2173 }
 0x3e6   : > { %v2266_v60 = vmax.f32 %v6471_v51, %v2174_v54  ;;  %v2120_v20 = vpop.f32.mrf.mxu2 }
 0x3e7   : > { %v6640_v14 = vadd.f32 %v6323_v58, %v2120_v20 }
 0x3e8   : > { %2298 = vst.msk [vmem:[#allocation2 + $0x39] sm:$0xff] %vm225_vm0, %v2266_v60 }
 0x3eb   : > { %2215 = vrot.lane.b32.xlu1 %v6625_v0, %s4579_s13 }
 0x3ec   : > { %2219 = vrot.lane.b32.xlu0 %v6628_v37, %s4579_s13 }
 0x3ed   : > { %v2182_v46 = vpop.permute.xlu2 %2181 }
 0x3ee   : > { %v2270_v1 = vmax.f32 %v6525_v29, %v2182_v46  ;;  %v2123_v10 = vpop.f32.mrf.mxu2  ;;  %v2359_v29 = vld [vmem:[#allocation2 + $0x1] sm:$0xff] }
 0x3ef   : > { %v6636_v51 = vadd.f32 %v6323_v58, %v2123_v10  ;;  %v6689_v48 = vld [vmem:[#allocation2 + $0x39] sm:$0xff] }
 0x3f0   : > { %2302 = vst.msk [vmem:[#allocation2 + $0x69] sm:$0xff] %vm225_vm0, %v2270_v1 }
 0x3f1   : > { %2223 = vrot.lane.b32.xlu2 %v6636_v51, %s4579_s13 }
 0x3f3   : > { %2221 = vrot.lane.b32.xlu1 %v6640_v14, %s4579_s13 }
 0x3f5   : > { %v2178_v19 = vpop.permute.xlu0 %2177 }
 0x3f6   : > { %v2268_v40 = vmax.f32 %v6513_v45, %v2178_v19  ;;  %v2126_v42 = vpop.f32.mrf.mxu2 }
 0x3f7   : > { %v6648_v9 = vadd.f32 %v6323_v58, %v2126_v42  ;;  %v6695_v23 = vld [vmem:[#allocation2 + $0x69] sm:$0xff] }
 0x3f8   : > { %2300 = vst.msk [vmem:[#allocation2 + $0x51] sm:$0xff] %vm225_vm0, %v2268_v40 }
 0x3f9   : > { %2225 = vrot.lane.b32.xlu0 %v6648_v9, %s4579_s13 }
 0x3fd   : > { %v2180_v31 = vpop.permute.xlu1 %2179 }
 0x3fe   : > { %v2269_v11 = vmax.f32 %v6520_v47, %v2180_v31  ;;  %v2129_v59 = vpop.f32.mrf.mxu2  ;;  %v6669_v47 = vld [vmem:[#allocation2 + $0x21] sm:$0xff] }
 0x3ff   : > { %v6655_v22 = vadd.f32 %v6323_v58, %v2129_v59  ;;  %v6691_v39 = vld [vmem:[#allocation2 + $0x51] sm:$0xff] }
 0x400   : > { %2301 = vst.msk [vmem:[#allocation2 + $0x61] sm:$0xff] %vm225_vm0, %v2269_v11 }
 0x401   : > { %2227 = vrot.lane.b32.xlu1 %v6655_v22, %s4579_s13  ;;  %2647 = vrot.lane.b32.xlu0 %v2359_v29, %s4571_s24 }
 0x405   : > { %v2188_v45 = vpop.permute.xlu2 %2187 }
 0x406   : > { %v2273_v62 = vmax.f32 %v6540_v17, %v2188_v45  ;;  %v2132_v24 = vpop.f32.mrf.mxu2 }
 0x407   : > { %v6663_v61 = vadd.f32 %v6323_v58, %v2132_v24  ;;  %v6677_v58 = vld [vmem:[#allocation2 + $0x31] sm:$0xff]  ;;  %v6703_v44 = vld [vmem:[#allocation2 + $0x61] sm:$0xff] }
 0x408   : > { %2305 = vst.msk [vmem:[#allocation2 + $0x91] sm:$0xff] %vm225_vm0, %v2273_v62 }
 0x409   : > { %2229 = vrot.lane.b32.xlu2 %v6663_v61, %s4579_s13  ;;  %2649 = vrot.lane.b32.xlu1 %v2360_v43, %s4571_s24 }
 0x40a   : > { %2653 = vrot.lane.b32.xlu0 %v6669_v47, %s4571_s24 }
 0x40d   : > { %v2184_v13 = vpop.permute.xlu0 %2183 }
 0x40e   : > { %v2271_v17 = vmax.f32 %v6530_v52, %v2184_v13 }
 0x40f   : > { %v6709_v36 = vld [vmem:[#allocation2 + $0x91] sm:$0xff] }
 0x410   : > { %2303 = vst.msk [vmem:[#allocation2 + $0x79] sm:$0xff] %vm225_vm0, %v2271_v17 }
 0x411   : > { %2651 = vrot.lane.b32.xlu2 %v6675_v34, %s4571_s24  ;;  %2655 = vrot.lane.b32.xlu1 %v6677_v58, %s4571_s24 }
 0x412   : > { %2659 = vrot.lane.b32.xlu0 %v6681_v8, %s4571_s24 }
 0x415   : > { %v2186_v55 = vpop.permute.xlu1 %2185 }
 0x416   : > { %v2272_v52 = vmax.f32 %v6535_v3, %v2186_v55 }
 0x417   : > { %v6705_v41 = vld [vmem:[#allocation2 + $0x79] sm:$0xff] }
 0x418   : > { %2304 = vst.msk [vmem:[#allocation2 + $0x81] sm:$0xff] %vm225_vm0, %v2272_v52 }
 0x419   : > { %2657 = vrot.lane.b32.xlu2 %v6689_v48, %s4571_s24  ;;  %2661 = vrot.lane.b32.xlu1 %v6691_v39, %s4571_s24 }
 0x41a   : > { %2665 = vrot.lane.b32.xlu0 %v6695_v23, %s4571_s24 }
 0x41d   : > { %v2194_v30 = vpop.permute.xlu2 %2193 }
 0x41e   : > { %v2276_v3 = vmax.f32 %v6559_v15, %v2194_v30 }
 0x41f   : > { %v6720_v4 = vld [vmem:[#allocation2 + $0x81] sm:$0xff] }
 0x420   : > { %2308 = vst.msk [vmem:[#allocation2 + $0xb1] sm:$0xff] %vm225_vm0, %v2276_v3 }
 0x421   : > { %2663 = vrot.lane.b32.xlu2 %v6703_v44, %s4571_s24  ;;  %2667 = vrot.lane.b32.xlu1 %v6705_v41, %s4571_s24 }
 0x422   : > { %2671 = vrot.lane.b32.xlu0 %v6709_v36, %s4571_s24 }
 0x425   : > { %v2200_v21 = vpop.permute.xlu2 %2199  ;;  %v2190_v63 = vpop.permute.xlu0 %2189 }
 0x426   : > { %v2279_v15 = vmax.f32 %v6564_v57, %v2200_v21  ;;  %v2274_v33 = vmax.f32 %v6545_v49, %v2190_v63 }
 0x427   : > { %v6717_v35 = vld [vmem:[#allocation2 + $0xb1] sm:$0xff] }
 0x428   : > { %2311 = vst.msk [vmem:[#allocation2 + $0xd9] sm:$0xff] %vm225_vm0, %v2279_v15 }
 0x429   : > { %2306 = vst.msk [vmem:[#allocation2 + $0x99] sm:$0xff] %vm225_vm0, %v2274_v33  ;;  %2669 = vrot.lane.b32.xlu2 %v6720_v4, %s4571_s24  ;;  %v6813_v33 = vld [vmem:[#allocation2 + $0x32] sm:$0xff] }
 0x42a   : > { %2677 = vrot.lane.b32.xlu0 %v6717_v35, %s4571_s24 }
 0x42d   : > { %v2206_v27 = vpop.permute.xlu2 %2205  ;;  %v2192_v12 = vpop.permute.xlu1 %2191 }
 0x42e   : > { %v2282_v57 = vmax.f32 %v6574_v16, %v2206_v27  ;;  %v2275_v49 = vmax.f32 %v6550_v5, %v2192_v12 }
 0x42f   : > { %v6729_v50 = vld [vmem:[#allocation2 + $0xd9] sm:$0xff] }
 0x430   : > { %2314 = vst.msk [vmem:[#allocation2 + $0xf9] sm:$0xff] %vm225_vm0, %v2282_v57  ;;  %v6732_v2 = vld [vmem:[#allocation2 + $0x99] sm:$0xff] }
 0x431   : > { %2307 = vst.msk [vmem:[#allocation2 + $0xa9] sm:$0xff] %vm225_vm0, %v2275_v49  ;;  %2673 = vrot.lane.b32.xlu1 %v6732_v2, %s4571_s24  ;;  %v6829_v49 = vld [vmem:[#allocation2 + $0x52] sm:$0xff] }
 0x432   : > { %2683 = vrot.lane.b32.xlu0 %v6729_v50, %s4571_s24 }
 0x435   : > { %v2212_v28 = vpop.permute.xlu2 %2211 }
 0x436   : > { %v2285_v54 = vmax.f32 %v6594_v25, %v2212_v28 }
 0x437   : > { %v6740_v16 = vld [vmem:[#allocation2 + $0xf9] sm:$0xff] }
 0x438   : > { %2317 = vst.msk [vmem:[#allocation2 + $0x121] sm:$0xff] %vm225_vm0, %v2285_v54  ;;  %v6743_v5 = vld [vmem:[#allocation2 + $0xa9] sm:$0xff] }
 0x439   : > { %2675 = vrot.lane.b32.xlu2 %v6743_v5, %s4571_s24 }
 0x43a   : > { %2689 = vrot.lane.b32.xlu0 %v6740_v16, %s4571_s24 }
 0x43d   : > { %v2218_v60 = vpop.permute.xlu2 %2217  ;;  %v2196_v20 = vpop.permute.xlu0 %2195 }
 0x43e   : > { %v2288_v46 = vmax.f32 %v6611_v38, %v2218_v60  ;;  %v2277_v1 = vmax.f32 %v6567_v32, %v2196_v20  ;;  %v6841_v20 = vld [vmem:[#allocation2 + $0x7a] sm:$0xff] }
 0x43f   : > { %v6751_v10 = vld [vmem:[#allocation2 + $0x121] sm:$0xff] }
 0x440   : > { %2320 = vst.msk [vmem:[#allocation2 + $0x141] sm:$0xff] %vm225_vm0, %v2288_v46  ;;  %v2391_v46 = vld [vmem:[#allocation2 + $0x2] sm:$0xff] }
 0x441   : > { %2309 = vst.msk [vmem:[#allocation2 + $0xc1] sm:$0xff] %vm225_vm0, %v2277_v1 }
 0x442   : > { %2695 = vrot.lane.b32.xlu0 %v6751_v10, %s4571_s24 }
 0x445   : > { %v2198_v25 = vpop.permute.xlu1 %2197 }
 0x446   : > { %v2278_v19 = vmax.f32 %v6577_v7, %v2198_v25  ;;  %v2202_v40 = vpop.permute.xlu0 %2201  ;;  %v6855_v25 = vld [vmem:[#allocation2 + $0x9a] sm:$0xff] }
 0x447   : > { %v2280_v42 = vmax.f32 %v6580_v18, %v2202_v40  ;;  %v6759_v31 = vld [vmem:[#allocation2 + $0x141] sm:$0xff] }
 0x448   : > { %2310 = vst.msk [vmem:[#allocation2 + $0xc9] sm:$0xff] %vm225_vm0, %v2278_v19  ;;  %v6762_v32 = vld [vmem:[#allocation2 + $0xc1] sm:$0xff] }
 0x449   : > { %2312 = vst.msk [vmem:[#allocation2 + $0xe1] sm:$0xff] %vm225_vm0, %v2280_v42  ;;  %2679 = vrot.lane.b32.xlu1 %v6762_v32, %s4571_s24  ;;  %v6857_v19 = vld [vmem:[#allocation2 + $0x1a] sm:$0xff]  ;;  %v6863_v40 = vld [vmem:[#allocation2 + $0x22] sm:$0xff] }
 0x44a   : > { %2701 = vrot.lane.b32.xlu0 %v6759_v31, %s4571_s24 }
 0x44b   : > { %v2224_v38 = vpop.permute.xlu2 %2223 }
 0x44c   : > { %v2291_v7 = vmax.f32 %v6636_v51, %v2224_v38 }
 0x44d   : > { %v2204_v11 = vpop.permute.xlu1 %2203 }
 0x44e   : > { %2323 = vst.msk [vmem:[#allocation2 + $0x169] sm:$0xff] %vm225_vm0, %v2291_v7  ;;  %v2281_v18 = vmax.f32 %v6591_v26, %v2204_v11  ;;  %v2208_v59 = vpop.permute.xlu0 %2207  ;;  %v6871_v7 = vld [vmem:[#allocation2 + $0x3a] sm:$0xff] }
 0x44f   : > { %v2283_v29 = vmax.f32 %v6597_v56, %v2208_v59  ;;  %v6773_v45 = vld [vmem:[#allocation2 + $0xc9] sm:$0xff] }
 0x450   : > { %2313 = vst.msk [vmem:[#allocation2 + $0xf1] sm:$0xff] %vm225_vm0, %v2281_v18  ;;  %2681 = vrot.lane.b32.xlu2 %v6773_v45, %s4571_s24  ;;  %v6778_v62 = vld [vmem:[#allocation2 + $0xe1] sm:$0xff]  ;;  %v6879_v18 = vld [vmem:[#allocation2 + $0x4a] sm:$0xff] }
 0x451   : > { %2315 = vst.msk [vmem:[#allocation2 + $0x109] sm:$0xff] %vm225_vm0, %v2283_v29  ;;  %2685 = vrot.lane.b32.xlu1 %v6778_v62, %s4571_s24  ;;  %v6869_v38 = vld [vmem:[#allocation2 + $0xc2] sm:$0xff] }
 0x455   : > { %v2210_v51 = vpop.permute.xlu1 %2209  ;;  %v6783_v24 = vld [vmem:[#allocation2 + $0x169] sm:$0xff] }
 0x456   : > { %v2284_v26 = vmax.f32 %v6608_v53, %v2210_v51  ;;  %v2214_v56 = vpop.permute.xlu0 %2213  ;;  %2707 = vrot.lane.b32.xlu0 %v6783_v24, %s4571_s24  ;;  %v2392_v53 = vld [vmem:[#allocation2 + $0xa] sm:$0xff]  ;;  %v6887_v51 = vld [vmem:[#allocation2 + $0xe2] sm:$0xff] }
 0x457   : > { %v2286_v43 = vmax.f32 %v6614_v6, %v2214_v56  ;;  %v6789_v13 = vld [vmem:[#allocation2 + $0xf1] sm:$0xff] }
 0x458   : > { %2316 = vst.msk [vmem:[#allocation2 + $0x111] sm:$0xff] %vm225_vm0, %v2284_v26  ;;  %2687 = vrot.lane.b32.xlu2 %v6789_v13, %s4571_s24  ;;  %v6794_v17 = vld [vmem:[#allocation2 + $0x109] sm:$0xff] }
 0x459   : > { %2318 = vst.msk [vmem:[#allocation2 + $0x129] sm:$0xff] %vm225_vm0, %v2286_v43  ;;  %2691 = vrot.lane.b32.xlu1 %v6794_v17, %s4571_s24  ;;  %v6889_v26 = vld [vmem:[#allocation2 + $0x62] sm:$0xff]  ;;  %v6895_v56 = vld [vmem:[#allocation2 + $0x6a] sm:$0xff] }
 0x45d   : > { %v2216_v55 = vpop.permute.xlu1 %2215 }
 0x45e   : > { %v2287_v52 = vmax.f32 %v6625_v0, %v2216_v55  ;;  %v2220_v30 = vpop.permute.xlu0 %2219  ;;  %2777 = vrot.lane.b32.xlu0 %v2392_v53, %s4572_s25 }
 0x45f   : > { %v2289_v6 = vmax.f32 %v6628_v37, %v2220_v30  ;;  %v6802_v3 = vld [vmem:[#allocation2 + $0x111] sm:$0xff] }
 0x460   : > { %2319 = vst.msk [vmem:[#allocation2 + $0x139] sm:$0xff] %vm225_vm0, %v2287_v52  ;;  %2693 = vrot.lane.b32.xlu2 %v6802_v3, %s4571_s24  ;;  %v6807_v21 = vld [vmem:[#allocation2 + $0x129] sm:$0xff] }
 0x461   : > { %2321 = vst.msk [vmem:[#allocation2 + $0x151] sm:$0xff] %vm225_vm0, %v2289_v6  ;;  %2697 = vrot.lane.b32.xlu1 %v6807_v21, %s4571_s24  ;;  %v6903_v55 = vld [vmem:[#allocation2 + $0x10a] sm:$0xff]  ;;  %v6905_v52 = vld [vmem:[#allocation2 + $0x82] sm:$0xff]  ;;  %v6913_v6 = vld [vmem:[#allocation2 + $0x92] sm:$0xff] }
 0x463   : > { %v2230_v0 = vpop.permute.xlu2 %2229 }
 0x464   : > { %v2294_v63 = vmax.f32 %v6663_v61, %v2230_v0 }
 0x465   : > { %v2222_v15 = vpop.permute.xlu1 %2221 }
 0x466   : > { %2326 = vst.msk [vmem:[#allocation2 + $0x189] sm:$0xff] %vm225_vm0, %v2294_v63  ;;  %v2290_v37 = vmax.f32 %v6640_v14, %v2222_v15  ;;  %2783 = vrot.lane.b32.xlu0 %v6813_v33, %s4572_s25  ;;  %v6921_v15 = vld [vmem:[#allocation2 + $0x12a] sm:$0xff] }
 0x467   : > { %v6819_v27 = vld [vmem:[#allocation2 + $0x139] sm:$0xff]  ;;  %8999 = vst [vmem:[#allocation72_spill] sm:$0xff] %v6921_v15 }
 0x468   : > { %2322 = vst.msk [vmem:[#allocation2 + $0x159] sm:$0xff] %vm225_vm0, %v2290_v37  ;;  %2699 = vrot.lane.b32.xlu2 %v6819_v27, %s4571_s24  ;;  %v6824_v12 = vld [vmem:[#allocation2 + $0x151] sm:$0xff] }
 0x469   : > { %2703 = vrot.lane.b32.xlu1 %v6824_v12, %s4571_s24  ;;  %v6923_v37 = vld [vmem:[#allocation2 + $0xaa] sm:$0xff] }
 0x46b   : > { %v2226_v61 = vpop.permute.xlu0 %2225  ;;  %v6851_v1 = vpop.permute.xlu2 %2651 }
 0x46c   : > { %v2292_v57 = vmax.f32 %v6648_v9, %v2226_v61  ;;  %8988 = vst [vmem:[#allocation79_spill] sm:$0xff] %v6851_v1  ;;  %v6929_v61 = vld [vmem:[#allocation2 + $0xb2] sm:$0xff] }
 0x46e   : > { %2324 = vst.msk [vmem:[#allocation2 + $0x171] sm:$0xff] %vm225_vm0, %v2292_v57  ;;  %2789 = vrot.lane.b32.xlu0 %v6829_v49, %s4572_s25 }
 0x46f   : > { %v6834_v14 = vld [vmem:[#allocation2 + $0x159] sm:$0xff] }
 0x470   : > { %2705 = vrot.lane.b32.xlu2 %v6834_v14, %s4571_s24 }
 0x473   : > { %v2228_v28 = vpop.permute.xlu1 %2227  ;;  %v6839_v60 = vpop.permute.xlu0 %2647 }
 0x474   : > { %v2293_v54 = vmax.f32 %v6655_v22, %v2228_v28  ;;  %8987 = vst [vmem:[#allocation39_spill] sm:$0xff] %v6839_v60  ;;  %v6873_v11 = vpop.permute.xlu2 %2657  ;;  %v6993_v60 = vld [vmem:[#allocation2 + $0x13a] sm:$0xff] }
 0x475   : > { %v6843_v9 = vld [vmem:[#allocation2 + $0x171] sm:$0xff]  ;;  %8991 = vst [vmem:[#allocation41_spill] sm:$0xff] %v6873_v11  ;;  %v6965_v11 = vld [vmem:[#allocation2 + $0xfa] sm:$0xff] }
 0x476   : > { %2325 = vst.msk [vmem:[#allocation2 + $0x181] sm:$0xff] %vm225_vm0, %v2293_v54  ;;  %2795 = vrot.lane.b32.xlu0 %v6841_v20, %s4572_s25  ;;  %2709 = vrot.lane.b32.xlu1 %v6843_v9, %s4571_s24 }
 0x477   : > { %9015 = vst [vmem:[#allocation45_spill] sm:$0xff] %v6993_v60 }
 0x478   : > { %2775 = vrot.lane.b32.xlu2 %v2391_v46, %s4572_s25  ;;  %v6939_v46 = vld [vmem:[#allocation2 + $0x152] sm:$0xff] }
 0x479   : > { %9003 = vst [vmem:[#allocation91_spill] sm:$0xff] %v6939_v46 }
 0x47b   : > { %v6885_v29 = vpop.permute.xlu1 %2649 }
 0x47c   : > { %v6853_v22 = vpop.permute.xlu0 %2653  ;;  %8993 = vst [vmem:[#allocation33_spill] sm:$0xff] %v6885_v29  ;;  %v6897_v43 = vpop.permute.xlu2 %2663  ;;  %v6991_v29 = vld [vmem:[#allocation2 + $0x50] sm:$0xff] }
 0x47d   : > { %8989 = vst [vmem:[#allocation38_spill] sm:$0xff] %v6853_v22  ;;  %v6975_v22 = vld [vmem:[#allocation2 + $0x112] sm:$0xff] }
 0x47e   : > { %2801 = vrot.lane.b32.xlu0 %v6855_v25, %s4572_s25  ;;  %2779 = vrot.lane.b32.xlu1 %v6857_v19, %s4572_s25  ;;  %8994 = vst [vmem:[#allocation84_spill] sm:$0xff] %v6897_v43 }
 0x47f   : > { %9014 = vst [vmem:[#allocation183_spill] sm:$0xff] %v6991_v29 }
 0x480   : > { %2781 = vrot.lane.b32.xlu2 %v6863_v40, %s4572_s25 }
 0x483   : > { %v6911_v30 = vpop.permute.xlu1 %2655 }
 0x484   : > { %v6867_v42 = vpop.permute.xlu0 %2659  ;;  %8996 = vst [vmem:[#allocation90_spill] sm:$0xff] %v6911_v30  ;;  %v6917_v0 = vpop.permute.xlu2 %2669 }
 0x485   : > { %8990 = vst [vmem:[#allocation83_spill] sm:$0xff] %v6867_v42  ;;  %v6959_v42 = vld [vmem:[#allocation2 + $0xf2] sm:$0xff] }
 0x486   : > { %2807 = vrot.lane.b32.xlu0 %v6869_v38, %s4572_s25  ;;  %2785 = vrot.lane.b32.xlu1 %v6871_v7, %s4572_s25  ;;  %8997 = vst [vmem:[#allocation42_spill] sm:$0xff] %v6917_v0 }
 0x488   : > { %2787 = vrot.lane.b32.xlu2 %v6879_v18, %s4572_s25 }
 0x48b   : > { %v6933_v57 = vpop.permute.xlu1 %2661 }
 0x48c   : > { %v6883_v59 = vpop.permute.xlu0 %2665  ;;  %9000 = vst [vmem:[#allocation107_spill] sm:$0xff] %v6933_v57  ;;  %v6957_v57 = vld [vmem:[#allocation2 + $0x172] sm:$0xff] }
 0x48d   : > { %8992 = vst [vmem:[#allocation67_spill] sm:$0xff] %v6883_v59 }
 0x48e   : > { %2813 = vrot.lane.b32.xlu0 %v6887_v51, %s4572_s25  ;;  %2791 = vrot.lane.b32.xlu1 %v6889_v26, %s4572_s25  ;;  %9007 = vst [vmem:[#allocation94_spill] sm:$0xff] %v6957_v57 }
 0x490   : > { %2793 = vrot.lane.b32.xlu2 %v6895_v56, %s4572_s25 }
 0x493   : > { %v6935_v28 = vpop.permute.xlu2 %2675  ;;  %v6953_v59 = vpop.permute.xlu1 %2667 }
 0x494   : > { %v6901_v53 = vpop.permute.xlu0 %2671  ;;  %9001 = vst [vmem:[#allocation43_spill] sm:$0xff] %v6935_v28  ;;  %v7009_v28 = vld [vmem:[#allocation2 + $0x78] sm:$0xff] }
 0x495   : > { %8995 = vst [vmem:[#allocation34_spill] sm:$0xff] %v6901_v53  ;;  %v6947_v53 = vld [vmem:[#allocation2 + $0xda] sm:$0xff] }
 0x496   : > { %2819 = vrot.lane.b32.xlu0 %v6903_v55, %s4572_s25  ;;  %2797 = vrot.lane.b32.xlu1 %v6905_v52, %s4572_s25  ;;  %9005 = vst [vmem:[#allocation35_spill] sm:$0xff] %v6953_v59 }
 0x497   : > { %9019 = vst [vmem:[#allocation124_spill] sm:$0xff] %v7009_v28 }
 0x498   : > { %2799 = vrot.lane.b32.xlu2 %v6913_v6, %s4572_s25 }
 0x49c   : > { %v6919_v63 = vpop.permute.xlu0 %2677 }
 0x49d   : > { %8998 = vst [vmem:[#allocation55_spill] sm:$0xff] %v6919_v63  ;;  %v6941_v63 = vld [vmem:[#allocation2 + $0xca] sm:$0xff] }
 0x49e   : > { %2825 = vrot.lane.b32.xlu0 %v6921_v15, %s4572_s25  ;;  %2803 = vrot.lane.b32.xlu1 %v6923_v37, %s4572_s25  ;;  %v7037_v15 = vld [vmem:[#allocation2 + $0xc0] sm:$0xff] }
 0x49f   : > { %9027 = vst [vmem:[#allocation187_spill] sm:$0xff] %v7037_v15 }
 0x4a0   : > { %2805 = vrot.lane.b32.xlu2 %v6929_v61, %s4572_s25 }
 0x4a3   : > { %v6971_v59 = vpop.permute.xlu1 %2673 }
 0x4a4   : > { %v6937_v54 = vpop.permute.xlu0 %2683  ;;  %9009 = vst [vmem:[#allocation53_spill] sm:$0xff] %v6971_v59 }
 0x4a5   : > { %9002 = vst [vmem:[#allocation44_spill] sm:$0xff] %v6937_v54  ;;  %v6983_v54 = vld [vmem:[#allocation2 + $0x122] sm:$0xff] }
 0x4a6   : > { %2831 = vrot.lane.b32.xlu0 %v6939_v46, %s4572_s25  ;;  %2809 = vrot.lane.b32.xlu1 %v6941_v63, %s4572_s25  ;;  %v7027_v46 = vld [vmem:[#allocation2 + $0x98] sm:$0xff] }
 0x4a7   : > { %9024 = vst [vmem:[#allocation112_spill] sm:$0xff] %v7027_v46 }
 0x4a8   : > { %2811 = vrot.lane.b32.xlu2 %v6947_v53, %s4572_s25 }
 0x4aa   : > { %v6951_v0 = vpop.permute.xlu2 %2681 }
 0x4ab   : > { %9004 = vst [vmem:[#allocation110_spill] sm:$0xff] %v6951_v0 }
 0x4ac   : > { %v6955_v43 = vpop.permute.xlu0 %2689 }
 0x4ad   : > { %9006 = vst [vmem:[#allocation56_spill] sm:$0xff] %v6955_v43  ;;  %v6973_v43 = vld [vmem:[#allocation2 + $0x30] sm:$0xff] }
 0x4ae   : > { %2837 = vrot.lane.b32.xlu0 %v6957_v57, %s4572_s25  ;;  %2815 = vrot.lane.b32.xlu1 %v6959_v42, %s4572_s25  ;;  %9010 = vst [vmem:[#allocation88_spill] sm:$0xff] %v6973_v43  ;;  %v2329_v57 = vld [vmem:[#allocation2 + $0x18] sm:$0xff] }
 0x4b0   : > { %2817 = vrot.lane.b32.xlu2 %v6965_v11, %s4572_s25 }
 0x4b2   : > { %v6969_v30 = vpop.permute.xlu2 %2687 }
 0x4b3   : > { %9008 = vst [vmem:[#allocation95_spill] sm:$0xff] %v6969_v30 }
 0x4b4   : > { %v6977_v1 = vpop.permute.xlu0 %2695 }
 0x4b5   : > { %9011 = vst [vmem:[#allocation92_spill] sm:$0xff] %v6977_v1  ;;  %v6999_v1 = vld [vmem:[#allocation2 + $0x142] sm:$0xff] }
 0x4b6   : > { %2907 = vrot.lane.b32.xlu0 %v6973_v43, %s4573_s26  ;;  %2821 = vrot.lane.b32.xlu1 %v6975_v22, %s4572_s25  ;;  %v7011_v43 = vld [vmem:[#allocation2 + $0x15a] sm:$0xff] }
 0x4b7   : > { %9020 = vst [vmem:[#allocation125_spill] sm:$0xff] %v7011_v43 }
 0x4b8   : > { %2823 = vrot.lane.b32.xlu2 %v6983_v54, %s4572_s25 }
 0x4ba   : > { %v6987_v30 = vpop.permute.xlu2 %2693 }
 0x4bb   : > { %9012 = vst [vmem:[#allocation164_spill] sm:$0xff] %v6987_v30  ;;  %v6989_v0 = vpop.permute.xlu1 %2679 }
 0x4bc   : > { %9013 = vst [vmem:[#allocation174_spill] sm:$0xff] %v6989_v0  ;;  %v7001_v59 = vpop.permute.xlu0 %2701 }
 0x4bd   : > { %9016 = vst [vmem:[#allocation61_spill] sm:$0xff] %v7001_v59 }
 0x4be   : > { %2913 = vrot.lane.b32.xlu0 %v6991_v29, %s4573_s26  ;;  %2827 = vrot.lane.b32.xlu1 %v6993_v60, %s4572_s25  ;;  %v7017_v29 = vld [vmem:[#allocation2 + $0x16a] sm:$0xff] }
 0x4c0   : > { %2829 = vrot.lane.b32.xlu2 %v6999_v1, %s4572_s25 }
 0x4c2   : > { %v7005_v30 = vpop.permute.xlu2 %2699 }
 0x4c3   : > { %9017 = vst [vmem:[#allocation77_spill] sm:$0xff] %v7005_v30  ;;  %v7007_v0 = vpop.permute.xlu1 %2685 }
 0x4c4   : > { %9018 = vst [vmem:[#allocation111_spill] sm:$0xff] %v7007_v0 }
 0x4c6   : > { %2919 = vrot.lane.b32.xlu0 %v7009_v28, %s4573_s26  ;;  %2833 = vrot.lane.b32.xlu1 %v7011_v43, %s4572_s25  ;;  %v2330_v28 = vld [vmem:[#allocation2 + $0x20] sm:$0xff] }
 0x4c8   : > { %2835 = vrot.lane.b32.xlu2 %v7017_v29, %s4572_s25  ;;  %v7021_v59 = vpop.permute.xlu0 %2707  ;;  %s8231_s25 = scalar_lea.vmem %s8498_s5, %s4471_s20 }
 0x4c9   : > { %9021 = vst [vmem:[#allocation144_spill] sm:$0xff] %v7021_v59  ;;  %v2332_v59 = vld [vmem:[#allocation2 + $0x38] sm:$0xff] }
 0x4ca   : > { %v7023_v30 = vpop.permute.xlu2 %2705 }
 0x4cb   : > { %9022 = vst [vmem:[#allocation59_spill] sm:$0xff] %v7023_v30  ;;  %v7025_v0 = vpop.permute.xlu1 %2691 }
 0x4cc   : > { %9023 = vst [vmem:[#allocation76_spill] sm:$0xff] %v7025_v0  ;;  %v7044_v0 = vld [vmem:[#allocation2 + $0x48] sm:$0xff] }
 0x4ce   : > { %2925 = vrot.lane.b32.xlu0 %v7027_v46, %s4573_s26  ;;  %2903 = vrot.lane.b32.xlu1 %v2329_v57, %s4573_s26  ;;  %v7067_v46 = vld [vmem:[#allocation2 + $0x108] sm:$0xff] }
 0x4cf   : > { %9036 = vst [vmem:[#allocation93_spill] sm:$0xff] %v7067_v46 }
 0x4d0   : > { %2905 = vrot.lane.b32.xlu2 %v2330_v28, %s4573_s26  ;;  %v7033_v43 = vpop.permute.xlu0 %2777 }
 0x4d1   : > { %9025 = vst [vmem:[#allocation165_spill] sm:$0xff] %v7033_v43  ;;  %v2335_v43 = vld [vmem:[#allocation2 + $0x60] sm:$0xff] }
 0x4d2   : > { %v7035_v60 = vpop.permute.xlu2 %2775 }
 0x4d3   : > { %9026 = vst [vmem:[#allocation166_spill] sm:$0xff] %v7035_v60  ;;  %v7039_v30 = vpop.permute.xlu1 %2697  ;;  %v7052_v60 = vld [vmem:[#allocation2 + $0xe0] sm:$0xff] }
 0x4d4   : > { %9028 = vst [vmem:[#allocation46_spill] sm:$0xff] %v7039_v30  ;;  %v7057_v30 = vld [vmem:[#allocation2 + $0x68] sm:$0xff] }
 0x4d5   : > { %9031 = vst [vmem:[#allocation114_spill] sm:$0xff] %v7052_v60 }
 0x4d6   : > { %2931 = vrot.lane.b32.xlu0 %v7037_v15, %s4573_s26  ;;  %2909 = vrot.lane.b32.xlu1 %v2332_v59, %s4573_s26  ;;  %9032 = vst [vmem:[#allocation122_spill] sm:$0xff] %v7057_v30 }
 0x4d8   : > { %2911 = vrot.lane.b32.xlu2 %v7044_v0, %s4573_s26  ;;  %v7048_v57 = vpop.permute.xlu0 %2783 }
 0x4d9   : > { %9029 = vst [vmem:[#allocation47_spill] sm:$0xff] %v7048_v57 }
 0x4da   : > { %v7050_v28 = vpop.permute.xlu2 %2781 }
 0x4db   : > { %9030 = vst [vmem:[#allocation96_spill] sm:$0xff] %v7050_v28  ;;  %v7059_v59 = vpop.permute.xlu1 %2703  ;;  %v2338_v28 = vld [vmem:[#allocation2 + $0x80] sm:$0xff] }
 0x4dc   : > { %9033 = vst [vmem:[#allocation133_spill] sm:$0xff] %v7059_v59 }
 0x4de   : > { %2937 = vrot.lane.b32.xlu0 %v7052_v60, %s4573_s26  ;;  %2915 = vrot.lane.b32.xlu1 %v2335_v43, %s4573_s26  ;;  %v7072_v43 = vld [vmem:[#allocation2 + $0x90] sm:$0xff] }
 0x4df   : > { %9037 = vst [vmem:[#allocation154_spill] sm:$0xff] %v7072_v43 }
 0x4e0   : > { %2917 = vrot.lane.b32.xlu2 %v7057_v30, %s4573_s26  ;;  %v7063_v15 = vpop.permute.xlu0 %2789  ;;  %v7084_v30 = vld [vmem:[#allocation2 + $0x128] sm:$0xff] }
 0x4e1   : > { %9034 = vst [vmem:[#allocation145_spill] sm:$0xff] %v7063_v15 }
 0x4e2   : > { %v7065_v57 = vpop.permute.xlu2 %2787  ;;  %9042 = vst [vmem:[#allocation37_spill] sm:$0xff] %v7084_v30 }
 0x4e3   : > { %9035 = vst [vmem:[#allocation146_spill] sm:$0xff] %v7065_v57  ;;  %v7082_v57 = vld [vmem:[#allocation2 + $0xa8] sm:$0xff] }
 0x4e4   : > { %9041 = vst [vmem:[#allocation189_spill] sm:$0xff] %v7082_v57 }
 0x4e6   : > { %2943 = vrot.lane.b32.xlu0 %v7067_v46, %s4573_s26  ;;  %2921 = vrot.lane.b32.xlu1 %v2338_v28, %s4573_s26  ;;  %v7090_v28 = vld [vmem:[#allocation2 + $0xb0] sm:$0xff]  ;;  %v7100_v46 = vld [vmem:[#allocation2 + $0xc8] sm:$0xff] }
 0x4e7   : > { %9043 = vst [vmem:[#allocation62_spill] sm:$0xff] %v7090_v28 }
 0x4e8   : > { %2923 = vrot.lane.b32.xlu2 %v7072_v43, %s4573_s26  ;;  %v7076_v59 = vpop.permute.xlu1 %2709  ;;  %v7078_v60 = vpop.permute.xlu0 %2795  ;;  %9047 = vst [vmem:[#allocation135_spill] sm:$0xff] %v7100_v46  ;;  %v7102_v43 = vld [vmem:[#allocation2 + $0x150] sm:$0xff] }
 0x4e9   : > { %9038 = vst [vmem:[#allocation162_spill] sm:$0xff] %v7076_v59 }
 0x4ea   : > { %9039 = vst [vmem:[#allocation175_spill] sm:$0xff] %v7078_v60  ;;  %v7080_v15 = vpop.permute.xlu2 %2793 }
 0x4eb   : > { %9040 = vst [vmem:[#allocation188_spill] sm:$0xff] %v7080_v15 }
 0x4ec   : > { %9048 = vst [vmem:[#allocation142_spill] sm:$0xff] %v7102_v43 }
 0x4ee   : > { %2949 = vrot.lane.b32.xlu0 %v7084_v30, %s4573_s26  ;;  %2927 = vrot.lane.b32.xlu1 %v7082_v57, %s4573_s26  ;;  %v7108_v57 = vld [vmem:[#allocation2 + $0xd8] sm:$0xff]  ;;  %v7118_v30 = vld [vmem:[#allocation2 + $0xf0] sm:$0xff] }
 0x4ef   : > { %9052 = vst [vmem:[#allocation167_spill] sm:$0xff] %v7118_v30 }
 0x4f0   : > { %2929 = vrot.lane.b32.xlu2 %v7090_v28, %s4573_s26  ;;  %v7094_v59 = vpop.permute.xlu1 %2779  ;;  %v7096_v60 = vpop.permute.xlu0 %2801  ;;  %v7120_v28 = vld [vmem:[#allocation2 + $0x170] sm:$0xff] }
 0x4f1   : > { %9044 = vst [vmem:[#allocation99_spill] sm:$0xff] %v7094_v59 }
 0x4f2   : > { %9045 = vst [vmem:[#allocation100_spill] sm:$0xff] %v7096_v60  ;;  %v7098_v15 = vpop.permute.xlu2 %2799 }
 0x4f3   : > { %9046 = vst [vmem:[#allocation126_spill] sm:$0xff] %v7098_v15 }
 0x4f4   : > { %9053 = vst [vmem:[#allocation177_spill] sm:$0xff] %v7120_v28 }
 0x4f6   : > { %2955 = vrot.lane.b32.xlu0 %v7102_v43, %s4573_s26  ;;  %2933 = vrot.lane.b32.xlu1 %v7100_v46, %s4573_s26  ;;  %v2348_v43 = vld [vmem:[#allocation2 + $0xf8] sm:$0xff] }
 0x4f8   : > { %2935 = vrot.lane.b32.xlu2 %v7108_v57, %s4573_s26  ;;  %v7112_v59 = vpop.permute.xlu1 %2785  ;;  %v7114_v60 = vpop.permute.xlu0 %2807 }
 0x4f9   : > { %9049 = vst [vmem:[#allocation150_spill] sm:$0xff] %v7112_v59 }
 0x4fa   : > { %9050 = vst [vmem:[#allocation97_spill] sm:$0xff] %v7114_v60  ;;  %v7116_v15 = vpop.permute.xlu2 %2805 }
 0x4fb   : > { %9051 = vst [vmem:[#allocation103_spill] sm:$0xff] %v7116_v15  ;;  %v7133_v15 = vld [vmem:[#allocation2 + $0x110] sm:$0xff] }
 0x4fc   : > { %9057 = vst [vmem:[#allocation82_spill] sm:$0xff] %v7133_v15 }
 0x4fe   : > { %2961 = vrot.lane.b32.xlu0 %v7120_v28, %s4573_s26  ;;  %2939 = vrot.lane.b32.xlu1 %v7118_v30, %s4573_s26  ;;  %v2351_v28 = vld [vmem:[#allocation2 + $0x120] sm:$0xff] }
 0x500   : > { %2941 = vrot.lane.b32.xlu2 %v2348_v43, %s4573_s26  ;;  %v7127_v46 = vpop.permute.xlu1 %2791  ;;  %v7129_v59 = vpop.permute.xlu0 %2813 }
 0x501   : > { %9054 = vst [vmem:[#allocation185_spill] sm:$0xff] %v7127_v46 }
 0x502   : > { %9055 = vst [vmem:[#allocation48_spill] sm:$0xff] %v7129_v59  ;;  %v7131_v60 = vpop.permute.xlu2 %2811  ;;  %v2353_v59 = vld [vmem:[#allocation2 + $0x138] sm:$0xff] }
 0x503   : > { %9056 = vst [vmem:[#allocation64_spill] sm:$0xff] %v7131_v60  ;;  %v2354_v60 = vld [vmem:[#allocation2 + $0x140] sm:$0xff] }
 0x506   : > { %3031 = vrot.lane.b32.xlu0 %v6675_v34, %s4574_s27  ;;  %2945 = vrot.lane.b32.xlu1 %v7133_v15, %s4573_s26 }
 0x508   : > { %2947 = vrot.lane.b32.xlu2 %v2351_v28, %s4573_s26  ;;  %v7140_v30 = vpop.permute.xlu1 %2797  ;;  %v7142_v43 = vpop.permute.xlu0 %2819 }
 0x509   : > { %9058 = vst [vmem:[#allocation115_spill] sm:$0xff] %v7140_v30  ;;  %v2356_v30 = vld [vmem:[#allocation2 + $0x158] sm:$0xff] }
 0x50a   : > { %9059 = vst [vmem:[#allocation127_spill] sm:$0xff] %v7142_v43  ;;  %v7144_v46 = vpop.permute.xlu2 %2817  ;;  %v2357_v43 = vld [vmem:[#allocation2 + $0x168] sm:$0xff] }
 0x50b   : > { %9060 = vst [vmem:[#allocation128_spill] sm:$0xff] %v7144_v46  ;;  %v2453_v46 = vld [vmem:[#allocation2 + $0x180] sm:$0xff] }
 0x50e   : > { %3037 = vrot.lane.b32.xlu0 %v6689_v48, %s4574_s27  ;;  %2951 = vrot.lane.b32.xlu1 %v2353_v59, %s4573_s26 }
 0x510   : > { %2953 = vrot.lane.b32.xlu2 %v2354_v60, %s4573_s26  ;;  %v7150_v34 = vpop.permute.xlu1 %2803  ;;  %v7152_v15 = vpop.permute.xlu0 %2825 }
 0x512   : > { %v7154_v28 = vpop.permute.xlu2 %2823 }
 0x513   : > { %9061 = vst [vmem:[#allocation147_spill] sm:$0xff] %v7154_v28  ;;  %v2454_v28 = vld [vmem:[#allocation2 + $0x188] sm:$0xff] }
 0x516   : > { %3043 = vrot.lane.b32.xlu0 %v6703_v44, %s4574_s27  ;;  %2957 = vrot.lane.b32.xlu1 %v2356_v30, %s4573_s26 }
 0x518   : > { %2959 = vrot.lane.b32.xlu2 %v2357_v43, %s4573_s26  ;;  %v7160_v48 = vpop.permute.xlu1 %2809  ;;  %v7162_v59 = vpop.permute.xlu0 %2831 }
 0x51a   : > { %v7164_v60 = vpop.permute.xlu2 %2829 }
 0x51b   : > { %9062 = vst [vmem:[#allocation151_spill] sm:$0xff] %v7164_v60 }
 0x51e   : > { %3049 = vrot.lane.b32.xlu0 %v6720_v4, %s4574_s27  ;;  %2963 = vrot.lane.b32.xlu1 %v2453_v46, %s4573_s26 }
 0x520   : > { %2965 = vrot.lane.b32.xlu2 %v2454_v28, %s4573_s26  ;;  %v7170_v44 = vpop.permute.xlu1 %2815  ;;  %v7172_v30 = vpop.permute.xlu0 %2837 }
 0x522   : > { %v7174_v43 = vpop.permute.xlu2 %2835 }
 0x523   : > { %9063 = vst [vmem:[#allocation81_spill] sm:$0xff] %v7174_v43  ;;  %v2485_v43 = vld [vmem:[#allocation2 + $0x181] sm:$0xff] }
 0x526   : > { %3055 = vrot.lane.b32.xlu0 %v6743_v5, %s4574_s27  ;;  %3033 = vrot.lane.b32.xlu1 %v6669_v47, %s4574_s27 }
 0x528   : > { %3035 = vrot.lane.b32.xlu2 %v6677_v58, %s4574_s27  ;;  %v7182_v4 = vpop.permute.xlu1 %2821  ;;  %v7184_v46 = vpop.permute.xlu0 %2907 }
 0x529   : > { %9064 = vst [vmem:[#allocation155_spill] sm:$0xff] %v7182_v4  ;;  %v2569_v4 = vld [vmem:[#allocation2 + $0x109] sm:$0xff] }
 0x52a   : > { %v7186_v28 = vpop.permute.xlu2 %2905 }
 0x52e   : > { %3061 = vrot.lane.b32.xlu0 %v6773_v45, %s4574_s27  ;;  %3039 = vrot.lane.b32.xlu1 %v6681_v8, %s4574_s27 }
 0x530   : > { %3041 = vrot.lane.b32.xlu2 %v6691_v39, %s4574_s27  ;;  %v7194_v5 = vpop.permute.xlu1 %2827  ;;  %v7196_v47 = vpop.permute.xlu0 %2913 }
 0x531   : > { %9065 = vst [vmem:[#allocation168_spill] sm:$0xff] %v7194_v5 }
 0x532   : > { %9066 = vst [vmem:[#allocation169_spill] sm:$0xff] %v7196_v47  ;;  %v7198_v58 = vpop.permute.xlu2 %2911 }
 0x536   : > { %3067 = vrot.lane.b32.xlu0 %v6789_v13, %s4574_s27  ;;  %3045 = vrot.lane.b32.xlu1 %v6695_v23, %s4574_s27 }
 0x538   : > { %3047 = vrot.lane.b32.xlu2 %v6705_v41, %s4574_s27  ;;  %v7206_v45 = vpop.permute.xlu1 %2833  ;;  %v7208_v8 = vpop.permute.xlu0 %2919 }
 0x539   : > { %9067 = vst [vmem:[#allocation190_spill] sm:$0xff] %v7206_v45  ;;  %v9092_v45 = vld [vmem:[#allocation72_spill] sm:$0xff] }
 0x53a   : > { %9068 = vst [vmem:[#allocation36_spill] sm:$0xff] %v7208_v8  ;;  %v7210_v39 = vpop.permute.xlu2 %2917 }
 0x53b   : > { %9069 = vst [vmem:[#allocation49_spill] sm:$0xff] %v7210_v39 }
 0x53e   : > { %3073 = vrot.lane.b32.xlu0 %v6802_v3, %s4574_s27  ;;  %3051 = vrot.lane.b32.xlu1 %v6709_v36, %s4574_s27 }
 0x540   : > { %3053 = vrot.lane.b32.xlu2 %v6732_v2, %s4574_s27  ;;  %v7218_v13 = vpop.permute.xlu1 %2903  ;;  %v7220_v23 = vpop.permute.xlu0 %2925 }
 0x541   : > { %9070 = vst [vmem:[#allocation50_spill] sm:$0xff] %v7220_v23  ;;  %v9096_v23 = vld [vmem:[#allocation91_spill] sm:$0xff] }
 0x542   : > { %v7222_v41 = vpop.permute.xlu2 %2923 }
 0x543   : > { %9071 = vst [vmem:[#allocation101_spill] sm:$0xff] %v7222_v41  ;;  %v7423_v41 = vld [vmem:[#allocation2 + $0x182] sm:$0xff] }
 0x546   : > { %3079 = vrot.lane.b32.xlu0 %v6819_v27, %s4574_s27  ;;  %3057 = vrot.lane.b32.xlu1 %v6717_v35, %s4574_s27 }
 0x548   : > { %3059 = vrot.lane.b32.xlu2 %v6762_v32, %s4574_s27  ;;  %v7230_v3 = vpop.permute.xlu1 %2909  ;;  %v7232_v36 = vpop.permute.xlu0 %2931 }
 0x54a   : > { %v7234_v2 = vpop.permute.xlu2 %2929 }
 0x54e   : > { %3085 = vrot.lane.b32.xlu0 %v6834_v14, %s4574_s27  ;;  %3063 = vrot.lane.b32.xlu1 %v6729_v50, %s4574_s27 }
 0x550   : > { %3065 = vrot.lane.b32.xlu2 %v6778_v62, %s4574_s27  ;;  %v7242_v27 = vpop.permute.xlu1 %2915  ;;  %v7244_v35 = vpop.permute.xlu0 %2937 }
 0x551   : > { %9072 = vst [vmem:[#allocation116_spill] sm:$0xff] %v7242_v27  ;;  %v9121_v27 = vld [vmem:[#allocation111_spill] sm:$0xff] }
 0x552   : > { %v7246_v32 = vpop.permute.xlu2 %2935 }
 0x556   : > { %3091 = vrot.lane.b32.xlu0 %v2485_v43, %s4574_s27  ;;  %3069 = vrot.lane.b32.xlu1 %v6740_v16, %s4574_s27 }
 0x558   : > { %3071 = vrot.lane.b32.xlu2 %v6794_v17, %s4574_s27  ;;  %v7253_v14 = vpop.permute.xlu1 %2921  ;;  %v7255_v50 = vpop.permute.xlu0 %2943 }
 0x559   : > { %9073 = vst [vmem:[#allocation123_spill] sm:$0xff] %v7253_v14  ;;  %v9108_v14 = vld [vmem:[#allocation183_spill] sm:$0xff] }
 0x55a   : > { %v7257_v62 = vpop.permute.xlu2 %2941 }
 0x55e   : > { %3161 = vrot.lane.b32.xlu0 %v6863_v40, %s4575_s28  ;;  %3075 = vrot.lane.b32.xlu1 %v6751_v10, %s4574_s27 }
 0x560   : > { %3077 = vrot.lane.b32.xlu2 %v6807_v21, %s4574_s27  ;;  %v7265_v43 = vpop.permute.xlu1 %2927  ;;  %v7267_v16 = vpop.permute.xlu0 %2949 }
 0x561   : > { %9074 = vst [vmem:[#allocation136_spill] sm:$0xff] %v7265_v43 }
 0x562   : > { %9075 = vst [vmem:[#allocation148_spill] sm:$0xff] %v7267_v16  ;;  %v7269_v17 = vpop.permute.xlu2 %2947  ;;  %v9116_v16 = vld [vmem:[#allocation135_spill] sm:$0xff] }
 0x563   : > { %9076 = vst [vmem:[#allocation52_spill] sm:$0xff] %v7269_v17 }
 0x566   : > { %3167 = vrot.lane.b32.xlu0 %v6879_v18, %s4575_s28  ;;  %3081 = vrot.lane.b32.xlu1 %v6759_v31, %s4574_s27 }
 0x568   : > { %3083 = vrot.lane.b32.xlu2 %v6824_v12, %s4574_s27  ;;  %v7277_v40 = vpop.permute.xlu1 %2933  ;;  %v7279_v10 = vpop.permute.xlu0 %2955 }
 0x569   : > { %9077 = vst [vmem:[#allocation98_spill] sm:$0xff] %v7277_v40  ;;  %v7295_v40 = vld [vmem:[#allocation2 + $0x189] sm:$0xff] }
 0x56a   : > { %9078 = vst [vmem:[#allocation156_spill] sm:$0xff] %v7279_v10  ;;  %v7281_v21 = vpop.permute.xlu2 %2953  ;;  %v9102_v10 = vld [vmem:[#allocation154_spill] sm:$0xff] }
 0x56e   : > { %3173 = vrot.lane.b32.xlu0 %v6895_v56, %s4575_s28  ;;  %3087 = vrot.lane.b32.xlu1 %v6783_v24, %s4574_s27 }
 0x570   : > { %3089 = vrot.lane.b32.xlu2 %v6843_v9, %s4574_s27  ;;  %v7289_v18 = vpop.permute.xlu1 %2939  ;;  %v7291_v31 = vpop.permute.xlu0 %2961 }
 0x571   : > { %9079 = vst [vmem:[#allocation163_spill] sm:$0xff] %v7291_v31 }
 0x572   : > { %v7293_v12 = vpop.permute.xlu2 %2959 }
 0x576   : > { %3179 = vrot.lane.b32.xlu0 %v6913_v6, %s4575_s28  ;;  %3093 = vrot.lane.b32.xlu1 %v7295_v40, %s4574_s27 }
 0x578   : > { %3159 = vrot.lane.b32.xlu2 %v6857_v19, %s4575_s28  ;;  %v7303_v24 = vpop.permute.xlu1 %2945  ;;  %v7305_v9 = vpop.permute.xlu0 %3031 }
 0x57a   : > { %v7307_v56 = vpop.permute.xlu2 %2965 }
 0x57e   : > { %3185 = vrot.lane.b32.xlu0 %v6929_v61, %s4575_s28  ;;  %3163 = vrot.lane.b32.xlu1 %v6813_v33, %s4575_s28 }
 0x580   : > { %3165 = vrot.lane.b32.xlu2 %v6871_v7, %s4575_s28  ;;  %v7315_v6 = vpop.permute.xlu1 %2951  ;;  %v7317_v31 = vpop.permute.xlu0 %3037 }
 0x581   : > { %9080 = vst [vmem:[#allocation178_spill] sm:$0xff] %v7315_v6  ;;  %v9112_v6 = vld [vmem:[#allocation112_spill] sm:$0xff] }
 0x582   : > { %v7319_v19 = vpop.permute.xlu2 %3035 }
 0x586   : > { %3191 = vrot.lane.b32.xlu0 %v6947_v53, %s4575_s28  ;;  %3169 = vrot.lane.b32.xlu1 %v6829_v49, %s4575_s28 }
 0x588   : > { %3171 = vrot.lane.b32.xlu2 %v6889_v26, %s4575_s28  ;;  %v7327_v61 = vpop.permute.xlu1 %2957  ;;  %v7329_v33 = vpop.permute.xlu0 %3043 }
 0x589   : > { %9081 = vst [vmem:[#allocation191_spill] sm:$0xff] %v7327_v61  ;;  %v9097_v61 = vld [vmem:[#allocation122_spill] sm:$0xff] }
 0x58a   : > { %9082 = vst [vmem:[#allocation192_spill] sm:$0xff] %v7329_v33  ;;  %v7331_v7 = vpop.permute.xlu2 %3041 }
 0x58b   : > { %9083 = vst [vmem:[#allocation40_spill] sm:$0xff] %v7331_v7  ;;  %v9122_v7 = vld [vmem:[#allocation114_spill] sm:$0xff] }
 0x58c   : > { %v3658_v47 = vsel %vm225_vm0, %v9122_v7, %v9121_v27 }
 0x58e   : > { %3175 = vrot.lane.b32.xlu1 %v6841_v20, %s4575_s28  ;;  %3197 = vrot.lane.b32.xlu0 %v6965_v11, %s4575_s28 }
 0x590   : > { %3177 = vrot.lane.b32.xlu2 %v6905_v52, %s4575_s28  ;;  %v7339_v53 = vpop.permute.xlu1 %2963  ;;  %v7341_v49 = vpop.permute.xlu0 %3049 }
 0x591   : > { %9084 = vst [vmem:[#allocation65_spill] sm:$0xff] %v7339_v53  ;;  %v7381_v53 = vld [vmem:[#allocation2 + $0x18a] sm:$0xff] }
 0x592   : > { %9085 = vst [vmem:[#allocation105_spill] sm:$0xff] %v7341_v49  ;;  %v7343_v26 = vpop.permute.xlu2 %3047 }
 0x593   : > { %9086 = vst [vmem:[#allocation106_spill] sm:$0xff] %v7343_v26  ;;  %v2526_v26 = vld [vmem:[#allocation2 + $0x80] sm:$0xff] }
 0x596   : > { %3181 = vrot.lane.b32.xlu1 %v6855_v25, %s4575_s28  ;;  %3203 = vrot.lane.b32.xlu0 %v6983_v54, %s4575_s28 }
 0x598   : > { %3183 = vrot.lane.b32.xlu2 %v6923_v37, %s4575_s28  ;;  %v7351_v20 = vpop.permute.xlu1 %3033  ;;  %v7353_v11 = vpop.permute.xlu0 %3055 }
 0x599   : > { %9087 = vst [vmem:[#allocation129_spill] sm:$0xff] %v7353_v11 }
 0x59a   : > { %v7355_v52 = vpop.permute.xlu2 %3053 }
 0x59b   : > { %9088 = vst [vmem:[#allocation137_spill] sm:$0xff] %v7355_v52 }
 0x59e   : > { %3187 = vrot.lane.b32.xlu1 %v6869_v38, %s4575_s28  ;;  %3209 = vrot.lane.b32.xlu0 %v6999_v1, %s4575_s28 }
 0x5a0   : > { %3189 = vrot.lane.b32.xlu2 %v6941_v63, %s4575_s28  ;;  %v7363_v25 = vpop.permute.xlu1 %3039  ;;  %v7365_v54 = vpop.permute.xlu0 %3061 }
 0x5a1   : > { %9089 = vst [vmem:[#allocation143_spill] sm:$0xff] %v7365_v54 }
 0x5a2   : > { %v7367_v37 = vpop.permute.xlu2 %3059 }
 0x5a6   : > { %3193 = vrot.lane.b32.xlu1 %v6887_v51, %s4575_s28  ;;  %3215 = vrot.lane.b32.xlu0 %v7017_v29, %s4575_s28 }
 0x5a8   : > { %3195 = vrot.lane.b32.xlu2 %v6959_v42, %s4575_s28  ;;  %v7375_v38 = vpop.permute.xlu1 %3045  ;;  %v7377_v1 = vpop.permute.xlu0 %3067 }
 0x5a9   : > { %9090 = vst [vmem:[#allocation152_spill] sm:$0xff] %v7375_v38  ;;  %v2552_v38 = vld [vmem:[#allocation2 + $0x39] sm:$0xff] }
 0x5aa   : > { %v7379_v63 = vpop.permute.xlu2 %3065 }
 0x5ae   : > { %3199 = vrot.lane.b32.xlu1 %v6903_v55, %s4575_s28  ;;  %3221 = vrot.lane.b32.xlu0 %v7381_v53, %s4575_s28  ;;  %v9093_v55 = vld [vmem:[#allocation45_spill] sm:$0xff] }
 0x5b0   : > { %3201 = vrot.lane.b32.xlu2 %v6975_v22, %s4575_s28  ;;  %v7389_v29 = vpop.permute.xlu1 %3051  ;;  %v7391_v51 = vpop.permute.xlu0 %3073 }
 0x5b1   : > { %9091 = vst [vmem:[#allocation102_spill] sm:$0xff] %v7389_v29  ;;  %v9101_v29 = vld [vmem:[#allocation94_spill] sm:$0xff] }
 0x5b2   : > { %v7393_v54 = vpop.permute.xlu2 %3071 }
 0x5b6   : > { %3205 = vrot.lane.b32.xlu1 %v9092_v45, %s4575_s28  ;;  %3291 = vrot.lane.b32.xlu0 %v7044_v0, %s4576_s29  ;;  %v9098_v45 = vld [vmem:[#allocation125_spill] sm:$0xff] }
 0x5b8   : > { %3207 = vrot.lane.b32.xlu2 %v9093_v55, %s4575_s28  ;;  %v7401_v11 = vpop.permute.xlu1 %3057  ;;  %v7403_v43 = vpop.permute.xlu0 %3079 }
 0x5b9   : > { %9094 = vst [vmem:[#allocation104_spill] sm:$0xff] %v7403_v43 }
 0x5ba   : > { %v7405_v52 = vpop.permute.xlu2 %3077 }
 0x5bb   : > { %9095 = vst [vmem:[#allocation170_spill] sm:$0xff] %v7405_v52  ;;  %v2529_v52 = vld [vmem:[#allocation2 + $0xa8] sm:$0xff] }
 0x5be   : > { %3211 = vrot.lane.b32.xlu1 %v9096_v23, %s4575_s28  ;;  %3297 = vrot.lane.b32.xlu0 %v9097_v61, %s4576_s29 }
 0x5c0   : > { %3213 = vrot.lane.b32.xlu2 %v9098_v45, %s4575_s28  ;;  %v7413_v60 = vpop.permute.xlu1 %3063  ;;  %v7415_v0 = vpop.permute.xlu0 %3085 }
 0x5c1   : > { %9099 = vst [vmem:[#allocation179_spill] sm:$0xff] %v7415_v0  ;;  %v9105_v0 = vld [vmem:[#allocation88_spill] sm:$0xff] }
 0x5c2   : > { %v7417_v55 = vpop.permute.xlu2 %3083 }
 0x5c3   : > { %9100 = vst [vmem:[#allocation186_spill] sm:$0xff] %v7417_v55  ;;  %v9106_v55 = vld [vmem:[#allocation62_spill] sm:$0xff] }
 0x5c6   : > { %3217 = vrot.lane.b32.xlu1 %v9101_v29, %s4575_s28  ;;  %3303 = vrot.lane.b32.xlu0 %v9102_v10, %s4576_s29  ;;  %v2520_v29 = vld [vmem:[#allocation2 + $0x38] sm:$0xff] }
 0x5c8   : > { %3219 = vrot.lane.b32.xlu2 %v7423_v41, %s4575_s28  ;;  %v3070_v23 = vpop.permute.xlu1 %3069  ;;  %v7427_v61 = vpop.permute.xlu0 %3091 }
 0x5c9   : > { %9103 = vst [vmem:[#allocation51_spill] sm:$0xff] %v7427_v61  ;;  %v2523_v61 = vld [vmem:[#allocation2 + $0x60] sm:$0xff] }
 0x5ca   : > { %v7429_v45 = vpop.permute.xlu2 %3089 }
 0x5cb   : > { %9104 = vst [vmem:[#allocation68_spill] sm:$0xff] %v7429_v45 }
 0x5ce   : > { %3287 = vrot.lane.b32.xlu1 %v9105_v0, %s4576_s29  ;;  %3309 = vrot.lane.b32.xlu0 %v9106_v55, %s4576_s29 }
 0x5d0   : > { %3289 = vrot.lane.b32.xlu2 %v2520_v29, %s4576_s29  ;;  %v7436_v10 = vpop.permute.xlu1 %3075  ;;  %v7438_v5 = vpop.permute.xlu0 %3161  ;;  %v9109_v29 = vld [vmem:[#allocation124_spill] sm:$0xff] }
 0x5d1   : > { %9107 = vst [vmem:[#allocation89_spill] sm:$0xff] %v7436_v10  ;;  %v9123_v10 = vld [vmem:[#allocation48_spill] sm:$0xff] }
 0x5d2   : > { %v7440_v49 = vpop.permute.xlu2 %3159  ;;  %v3690_v17 = vsel %vm1681_vm3, %v3658_v47, %v9123_v10  ;;  %v2568_v10 = vld [vmem:[#allocation2 + $0xf9] sm:$0xff] }
 0x5d6   : > { %3293 = vrot.lane.b32.xlu1 %v9108_v14, %s4576_s29  ;;  %3315 = vrot.lane.b32.xlu0 %v7108_v57, %s4576_s29 }
 0x5d8   : > { %3295 = vrot.lane.b32.xlu2 %v2523_v61, %s4576_s29  ;;  %v3082_v0 = vpop.permute.xlu1 %3081  ;;  %v7447_v55 = vpop.permute.xlu0 %3167  ;;  %v2583_v61 = vld [vmem:[#allocation2 + $0x32] sm:$0xff] }
 0x5da   : > { %v7449_v45 = vpop.permute.xlu2 %3165 }
 0x5de   : > { %3299 = vrot.lane.b32.xlu1 %v9109_v29, %s4576_s29  ;;  %3575 = vrot.lane.b32.xlu0 %v6959_v42, %s4578_s6 }
 0x5e0   : > { %3301 = vrot.lane.b32.xlu2 %v2526_v26, %s4576_s29  ;;  %v7456_v14 = vpop.permute.xlu1 %3087  ;;  %v7458_v8 = vpop.permute.xlu0 %3173 }
 0x5e1   : > { %9110 = vst [vmem:[#allocation117_spill] sm:$0xff] %v7458_v8  ;;  %v9115_v8 = vld [vmem:[#allocation187_spill] sm:$0xff] }
 0x5e2   : > { %v7460_v43 = vpop.permute.xlu2 %3171 }
 0x5e3   : > { %9111 = vst [vmem:[#allocation130_spill] sm:$0xff] %v7460_v43 }
 0x5e6   : > { %3305 = vrot.lane.b32.xlu1 %v9112_v6, %s4576_s29  ;;  %3543 = vrot.lane.b32.xlu0 %v2583_v61, %s4578_s6 }
 0x5e8   : > { %3307 = vrot.lane.b32.xlu2 %v2529_v52, %s4576_s29  ;;  %v7466_v29 = vpop.permute.xlu1 %3093  ;;  %v7468_v42 = vpop.permute.xlu0 %3179 }
 0x5e9   : > { %9113 = vst [vmem:[#allocation131_spill] sm:$0xff] %v7468_v42  ;;  %v9118_v42 = vld [vmem:[#allocation167_spill] sm:$0xff] }
 0x5ea   : > { %v7470_v26 = vpop.permute.xlu2 %3177 }
 0x5eb   : > { %9114 = vst [vmem:[#allocation149_spill] sm:$0xff] %v7470_v26  ;;  %v2567_v26 = vld [vmem:[#allocation2 + $0xf1] sm:$0xff] }
 0x5ee   : > { %3311 = vrot.lane.b32.xlu1 %v9115_v8, %s4576_s29  ;;  %3417 = vrot.lane.b32.xlu0 %v2552_v38, %s4577_s30 }
 0x5f0   : > { %3313 = vrot.lane.b32.xlu2 %v9116_v16, %s4576_s29  ;;  %v7477_v39 = vpop.permute.xlu1 %3163  ;;  %v7479_v61 = vpop.permute.xlu0 %3185 }
 0x5f2   : > { %v7481_v52 = vpop.permute.xlu2 %3183 }
 0x5f3   : > { %9117 = vst [vmem:[#allocation66_spill] sm:$0xff] %v7481_v52  ;;  %v2551_v52 = vld [vmem:[#allocation2 + $0x31] sm:$0xff] }
 0x5f6   : > { %3319 = vrot.lane.b32.xlu1 %v9118_v42, %s4576_s29  ;;  %3451 = vrot.lane.b32.xlu0 %v2569_v4, %s4577_s30  ;;  %v9124_v4 = vld [vmem:[#allocation82_spill] sm:$0xff]  ;;  %v3722_v42 = vsel %vm1714_vm4, %v3690_v17, %v7257_v62  ;;  %v2600_v62 = vld [vmem:[#allocation2 + $0xfa] sm:$0xff] }
 0x5f8   : > { %3447 = vrot.lane.b32.xlu2 %v2567_v26, %s4577_s30  ;;  %v7487_v43 = vpop.permute.xlu1 %3169  ;;  %v7489_v38 = vpop.permute.xlu0 %3191  ;;  %v2536_v26 = vld [vmem:[#allocation2 + $0xf8] sm:$0xff] }
 0x5f9   : > { %9119 = vst [vmem:[#allocation85_spill] sm:$0xff] %v7487_v43  ;;  %v3754_v43 = vsel %vm1747_vm6, %v3722_v42, %v3070_v23 }
 0x5fa   : > { %v7491_v33 = vpop.permute.xlu2 %3189 }
 0x5fb   : > { %9120 = vst [vmem:[#allocation157_spill] sm:$0xff] %v7491_v33 }
 0x5fe   : > { %3415 = vrot.lane.b32.xlu1 %v2551_v52, %s4577_s30  ;;  %3325 = vrot.lane.b32.xlu0 %v9124_v4, %s4576_s29  ;;  %v9129_v4 = vld [vmem:[#allocation46_spill] sm:$0xff] }
 0x600   : > { %3321 = vrot.lane.b32.xlu2 %v2536_v26, %s4576_s29  ;;  %v7505_v33 = vpop.permute.xlu1 %3175  ;;  %v3198_v27 = vpop.permute.xlu0 %3197  ;;  %v2586_v26 = vld [vmem:[#allocation2 + $0x52] sm:$0xff] }
 0x601   : > { %9125 = vst [vmem:[#allocation171_spill] sm:$0xff] %v7505_v33  ;;  %v7508_v7 = vsel %vm1780_vm5, %v3754_v43, %v3198_v27  ;;  %v9130_v43 = vld [vmem:[#allocation37_spill] sm:$0xff] }
 0x602   : > { %v7510_v47 = vpop.permute.xlu2 %3195  ;;  %v3664_v42 = vsel %vm225_vm0, %v9130_v43, %v9129_v4 }
 0x603   : > { %v3696_v27 = vsel %vm1681_vm3, %v3664_v42, %v7152_v15  ;;  %v9134_v42 = vld [vmem:[#allocation133_spill] sm:$0xff] }
 0x606   : > { %3449 = vrot.lane.b32.xlu1 %v2568_v10, %s4577_s30  ;;  %3581 = vrot.lane.b32.xlu0 %v6975_v22, %s4578_s6  ;;  %v9131_v10 = vld [vmem:[#allocation93_spill] sm:$0xff]  ;;  %v3728_v22 = vsel %vm1714_vm4, %v3696_v27, %v7281_v21 }
 0x608   : > { %3577 = vrot.lane.b32.xlu2 %v2600_v62, %s4578_s6  ;;  %v7516_v17 = vpop.permute.xlu1 %3181  ;;  %v7518_v23 = vpop.permute.xlu0 %3203  ;;  %v2584_v62 = vld [vmem:[#allocation2 + $0x3a] sm:$0xff] }
 0x609   : > { %9126 = vst [vmem:[#allocation172_spill] sm:$0xff] %v7516_v17  ;;  %v3760_v17 = vsel %vm1747_vm6, %v3728_v22, %v3082_v0 }
 0x60a   : > { %9127 = vst [vmem:[#allocation193_spill] sm:$0xff] %v7518_v23  ;;  %v7520_v52 = vpop.permute.xlu2 %3201  ;;  %v2601_v23 = vld [vmem:[#allocation2 + $0x10a] sm:$0xff] }
 0x60b   : > { %9128 = vst [vmem:[#allocation54_spill] sm:$0xff] %v7520_v52  ;;  %v2555_v52 = vld [vmem:[#allocation2 + $0x61] sm:$0xff] }
 0x60e   : > { %3323 = vrot.lane.b32.xlu1 %v9131_v10, %s4576_s29  ;;  %3549 = vrot.lane.b32.xlu0 %v2586_v26, %s4578_s6  ;;  %v9135_v10 = vld [vmem:[#allocation142_spill] sm:$0xff] }
 0x60f   : > { %v3667_v26 = vsel %vm225_vm0, %v9135_v10, %v9134_v42  ;;  %v9139_v42 = vld [vmem:[#allocation177_spill] sm:$0xff]  ;;  %v2585_v10 = vld [vmem:[#allocation2 + $0x4a] sm:$0xff] }
 0x610   : > { %3545 = vrot.lane.b32.xlu2 %v2584_v62, %s4578_s6  ;;  %v7534_v33 = vpop.permute.xlu1 %3187  ;;  %v3210_v4 = vpop.permute.xlu0 %3209  ;;  %v3699_v21 = vsel %vm1681_vm3, %v3667_v26, %v7162_v59 }
 0x611   : > { %v7537_v43 = vsel %vm1780_vm5, %v3760_v17, %v3210_v4  ;;  %v3731_v0 = vsel %vm1714_vm4, %v3699_v21, %v7293_v12  ;;  %v2553_v17 = vld [vmem:[#allocation2 + $0x49] sm:$0xff]  ;;  %v2570_v21 = vld [vmem:[#allocation2 + $0x111] sm:$0xff] }
 0x612   : > { %9132 = vst [vmem:[#allocation118_spill] sm:$0xff] %v7537_v43  ;;  %v7539_v15 = vpop.permute.xlu2 %3207  ;;  %v3763_v27 = vsel %vm1747_vm6, %v3731_v0, %v7456_v14  ;;  %v2572_v12 = vld [vmem:[#allocation2 + $0x129] sm:$0xff]  ;;  %v2575_v43 = vld [vmem:[#allocation2 + $0x151] sm:$0xff] }
 0x613   : > { %9133 = vst [vmem:[#allocation138_spill] sm:$0xff] %v7539_v15 }
 0x616   : > { %3579 = vrot.lane.b32.xlu1 %v2601_v23, %s4578_s6  ;;  %3423 = vrot.lane.b32.xlu0 %v2555_v52, %s4577_s30  ;;  %v9138_v23 = vld [vmem:[#allocation162_spill] sm:$0xff] }
 0x617   : > { %v3670_v52 = vsel %vm225_vm0, %v9139_v42, %v9138_v23  ;;  %v2554_v23 = vld [vmem:[#allocation2 + $0x51] sm:$0xff] }
 0x618   : > { %3419 = vrot.lane.b32.xlu2 %v2553_v17, %s4577_s30  ;;  %v7553_v22 = vpop.permute.xlu1 %3193  ;;  %v3216_v62 = vpop.permute.xlu0 %3215  ;;  %v3702_v26 = vsel %vm1681_vm3, %v3670_v52, %v7172_v30  ;;  %v2541_v42 = vld [vmem:[#allocation2 + $0x138] sm:$0xff] }
 0x619   : > { %v7556_v4 = vsel %vm1780_vm5, %v3763_v27, %v3216_v62  ;;  %v3734_v14 = vsel %vm1714_vm4, %v3702_v26, %v7307_v56  ;;  %v2539_v56 = vld [vmem:[#allocation2 + $0x120] sm:$0xff] }
 0x61a   : > { %9136 = vst [vmem:[#allocation58_spill] sm:$0xff] %v7556_v4  ;;  %v7558_v59 = vpop.permute.xlu2 %3213  ;;  %v3766_v0 = vsel %vm1747_vm6, %v3734_v14, %v7466_v29  ;;  %v2605_v26 = vld [vmem:[#allocation2 + $0x13a] sm:$0xff]  ;;  %v2603_v14 = vld [vmem:[#allocation2 + $0x122] sm:$0xff] }
 0x61b   : > { %9137 = vst [vmem:[#allocation158_spill] sm:$0xff] %v7558_v59 }
 0x61e   : > { %3547 = vrot.lane.b32.xlu1 %v2585_v10, %s4578_s6  ;;  %3457 = vrot.lane.b32.xlu0 %v2572_v12, %s4577_s30  ;;  %v2571_v12 = vld [vmem:[#allocation2 + $0x121] sm:$0xff] }
 0x620   : > { %3453 = vrot.lane.b32.xlu2 %v2570_v21, %s4577_s30  ;;  %v7572_v17 = vpop.permute.xlu1 %3199  ;;  %v3222_v27 = vpop.permute.xlu0 %3221 }
 0x621   : > { %v7575_v62 = vsel %vm1780_vm5, %v3766_v0, %v3222_v27 }
 0x622   : > { %9140 = vst [vmem:[#allocation180_spill] sm:$0xff] %v7575_v62  ;;  %v7577_v30 = vpop.permute.xlu2 %3219  ;;  %v3903_v62 = vld [vmem:[%s8496_s3 + $0x40] sm:$0xff] }
 0x623   : > { %9141 = vst [vmem:[#allocation194_spill] sm:$0xff] %v7577_v30  ;;  %4482 = vmatpush.msra.mxu3 %v3903_v62  ;;  %4011 = vmatpush.msra.mxu1 %v3903_v62  ;;  %v2558_v30 = vld [vmem:[#allocation2 + $0x81] sm:$0xff] }
 0x624   : > { %v3900_v62 = vld [vmem:[%s8496_s3 + $0x28] sm:$0xff] }
 0x626   : > { %3421 = vrot.lane.b32.xlu1 %v2554_v23, %s4577_s30  ;;  %3331 = vrot.lane.b32.xlu0 %v2541_v42, %s4576_s29  ;;  %v2540_v23 = vld [vmem:[#allocation2 + $0x128] sm:$0xff]  ;;  %v2589_v42 = vld [vmem:[#allocation2 + $0x7a] sm:$0xff] }
 0x628   : > { %3327 = vrot.lane.b32.xlu2 %v2539_v56, %s4576_s29  ;;  %v7582_v29 = vpop.permute.xlu1 %3205  ;;  %v7584_v52 = vpop.permute.xlu0 %3291  ;;  %v2587_v56 = vld [vmem:[#allocation2 + $0x62] sm:$0xff] }
 0x62a   : > { %v7586_v10 = vpop.permute.xlu2 %3289 }
 0x62e   : > { %3455 = vrot.lane.b32.xlu1 %v2571_v12, %s4577_s30  ;;  %3587 = vrot.lane.b32.xlu0 %v2605_v26, %s4578_s6 }
 0x630   : > { %3583 = vrot.lane.b32.xlu2 %v2603_v14, %s4578_s6  ;;  %v7591_v21 = vpop.permute.xlu1 %3211  ;;  %v7593_v0 = vpop.permute.xlu0 %3297 }
 0x631   : > { %9142 = vst [vmem:[#allocation69_spill] sm:$0xff] %v7591_v21 }
 0x632   : > { %v7595_v27 = vpop.permute.xlu2 %3295 }
 0x636   : > { %3329 = vrot.lane.b32.xlu1 %v2540_v23, %s4576_s29  ;;  %3555 = vrot.lane.b32.xlu0 %v2589_v42, %s4578_s6  ;;  %v3902_v23 = vld [vmem:[%s8496_s3 + $0x38] sm:$0xff]  ;;  %v2604_v42 = vld [vmem:[#allocation2 + $0x12a] sm:$0xff] }
 0x637   : > { %4483 = vmatpush.msra.mxu3 %v3902_v23  ;;  %4012 = vmatpush.msra.mxu1 %v3902_v23  ;;  %v9147_v23 = vld [vmem:[#allocation43_spill] sm:$0xff] }
 0x638   : > { %3551 = vrot.lane.b32.xlu2 %v2587_v56, %s4578_s6  ;;  %v7600_v12 = vpop.permute.xlu1 %3217  ;;  %v7602_v26 = vpop.permute.xlu0 %3303  ;;  %v3901_v56 = vld [vmem:[%s8496_s3 + $0x30] sm:$0xff] }
 0x639   : > { %9143 = vst [vmem:[#allocation109_spill] sm:$0xff] %v7600_v12  ;;  %v2556_v12 = vld [vmem:[#allocation2 + $0x69] sm:$0xff]  ;;  %4484 = vmatpush.msra.mxu3 %v3901_v56  ;;  %4013 = vmatpush.msra.mxu1 %v3901_v56 }
 0x63a   : > { %9144 = vst [vmem:[#allocation139_spill] sm:$0xff] %v7602_v26  ;;  %v7604_v14 = vpop.permute.xlu2 %3301  ;;  %v2588_v56 = vld [vmem:[#allocation2 + $0x6a] sm:$0xff] }
 0x63b   : > { %4485 = vmatpush.msra.mxu3 %v3900_v62  ;;  %4014 = vmatpush.msra.mxu1 %v3900_v62 }
 0x63e   : > { %3585 = vrot.lane.b32.xlu1 %v2604_v42, %s4578_s6  ;;  %3429 = vrot.lane.b32.xlu0 %v2558_v30, %s4577_s30  ;;  %v3899_v42 = vld [vmem:[%s8496_s3 + $0x20] sm:$0xff] }
 0x63f   : > { %4486 = vmatpush.msra.mxu3 %v3899_v42  ;;  %4015 = vmatpush.msra.mxu1 %v3899_v42 }
 0x640   : > { %3425 = vrot.lane.b32.xlu2 %v2556_v12, %s4577_s30  ;;  %v7618_v4 = vpop.permute.xlu1 %3287  ;;  %v7620_v59 = vpop.permute.xlu0 %3309  ;;  %v9148_v12 = vld [vmem:[#allocation189_spill] sm:$0xff] }
 0x641   : > { %9145 = vst [vmem:[#allocation70_spill] sm:$0xff] %v7620_v59  ;;  %v3653_v21 = vsel %vm225_vm0, %v9148_v12, %v9147_v23  ;;  %v3898_v59 = vld [vmem:[%s8496_s3 + $0x18] sm:$0xff]  ;;  %v3897_v23 = vld [vmem:[%s8496_s3 + $0x10] sm:$0xff] }
 0x642   : > { %v7625_v30 = vpop.permute.xlu2 %3307  ;;  %v3685_v26 = vsel %vm1681_vm3, %v3653_v21, %v7150_v34  ;;  %v9150_v34 = vld [vmem:[#allocation100_spill] sm:$0xff]  ;;  %4487 = vmatpush.msra.mxu3 %v3898_v59  ;;  %4016 = vmatpush.msra.mxu1 %v3898_v59  ;;  %v3895_v59 = vld [vmem:[%s8496_s3] sm:$0xff] }
 0x643   : > { %9146 = vst [vmem:[#allocation108_spill] sm:$0xff] %v7625_v30  ;;  %v9149_v30 = vld [vmem:[#allocation53_spill] sm:$0xff]  ;;  %v3717_v62 = vsel %vm1714_vm4, %v3685_v26, %v7232_v36 }
 0x644   : > { %v3652_v15 = vsel %vm225_vm0, %v9112_v6, %v9149_v30  ;;  %v3749_v42 = vsel %vm1747_vm6, %v3717_v62, %v7367_v37  ;;  %v2573_v12 = vld [vmem:[#allocation2 + $0x139] sm:$0xff]  ;;  %4488 = vmatpush.msra.mxu3 %v3897_v23  ;;  %v3896_v37 = vld [vmem:[%s8496_s3 + $0x8] sm:$0xff]  ;;  %4017 = vmatpush.msra.mxu1 %v3897_v23 }
 0x645   : > { %v3684_v21 = vsel %vm1681_vm3, %v3652_v15, %v9150_v34  ;;  %v3781_v6 = vsel %vm1780_vm5, %v3749_v42, %v7534_v33  ;;  %v2544_v62 = vld [vmem:[#allocation2 + $0x158] sm:$0xff]  ;;  %v2542_v23 = vld [vmem:[#allocation2 + $0x140] sm:$0xff] }
 0x646   : > { %3553 = vrot.lane.b32.xlu1 %v2588_v56, %s4578_s6  ;;  %3463 = vrot.lane.b32.xlu0 %v2575_v43, %s4577_s30  ;;  %v3716_v36 = vsel %vm1714_vm4, %v3684_v21, %v7234_v2  ;;  %v2574_v42 = vld [vmem:[#allocation2 + $0x141] sm:$0xff] }
 0x647   : > { %v3748_v15 = vsel %vm1747_vm6, %v3716_v36, %v7401_v11  ;;  %4489 = vmatpush.msra.mxu3 %v3896_v37  ;;  %4018 = vmatpush.msra.mxu1 %v3896_v37  ;;  %v2557_v11 = vld [vmem:[#allocation2 + $0x79] sm:$0xff]  ;;  %v2606_v36 = vld [vmem:[#allocation2 + $0x142] sm:$0xff]  ;;  %v2543_v37 = vld [vmem:[#allocation2 + $0x150] sm:$0xff] }
 0x648   : > { %3459 = vrot.lane.b32.xlu2 %v2573_v12, %s4577_s30  ;;  %v7657_v43 = vpop.permute.xlu1 %3293  ;;  %v3316_v26 = vpop.permute.xlu0 %3315  ;;  %v3780_v2 = vsel %vm1780_vm5, %v3748_v15, %v7479_v61  ;;  %v2608_v12 = vld [vmem:[#allocation2 + $0x15a] sm:$0xff] }
 0x649   : > { %v7662_v30 = vsel %vm1813_vm7, %v3781_v6, %v3316_v26  ;;  %4490 = vmatpush.msra.mxu3 %v3895_v59  ;;  %4019 = vmatpush.msra.mxu1 %v3895_v59 }
 0x64a   : > { %9151 = vst [vmem:[#allocation181_spill] sm:$0xff] %v7662_v30  ;;  %v3314_v33 = vpop.permute.xlu2 %3313  ;;  %v2607_v30 = vld [vmem:[#allocation2 + $0x152] sm:$0xff] }
 0x64b   : > { %v7673_v56 = vsel %vm1813_vm7, %v3780_v2, %v3314_v33  ;;  %v2592_v2 = vld [vmem:[#allocation2 + $0x9a] sm:$0xff]  ;;  %v2590_v33 = vld [vmem:[#allocation2 + $0x82] sm:$0xff] }
 0x64c   : > { %9152 = vst [vmem:[#allocation63_spill] sm:$0xff] %v7673_v56  ;;  %v2561_v56 = vld [vmem:[#allocation2 + $0xa9] sm:$0xff] }
 0x64e   : > { %3427 = vrot.lane.b32.xlu1 %v2557_v11, %s4577_s30  ;;  %3337 = vrot.lane.b32.xlu0 %v2544_v62, %s4576_s29 }
 0x650   : > { %3333 = vrot.lane.b32.xlu2 %v2542_v23, %s4576_s29  ;;  %v7678_v61 = vpop.permute.xlu1 %3299  ;;  %v3576_v34 = vpop.permute.xlu0 %3575  ;;  %v9155_v23 = vld [vmem:[#allocation174_spill] sm:$0xff] }
 0x652   : > { %v3448_v21 = vpop.permute.xlu2 %3447 }
 0x656   : > { %3461 = vrot.lane.b32.xlu1 %v2574_v42, %s4577_s30  ;;  %3593 = vrot.lane.b32.xlu0 %v2608_v12, %s4578_s6  ;;  %v3655_v42 = vsel %vm225_vm0, %v9115_v8, %v9155_v23  ;;  %v9156_v12 = vld [vmem:[#allocation97_spill] sm:$0xff] }
 0x658   : > { %3589 = vrot.lane.b32.xlu2 %v2606_v36, %s4578_s6  ;;  %v7683_v6 = vpop.permute.xlu1 %3305  ;;  %v3544_v26 = vpop.permute.xlu0 %3543  ;;  %v3687_v36 = vsel %vm1681_vm3, %v3655_v42, %v9156_v12 }
 0x659   : > { %9153 = vst [vmem:[#allocation73_spill] sm:$0xff] %v7683_v6 }
 0x65a   : > { %v7685_v15 = vpop.permute.xlu2 %3321 }
 0x65e   : > { %3335 = vrot.lane.b32.xlu1 %v2543_v37, %s4576_s29  ;;  %3561 = vrot.lane.b32.xlu0 %v2592_v2, %s4578_s6  ;;  %v3719_v37 = vsel %vm1714_vm4, %v3687_v36, %v7246_v32  ;;  %v9157_v36 = vld [vmem:[#allocation39_spill] sm:$0xff] }
 0x65f   : > { %v3751_v2 = vsel %vm1747_vm6, %v3719_v37, %v7413_v60  ;;  %v9158_v37 = vld [vmem:[#allocation166_spill] sm:$0xff] }
 0x660   : > { %3557 = vrot.lane.b32.xlu2 %v2590_v33, %s4578_s6  ;;  %v7690_v59 = vpop.permute.xlu1 %3311  ;;  %v3418_v11 = vpop.permute.xlu0 %3417  ;;  %v2559_v33 = vld [vmem:[#allocation2 + $0x91] sm:$0xff]  ;;  %v3783_v8 = vsel %vm1780_vm5, %v3751_v2, %v7489_v38 }
 0x661   : > { %9154 = vst [vmem:[#allocation119_spill] sm:$0xff] %v7690_v59  ;;  %v2327_v59 = vld [vmem:[#allocation2] sm:$0xff]  ;;  %v2591_v2 = vld [vmem:[#allocation2 + $0x92] sm:$0xff] }
 0x662   : > { %v7692_v62 = vpop.permute.xlu2 %3577 }
 0x666   : > { %3591 = vrot.lane.b32.xlu1 %v2607_v30, %s4578_s6  ;;  %3435 = vrot.lane.b32.xlu0 %v2561_v56, %s4577_s30  ;;  %v3639_v56 = vsel %vm225_vm0, %v2327_v59, %v9157_v36  ;;  %v2328_v59 = vld [vmem:[#allocation2 + $0x8] sm:$0xff]  ;;  %v9159_v36 = vld [vmem:[#allocation33_spill] sm:$0xff] }
 0x667   : > { %v3671_v6 = vsel %vm1681_vm3, %v3639_v56, %v9158_v37  ;;  %v3640_v56 = vsel %vm225_vm0, %v2328_v59, %v9159_v36 }
 0x668   : > { %3431 = vrot.lane.b32.xlu2 %v2559_v33, %s4577_s30  ;;  %v3320_v23 = vpop.permute.xlu1 %3319  ;;  %v7708_v42 = vpop.permute.xlu0 %3451  ;;  %v3703_v38 = vsel %vm1714_vm4, %v3671_v6, %v7218_v13  ;;  %v2578_v33 = vld [vmem:[#allocation2 + $0x171] sm:$0xff] }
 0x669   : > { %v3815_v12 = vsel %vm1813_vm7, %v3783_v8, %v3320_v23  ;;  %v3735_v8 = vsel %vm1747_vm6, %v3703_v38, %v7305_v9 }
 0x66a   : > { %v3546_v32 = vpop.permute.xlu2 %3545  ;;  %v3847_v30 = vsel %vm1846_vm9, %v3815_v12, %v3448_v21  ;;  %v2576_v21 = vld [vmem:[#allocation2 + $0x159] sm:$0xff] }
 0x66b   : > { %v3879_v60 = vsel %vm1879_vm8, %v3847_v30, %v3576_v34  ;;  %v3767_v34 = vsel %vm1780_vm5, %v3735_v8, %v7440_v49  ;;  %v9160_v49 = vld [vmem:[#allocation110_spill] sm:$0xff]  ;;  %v2547_v8 = vld [vmem:[#allocation2 + $0x180] sm:$0xff] }
 0x66c   : > { %4453 = vmatmul.msk.f32.vlgmr.msra.gmra.mxu3 %vm1925_vm10, %v3879_v60  ;;  %v3799_v23 = vsel %vm1813_vm7, %v3767_v34, %v7618_v4  ;;  %v3656_v60 = vsel %vm225_vm0, %v9116_v16, %v9160_v49  ;;  %v9161_v4 = vld [vmem:[#allocation165_spill] sm:$0xff] }
 0x66d   : > { %v3672_v37 = vsel %vm1681_vm3, %v3640_v56, %v9161_v4  ;;  %v3688_v38 = vsel %vm1681_vm3, %v3656_v60, %v7160_v48 }
 0x66e   : > { %3559 = vrot.lane.b32.xlu1 %v2591_v2, %s4578_s6  ;;  %3469 = vrot.lane.b32.xlu0 %v2578_v33, %s4577_s30  ;;  %v3704_v2 = vsel %vm1714_vm4, %v3672_v37, %v7186_v28  ;;  %v2560_v33 = vld [vmem:[#allocation2 + $0x99] sm:$0xff]  ;;  %v2546_v37 = vld [vmem:[#allocation2 + $0x170] sm:$0xff] }
 0x66f   : > { %v3736_v34 = vsel %vm1747_vm6, %v3704_v2, %v7351_v20  ;;  %v2593_v2 = vld [vmem:[#allocation2 + $0xaa] sm:$0xff] }
 0x670   : > { %3465 = vrot.lane.b32.xlu2 %v2576_v21, %s4577_s30  ;;  %v3416_v13 = vpop.permute.xlu1 %3415  ;;  %v7729_v6 = vpop.permute.xlu0 %3325  ;;  %v3768_v48 = vsel %vm1780_vm5, %v3736_v34, %v7438_v5  ;;  %v2545_v21 = vld [vmem:[#allocation2 + $0x168] sm:$0xff] }
 0x671   : > { %v3831_v12 = vsel %vm1846_vm9, %v3799_v23, %v3416_v13 }
 0x672   : > { %v7732_v9 = vpop.permute.xlu2 %3419  ;;  %v3863_v30 = vsel %vm1879_vm8, %v3831_v12, %v3544_v26  ;;  %v3720_v26 = vsel %vm1714_vm4, %v3688_v38, %v7244_v35  ;;  %v3800_v35 = vsel %vm1813_vm7, %v3768_v48, %v7586_v10  ;;  %v2577_v10 = vld [vmem:[#allocation2 + $0x169] sm:$0xff] }
 0x673   : > { %4437 = vmatmul.msk.f32.vlgmr.msra.gmra.mxu1 %vm1925_vm10, %v3863_v30  ;;  %v3752_v16 = vsel %vm1747_vm6, %v3720_v26, %v7379_v63  ;;  %v3832_v23 = vsel %vm1846_vm9, %v3800_v35, %v3418_v11  ;;  %v9162_v11 = vld [vmem:[#allocation44_spill] sm:$0xff]  ;;  %v2595_v38 = vld [vmem:[#allocation2 + $0xc2] sm:$0xff]  ;;  %v9165_v48 = vld [vmem:[#allocation99_spill] sm:$0xff] }
 0x674   : > { %v3784_v28 = vsel %vm1780_vm5, %v3752_v16, %v7553_v22  ;;  %v3864_v5 = vsel %vm1879_vm8, %v3832_v23, %v3546_v32  ;;  %v3657_v30 = vsel %vm225_vm0, %v7108_v57, %v9162_v11  ;;  %v2581_v11 = vld [vmem:[#allocation2 + $0x199] sm:$0xff] }
 0x675   : > { %v3816_v20 = vsel %vm1813_vm7, %v3784_v28, %v7685_v15  ;;  %v2609_v15 = vld [vmem:[#allocation2 + $0x16a] sm:$0xff] }
 0x676   : > { %3433 = vrot.lane.b32.xlu1 %v2560_v33, %s4577_s30  ;;  %3343 = vrot.lane.b32.xlu0 %v2547_v8, %s4576_s29  ;;  %v9164_v8 = vld [vmem:[#allocation79_spill] sm:$0xff] }
 0x678   : > { %3339 = vrot.lane.b32.xlu2 %v2545_v21, %s4576_s29  ;;  %v3450_v63 = vpop.permute.xlu1 %3449  ;;  %v3582_v59 = vpop.permute.xlu0 %3581 }
 0x679   : > { %v3848_v13 = vsel %vm1846_vm9, %v3816_v20, %v3450_v63  ;;  %v2610_v20 = vld [vmem:[#allocation2 + $0x172] sm:$0xff]  ;;  %v2564_v63 = vld [vmem:[#allocation2 + $0xc9] sm:$0xff] }
 0x67a   : > { %v3454_v12 = vpop.permute.xlu2 %3453  ;;  %v3880_v22 = vsel %vm1879_vm8, %v3848_v13, %v7692_v62  ;;  %v9163_v62 = vld [vmem:[#allocation64_spill] sm:$0xff] }
 0x67b   : > { %4438 = vmatmul.msk.f32.gmra.mxu1 %vm1925_vm10, %v3864_v5  ;;  %4454 = vmatmul.msk.f32.gmra.mxu3 %vm1925_vm10, %v3880_v22  ;;  %v3689_v56 = vsel %vm1681_vm3, %v3657_v30, %v9163_v62  ;;  %v2562_v5 = vld [vmem:[#allocation2 + $0xb1] sm:$0xff] }
 0x67c   : > { %v3721_v49 = vsel %vm1714_vm4, %v3689_v56, %v7289_v18  ;;  %v2594_v62 = vld [vmem:[#allocation2 + $0xb2] sm:$0xff] }
 0x67e   : > { %3467 = vrot.lane.b32.xlu1 %v2577_v10, %s4577_s30  ;;  %3599 = vrot.lane.b32.xlu0 %v7423_v41, %s4578_s6  ;;  %v3753_v41 = vsel %vm1747_vm6, %v3721_v49, %v7377_v1  ;;  %v4542_v10 = vld [vmem:[#allocation2 + $0x20] sm:$0xff] }
 0x67f   : > { %v3785_v4 = vsel %vm1780_vm5, %v3753_v41, %v7510_v47  ;;  %v4541_v47 = vld [vmem:[#allocation2 + $0x18] sm:$0xff]  ;;  %v2579_v49 = vld [vmem:[#allocation2 + $0x181] sm:$0xff] }
 0x680   : > { %3595 = vrot.lane.b32.xlu2 %v2609_v15, %s4578_s6  ;;  %v3324_v32 = vpop.permute.xlu1 %3323  ;;  %v3550_v36 = vpop.permute.xlu0 %3549  ;;  %v3641_v34 = vsel %vm225_vm0, %v4541_v47, %v9164_v8  ;;  %v9170_v47 = vld [vmem:[#allocation47_spill] sm:$0xff] }
 0x681   : > { %v3817_v57 = vsel %vm1813_vm7, %v3785_v4, %v3324_v32  ;;  %v3673_v28 = vsel %vm1681_vm3, %v3641_v34, %v9165_v48 }
 0x682   : > { %v7782_v60 = vpop.permute.xlu2 %3327  ;;  %v3849_v1 = vsel %vm1846_vm9, %v3817_v57, %v7708_v42  ;;  %v3705_v21 = vsel %vm1714_vm4, %v3673_v28, %v7184_v46  ;;  %v3818_v42 = vsel %vm1813_vm7, %v7508_v7, %v7729_v6  ;;  %v2563_v28 = vld [vmem:[#allocation2 + $0xc1] sm:$0xff] }
 0x683   : > { %v3737_v35 = vsel %vm1747_vm6, %v3705_v21, %v7319_v19  ;;  %v3850_v13 = vsel %vm1846_vm9, %v3818_v42, %v3454_v12  ;;  %v2548_v42 = vld [vmem:[#allocation2 + $0x188] sm:$0xff] }
 0x684   : > { %v3769_v23 = vsel %vm1780_vm5, %v3737_v35, %v7477_v39  ;;  %v3882_v12 = vsel %vm1879_vm8, %v3850_v13, %v3582_v59 }
 0x685   : > { %v3801_v46 = vsel %vm1813_vm7, %v3769_v23, %v7584_v52  ;;  %v9166_v52 = vld [vmem:[#allocation38_spill] sm:$0xff] }
 0x686   : > { %3341 = vrot.lane.b32.xlu1 %v2546_v37, %s4576_s29  ;;  %3567 = vrot.lane.b32.xlu0 %v2595_v38, %s4578_s6  ;;  %v3833_v19 = vsel %vm1846_vm9, %v3801_v46, %v7732_v9  ;;  %v3642_v15 = vsel %vm225_vm0, %v4542_v10, %v9166_v52  ;;  %v9167_v9 = vld [vmem:[#allocation96_spill] sm:$0xff]  ;;  %v4543_v38 = vld [vmem:[#allocation2 + $0x30] sm:$0xff]  ;;  %v9173_v10 = vld [vmem:[#allocation54_spill] sm:$0xff] }
 0x687   : > { %v3674_v30 = vsel %vm1681_vm3, %v3642_v15, %v9167_v9  ;;  %v4546_v9 = vld [vmem:[#allocation2 + $0x108] sm:$0xff] }
 0x688   : > { %3563 = vrot.lane.b32.xlu2 %v2593_v2, %s4578_s6  ;;  %v3580_v18 = vpop.permute.xlu1 %3579  ;;  %v7792_v26 = vpop.permute.xlu0 %3423  ;;  %v3706_v32 = vsel %vm1714_vm4, %v3674_v30, %v7230_v3  ;;  %v9168_v2 = vld [vmem:[#allocation90_spill] sm:$0xff]  ;;  %v9174_v30 = vld [vmem:[#allocation76_spill] sm:$0xff] }
 0x689   : > { %v3881_v33 = vsel %vm1879_vm8, %v3849_v1, %v3580_v18  ;;  %v3738_v59 = vsel %vm1747_vm6, %v3706_v32, %v7317_v31  ;;  %v3643_v18 = vsel %vm225_vm0, %v4543_v38, %v9168_v2  ;;  %v9169_v1 = vld [vmem:[#allocation95_spill] sm:$0xff] }
 0x68a   : > { %v7799_v16 = vpop.permute.xlu2 %3583  ;;  %4455 = vmatmul.msk.f32.gmra.mxu3 %vm1925_vm10, %v3881_v33  ;;  %v3770_v56 = vsel %vm1780_vm5, %v3738_v59, %v7449_v45  ;;  %v4544_v45 = vld [vmem:[#allocation2 + $0xf0] sm:$0xff]  ;;  %v3675_v8 = vsel %vm1681_vm3, %v3643_v18, %v9170_v47  ;;  %v9178_v18 = vld [vmem:[#allocation150_spill] sm:$0xff] }
 0x68b   : > { %v3802_v41 = vsel %vm1813_vm7, %v3770_v56, %v7657_v43  ;;  %v3659_v33 = vsel %vm225_vm0, %v4544_v45, %v9169_v1  ;;  %v2550_v43 = vld [vmem:[#allocation2 + $0x1a0] sm:$0xff]  ;;  %v9175_v59 = vld [vmem:[#allocation127_spill] sm:$0xff] }
 0x68c   : > { %v3691_v34 = vsel %vm1681_vm3, %v3659_v33, %v7170_v44  ;;  %v2613_v33 = vld [vmem:[#allocation2 + $0x19a] sm:$0xff] }
 0x68d   : > { %v3723_v48 = vsel %vm1714_vm4, %v3691_v34, %v7255_v50 }
 0x68e   : > { %3597 = vrot.lane.b32.xlu1 %v2610_v20, %s4578_s6  ;;  %3441 = vrot.lane.b32.xlu0 %v2564_v63, %s4577_s30  ;;  %v3755_v35 = vsel %vm1747_vm6, %v3723_v48, %v7393_v54 }
 0x690   : > { %3437 = vrot.lane.b32.xlu2 %v2562_v5, %s4577_s30  ;;  %v3548_v7 = vpop.permute.xlu1 %3547  ;;  %v7821_v6 = vpop.permute.xlu0 %3457 }
 0x691   : > { %v3865_v39 = vsel %vm1879_vm8, %v3833_v19, %v3548_v7 }
 0x692   : > { %v3552_v22 = vpop.permute.xlu2 %3551  ;;  %4439 = vmatmul.msk.f32.gmra.mxu1 %vm1925_vm10, %v3865_v39  ;;  %4456 = vmatmul.msk.f32.gmra.mxu3 %vm1925_vm10, %v3882_v12 }
 0x696   : > { %3565 = vrot.lane.b32.xlu1 %v2594_v62, %s4578_s6  ;;  %3475 = vrot.lane.b32.xlu0 %v2581_v11, %s4577_s30  ;;  %v2596_v11 = vld [vmem:[#allocation2 + $0xca] sm:$0xff] }
 0x698   : > { %3471 = vrot.lane.b32.xlu2 %v2579_v49, %s4577_s30  ;;  %v3422_v4 = vpop.permute.xlu1 %3421  ;;  %v7842_v57 = vpop.permute.xlu0 %3331 }
 0x699   : > { %v3834_v3 = vsel %vm1846_vm9, %v3802_v41, %v3422_v4  ;;  %v4547_v41 = vld [vmem:[#allocation2 + $0x38] sm:$0xff]  ;;  %v9176_v4 = vld [vmem:[#allocation41_spill] sm:$0xff] }
 0x69a   : > { %v7845_v37 = vpop.permute.xlu2 %3425  ;;  %v3866_v31 = vsel %vm1879_vm8, %v3834_v3, %v3550_v36  ;;  %v3707_v36 = vsel %vm1714_vm4, %v3675_v8, %v7198_v58  ;;  %v3787_v58 = vsel %vm1780_vm5, %v3755_v35, %v7572_v17  ;;  %v3644_v3 = vsel %vm225_vm0, %v4547_v41, %v9176_v4  ;;  %v9181_v8 = vld [vmem:[#allocation193_spill] sm:$0xff] }
 0x69b   : > { %4440 = vmatmul.msk.f32.gmra.mxu1 %vm1925_vm10, %v3866_v31  ;;  %v3739_v21 = vsel %vm1747_vm6, %v3707_v36, %v7363_v25  ;;  %v3819_v25 = vsel %vm1813_vm7, %v3787_v58, %v7782_v60  ;;  %v4545_v60 = vld [vmem:[#allocation2 + $0xf8] sm:$0xff]  ;;  %v3676_v45 = vsel %vm1681_vm3, %v3644_v3, %v9178_v18  ;;  %v2534_v3 = vld [vmem:[#allocation2 + $0xe0] sm:$0xff]  ;;  %v9196_v18 = vld [vmem:[#allocation170_spill] sm:$0xff] }
 0x69c   : > { %v3771_v44 = vsel %vm1780_vm5, %v3739_v21, %v7447_v55  ;;  %v9177_v31 = vld [vmem:[#allocation52_spill] sm:$0xff]  ;;  %v9183_v21 = vld [vmem:[#allocation85_spill] sm:$0xff] }
 0x69d   : > { %v3803_v50 = vsel %vm1813_vm7, %v3771_v44, %v7595_v27  ;;  %v2614_v27 = vld [vmem:[#allocation2 + $0x1a2] sm:$0xff]  ;;  %v9182_v36 = vld [vmem:[#allocation40_spill] sm:$0xff] }
 0x69e   : > { %3439 = vrot.lane.b32.xlu1 %v2563_v28, %s4577_s30  ;;  %3349 = vrot.lane.b32.xlu0 %v2550_v43, %s4576_s29  ;;  %v3835_v63 = vsel %vm1846_vm9, %v3803_v50, %v7792_v26  ;;  %v9171_v26 = vld [vmem:[#allocation56_spill] sm:$0xff]  ;;  %v9180_v43 = vld [vmem:[#allocation169_spill] sm:$0xff] }
 0x69f   : > { %v3867_v13 = vsel %vm1879_vm8, %v3835_v63, %v3552_v22  ;;  %v3660_v46 = vsel %vm225_vm0, %v4545_v60, %v9171_v26  ;;  %v2549_v22 = vld [vmem:[#allocation2 + $0x198] sm:$0xff]  ;;  %v3708_v47 = vsel %vm1714_vm4, %v3676_v45, %v9180_v43  ;;  %v2566_v43 = vld [vmem:[#allocation2 + $0xe1] sm:$0xff] }
 0x6a0   : > { %3345 = vrot.lane.b32.xlu2 %v2548_v42, %s4576_s29  ;;  %v3456_v54 = vpop.permute.xlu1 %3455  ;;  %v3588_v20 = vpop.permute.xlu0 %3587  ;;  %v3740_v48 = vsel %vm1747_vm6, %v3708_v47, %v9182_v36  ;;  %v2565_v42 = vld [vmem:[#allocation2 + $0xd9] sm:$0xff] }
 0x6a1   : > { %v3851_v23 = vsel %vm1846_vm9, %v3819_v25, %v3456_v54  ;;  %v3772_v35 = vsel %vm1780_vm5, %v3740_v48, %v9183_v21  ;;  %v2597_v26 = vld [vmem:[#allocation2 + $0xda] sm:$0xff] }
 0x6a2   : > { %v3460_v55 = vpop.permute.xlu2 %3459  ;;  %v3883_v17 = vsel %vm1879_vm8, %v3851_v23, %v7799_v16  ;;  %v9172_v16 = vld [vmem:[#allocation128_spill] sm:$0xff]  ;;  %v3804_v58 = vsel %vm1813_vm7, %v3772_v35, %v7593_v0 }
 0x6a3   : > { %4441 = vmatmul.msk.f32.gmra.mxu1 %vm1925_vm10, %v3867_v13  ;;  %4457 = vmatmul.msk.f32.gmra.mxu3 %vm1925_vm10, %v3883_v17  ;;  %v3692_v7 = vsel %vm1681_vm3, %v3660_v46, %v9172_v16  ;;  %v3836_v50 = vsel %vm1846_vm9, %v3804_v58, %v7845_v37  ;;  %v9184_v13 = vld [vmem:[#allocation83_spill] sm:$0xff]  ;;  %v9185_v17 = vld [vmem:[#allocation146_spill] sm:$0xff]  ;;  %v9198_v35 = vld [vmem:[#allocation92_spill] sm:$0xff] }
 0x6a4   : > { %v3724_v39 = vsel %vm1714_vm4, %v3692_v7, %v7303_v24  ;;  %v3661_v24 = vsel %vm225_vm0, %v4546_v9, %v9174_v30  ;;  %v2582_v46 = vld [vmem:[#allocation2 + $0x1a1] sm:$0xff]  ;;  %v4550_v30 = vld [vmem:[#allocation2 + $0x110] sm:$0xff] }
 0x6a5   : > { %v3693_v56 = vsel %vm1681_vm3, %v3661_v24, %v9175_v59  ;;  %v9188_v16 = vld [vmem:[#allocation130_spill] sm:$0xff]  ;;  %v9190_v24 = vld [vmem:[#allocation164_spill] sm:$0xff]  ;;  %v9192_v59 = vld [vmem:[#allocation155_spill] sm:$0xff] }
 0x6a6   : > { %3473 = vrot.lane.b32.xlu1 %v7295_v40, %s4577_s30  ;;  %3605 = vrot.lane.b32.xlu0 %v2614_v27, %s4578_s6  ;;  %v3756_v40 = vsel %vm1747_vm6, %v3724_v39, %v7391_v51  ;;  %v3725_v38 = vsel %vm1714_vm4, %v3693_v56, %v9177_v31  ;;  %v9186_v27 = vld [vmem:[#allocation116_spill] sm:$0xff] }
 0x6a7   : > { %v3788_v52 = vsel %vm1780_vm5, %v3756_v40, %v9173_v10  ;;  %v9195_v31 = vld [vmem:[#allocation152_spill] sm:$0xff] }
 0x6a8   : > { %3601 = vrot.lane.b32.xlu2 %v7381_v53, %s4578_s6  ;;  %v3330_v5 = vpop.permute.xlu1 %3329  ;;  %v3556_v19 = vpop.permute.xlu0 %3555  ;;  %v2598_v53 = vld [vmem:[#allocation2 + $0xe2] sm:$0xff] }
 0x6a9   : > { %v3820_v15 = vsel %vm1813_vm7, %v3788_v52, %v3330_v5  ;;  %v9187_v5 = vld [vmem:[#allocation192_spill] sm:$0xff] }
 0x6aa   : > { %v7895_v12 = vpop.permute.xlu2 %3333  ;;  %v3852_v62 = vsel %vm1846_vm9, %v3820_v15, %v7821_v6  ;;  %v9179_v6 = vld [vmem:[#allocation89_spill] sm:$0xff] }
 0x6ab   : > { %v3757_v1 = vsel %vm1747_vm6, %v3725_v38, %v9179_v6  ;;  %v9197_v6 = vld [vmem:[#allocation117_spill] sm:$0xff] }
 0x6ac   : > { %v3789_v34 = vsel %vm1780_vm5, %v3757_v1, %v9181_v8 }
 0x6ad   : > { %v3821_v28 = vsel %vm1813_vm7, %v3789_v34, %v7842_v57 }
 0x6ae   : > { %3347 = vrot.lane.b32.xlu1 %v2549_v22, %s4576_s29  ;;  %3573 = vrot.lane.b32.xlu0 %v2598_v53, %s4578_s6  ;;  %v3853_v44 = vsel %vm1846_vm9, %v3821_v28, %v3460_v55  ;;  %v4548_v55 = vld [vmem:[#allocation2 + $0x48] sm:$0xff]  ;;  %v4549_v53 = vld [vmem:[#allocation2 + $0x50] sm:$0xff] }
 0x6af   : > { %v3885_v63 = vsel %vm1879_vm8, %v3853_v44, %v3588_v20  ;;  %v3645_v0 = vsel %vm225_vm0, %v4548_v55, %v9184_v13 }
 0x6b0   : > { %3569 = vrot.lane.b32.xlu2 %v2596_v11, %s4578_s6  ;;  %v3586_v32 = vpop.permute.xlu1 %3585  ;;  %v7907_v51 = vpop.permute.xlu0 %3429  ;;  %v3677_v37 = vsel %vm1681_vm3, %v3645_v0, %v9185_v17  ;;  %v9189_v11 = vld [vmem:[#allocation107_spill] sm:$0xff] }
 0x6b1   : > { %v3884_v49 = vsel %vm1879_vm8, %v3852_v62, %v3586_v32  ;;  %v3709_v60 = vsel %vm1714_vm4, %v3677_v37, %v9186_v27  ;;  %v3646_v9 = vsel %vm225_vm0, %v4549_v53, %v9189_v11  ;;  %v3662_v32 = vsel %vm225_vm0, %v4550_v30, %v9190_v24  ;;  %v9208_v53 = vld [vmem:[#allocation171_spill] sm:$0xff] }
 0x6b2   : > { %v7918_v2 = vpop.permute.xlu2 %3589  ;;  %4458 = vmatmul.msk.f32.gmra.mxu3 %vm1925_vm10, %v3884_v49  ;;  %v3741_v20 = vsel %vm1747_vm6, %v3709_v60, %v9187_v5  ;;  %v3694_v56 = vsel %vm1681_vm3, %v3662_v32, %v9192_v59  ;;  %v9193_v49 = vld [vmem:[#allocation49_spill] sm:$0xff]  ;;  %v9209_v30 = vld [vmem:[#allocation139_spill] sm:$0xff] }
 0x6b3   : > { %v3773_v7 = vsel %vm1780_vm5, %v3741_v20, %v9188_v16  ;;  %v4552_v60 = vld [vmem:[#allocation2 + $0x60] sm:$0xff] }
 0x6b4   : > { %v3805_v39 = vsel %vm1813_vm7, %v3773_v7, %v7678_v61  ;;  %v9191_v61 = vld [vmem:[#allocation145_spill] sm:$0xff]  ;;  %v9205_v7 = vld [vmem:[#allocation36_spill] sm:$0xff] }
 0x6b5   : > { %v3678_v62 = vsel %vm1681_vm3, %v3646_v9, %v9191_v61  ;;  %v9204_v5 = vld [vmem:[#allocation185_spill] sm:$0xff] }
 0x6b6   : > { %3603 = vrot.lane.b32.xlu1 %v2613_v33, %s4578_s6  ;;  %v3710_v41 = vsel %vm1714_vm4, %v3678_v62, %v9193_v49  ;;  %v9210_v49 = vld [vmem:[#allocation67_spill] sm:$0xff] }
 0x6b7   : > { %v3742_v38 = vsel %vm1747_vm6, %v3710_v41, %v9195_v31 }
 0x6b8   : > { %3443 = vrot.lane.b32.xlu2 %v2565_v42, %s4577_s30  ;;  %v3554_v25 = vpop.permute.xlu1 %3553  ;;  %v3464_v54 = vpop.permute.xlu0 %3463  ;;  %v3774_v1 = vsel %vm1780_vm5, %v3742_v38, %v9197_v6  ;;  %v9199_v42 = vld [vmem:[#allocation147_spill] sm:$0xff]  ;;  %v9213_v38 = vld [vmem:[#allocation105_spill] sm:$0xff] }
 0x6b9   : > { %v3868_v57 = vsel %vm1879_vm8, %v3836_v50, %v3554_v25  ;;  %v3806_v47 = vsel %vm1813_vm7, %v3774_v1, %v7604_v14  ;;  %v9200_v50 = vld [vmem:[#allocation178_spill] sm:$0xff]  ;;  %v9215_v1 = vld [vmem:[#allocation73_spill] sm:$0xff] }
 0x6ba   : > { %v3558_v23 = vpop.permute.xlu2 %3557  ;;  %4442 = vmatmul.msk.f32.gmra.mxu1 %vm1925_vm10, %v3868_v57  ;;  %4459 = vmatmul.msk.f32.gmra.mxu3 %vm1925_vm10, %v3885_v63  ;;  %v3838_v36 = vsel %vm1846_vm9, %v3806_v47, %v7907_v51  ;;  %v9201_v63 = vld [vmem:[#allocation104_spill] sm:$0xff] }
 0x6bb   : > { %v3870_v21 = vsel %vm1879_vm8, %v3838_v36, %v3558_v23  ;;  %v9202_v23 = vld [vmem:[#allocation138_spill] sm:$0xff]  ;;  %v4554_v36 = vld [vmem:[#allocation2 + $0x78] sm:$0xff] }
 0x6be   : > { %3571 = vrot.lane.b32.xlu1 %v2597_v26, %s4578_s6  ;;  %v9203_v26 = vld [vmem:[#allocation84_spill] sm:$0xff] }
 0x6c0   : > { %3477 = vrot.lane.b32.xlu2 %v2582_v46, %s4577_s30  ;;  %v3428_v40 = vpop.permute.xlu1 %3427  ;;  %v3338_v10 = vpop.permute.xlu0 %3337  ;;  %v3647_v46 = vsel %vm225_vm0, %v4552_v60, %v9203_v26  ;;  %v9226_v26 = vld [vmem:[#allocation108_spill] sm:$0xff] }
 0x6c1   : > { %v3837_v22 = vsel %vm1846_vm9, %v3805_v39, %v3428_v40  ;;  %v3679_v20 = vsel %vm1681_vm3, %v3647_v46, %v9204_v5  ;;  %v9206_v40 = vld [vmem:[#allocation106_spill] sm:$0xff] }
 0x6c2   : > { %v3432_v52 = vpop.permute.xlu2 %3431  ;;  %v3869_v15 = vsel %vm1879_vm8, %v3837_v22, %v3556_v19  ;;  %v9194_v19 = vld [vmem:[#allocation148_spill] sm:$0xff]  ;;  %v3711_v39 = vsel %vm1714_vm4, %v3679_v20, %v9205_v7 }
 0x6c3   : > { %4443 = vmatmul.msk.f32.gmra.mxu1 %vm1925_vm10, %v3869_v15  ;;  %v3726_v4 = vsel %vm1714_vm4, %v3694_v56, %v9194_v19  ;;  %v3743_v22 = vsel %vm1747_vm6, %v3711_v39, %v9206_v40  ;;  %v9207_v15 = vld [vmem:[#allocation118_spill] sm:$0xff]  ;;  %v9211_v19 = vld [vmem:[#allocation188_spill] sm:$0xff] }
 0x6c4   : > { %v3758_v45 = vsel %vm1747_vm6, %v3726_v4, %v9196_v18  ;;  %v3775_v11 = vsel %vm1780_vm5, %v3743_v22, %v9208_v53 }
 0x6c5   : > { %v3790_v33 = vsel %vm1780_vm5, %v3758_v45, %v7582_v29  ;;  %v3807_v24 = vsel %vm1813_vm7, %v3775_v11, %v9209_v30  ;;  %v9214_v45 = vld [vmem:[#allocation149_spill] sm:$0xff] }
 0x6c6   : > { %3317 = vrot.lane.b32.xlu1 %v2534_v3, %s4576_s29  ;;  %v3822_v8 = vsel %vm1813_vm7, %v3790_v33, %v7895_v12  ;;  %v4551_v12 = vld [vmem:[#allocation2 + $0x120] sm:$0xff]  ;;  %v3839_v32 = vsel %vm1846_vm9, %v3807_v24, %v3432_v52  ;;  %v9212_v3 = vld [vmem:[#allocation123_spill] sm:$0xff] }
 0x6c7   : > { %v3663_v44 = vsel %vm225_vm0, %v4551_v12, %v9198_v35  ;;  %v9218_v12 = vld [vmem:[#allocation175_spill] sm:$0xff]  ;;  %v9227_v11 = vld [vmem:[#allocation61_spill] sm:$0xff] }
 0x6c8   : > { %3445 = vrot.lane.b32.xlu2 %v2566_v43, %s4577_s30  ;;  %v3462_v34 = vpop.permute.xlu1 %3461  ;;  %v3594_v14 = vpop.permute.xlu0 %3593  ;;  %v3695_v51 = vsel %vm1681_vm3, %v3663_v44, %v9199_v42  ;;  %v9219_v44 = vld [vmem:[#allocation168_spill] sm:$0xff]  ;;  %v9220_v42 = vld [vmem:[#allocation101_spill] sm:$0xff] }
 0x6c9   : > { %v3854_v48 = vsel %vm1846_vm9, %v3822_v8, %v3462_v34  ;;  %v3727_v25 = vsel %vm1714_vm4, %v3695_v51, %v9200_v50  ;;  %v9221_v50 = vld [vmem:[#allocation156_spill] sm:$0xff] }
 0x6ca   : > { %v3466_v28 = vpop.permute.xlu2 %3465  ;;  %v3886_v29 = vsel %vm1879_vm8, %v3854_v48, %v7918_v2  ;;  %v3759_v2 = vsel %vm1747_vm6, %v3727_v25, %v9201_v63  ;;  %v9216_v48 = vld [vmem:[#allocation35_spill] sm:$0xff]  ;;  %v8061_v63 = vld [vmem:[%s8497_s4] ss:$0 sm:$0xff] }
 0x6cb   : > { %4444 = vmatmul.msk.f32.gmra.mxu1 %vm1925_vm10, %v3870_v21  ;;  %4460 = vmatmul.msk.f32.gmra.mxu3 %vm1925_vm10, %v3886_v29  ;;  %v3791_v55 = vsel %vm1780_vm5, %v3759_v2, %v9202_v23  ;;  %v4555_v21 = vld [vmem:[#allocation2 + $0x138] sm:$0xff]  ;;  %v9217_v29 = vld [vmem:[#allocation77_spill] sm:$0xff]  ;;  %v9222_v2 = vld [vmem:[#allocation102_spill] sm:$0xff] }
 0x6d0   : > { %v3336_v58 = vpop.permute.xlu1 %3335  ;;  %v3562_v0 = vpop.permute.xlu0 %3561 }
 0x6d1   : > { %v3823_v13 = vsel %vm1813_vm7, %v3791_v55, %v3336_v58  ;;  %v9223_v55 = vld [vmem:[#allocation186_spill] sm:$0xff] }
 0x6d2   : > { %v3340_v57 = vpop.permute.xlu2 %3339  ;;  %v3855_v37 = vsel %vm1846_vm9, %v3823_v13, %v3464_v54  ;;  %v3824_v54 = vsel %vm1813_vm7, %v9207_v15, %v3338_v10  ;;  %v4553_v10 = vld [vmem:[#allocation2 + $0x68] sm:$0xff] }
 0x6d3   : > { %v3856_v9 = vsel %vm1846_vm9, %v3824_v54, %v3466_v28  ;;  %v3648_v41 = vsel %vm225_vm0, %v4553_v10, %v9210_v49  ;;  %v3649_v28 = vsel %vm225_vm0, %v4554_v36, %v9216_v48  ;;  %v9230_v10 = vld [vmem:[#allocation179_spill] sm:$0xff]  ;;  %v9235_v36 = vld [vmem:[#allocation137_spill] sm:$0xff] }
 0x6d4   : > { %v3888_v56 = vsel %vm1879_vm8, %v3856_v9, %v3594_v14  ;;  %v3680_v4 = vsel %vm1681_vm3, %v3648_v41, %v9211_v19  ;;  %v3665_v14 = vsel %vm225_vm0, %v4555_v21, %v9217_v29  ;;  %v3681_v35 = vsel %vm1681_vm3, %v3649_v28, %v9218_v12  ;;  %v9231_v41 = vld [vmem:[#allocation158_spill] sm:$0xff]  ;;  %v9237_v21 = vld [vmem:[#allocation172_spill] sm:$0xff] }
 0x6d5   : > { %v3712_v52 = vsel %vm1714_vm4, %v3680_v4, %v9212_v3  ;;  %v3697_v58 = vsel %vm1681_vm3, %v3665_v14, %v9219_v44  ;;  %v3713_v51 = vsel %vm1714_vm4, %v3681_v35, %v9220_v42  ;;  %v9236_v28 = vld [vmem:[#allocation58_spill] sm:$0xff] }
 0x6d6   : > { %v3744_v18 = vsel %vm1747_vm6, %v3712_v52, %v9213_v38  ;;  %v3729_v25 = vsel %vm1714_vm4, %v3697_v58, %v9221_v50  ;;  %v3745_v23 = vsel %vm1747_vm6, %v3713_v51, %v9222_v2  ;;  %v9238_v12 = vld [vmem:[#allocation70_spill] sm:$0xff] }
 0x6d7   : > { %v3776_v6 = vsel %vm1780_vm5, %v3744_v18, %v9214_v45  ;;  %v3761_v13 = vsel %vm1747_vm6, %v3729_v25, %v9223_v55  ;;  %v4557_v18 = vld [vmem:[#allocation2 + $0x80] sm:$0xff]  ;;  %v9232_v45 = vld [vmem:[#allocation42_spill] sm:$0xff]  ;;  %v4558_v25 = vld [vmem:[#allocation2 + $0x90] sm:$0xff] }
 0x6d8   : > { %v3592_v17 = vpop.permute.xlu1 %3591  ;;  %v3436_v61 = vpop.permute.xlu0 %3435  ;;  %v3808_v33 = vsel %vm1813_vm7, %v3776_v6, %v9215_v1  ;;  %v3650_v6 = vsel %vm225_vm0, %v4557_v18, %v9232_v45  ;;  %v9233_v1 = vld [vmem:[#allocation115_spill] sm:$0xff]  ;;  %v9239_v2 = vld [vmem:[#allocation34_spill] sm:$0xff] }
 0x6d9   : > { %v3887_v27 = vsel %vm1879_vm8, %v3855_v37, %v3592_v17  ;;  %v9225_v37 = vld [vmem:[#allocation69_spill] sm:$0xff]  ;;  %v9240_v55 = vld [vmem:[#allocation126_spill] sm:$0xff] }
 0x6da   : > { %4461 = vmatmul.msk.f32.gmra.mxu3 %vm1925_vm10, %v3887_v27  ;;  %v3596_v16 = vpop.permute.xlu2 %3595  ;;  %v3793_v27 = vsel %vm1780_vm5, %v3761_v13, %v9225_v37 }
 0x6db   : > { %v3825_v5 = vsel %vm1813_vm7, %v3793_v27, %v3340_v57  ;;  %v4556_v57 = vld [vmem:[#allocation2 + $0x140] sm:$0xff] }
 0x6dc   : > { %v3666_v9 = vsel %vm225_vm0, %v4556_v57, %v9227_v11  ;;  %v9242_v27 = vld [vmem:[#allocation129_spill] sm:$0xff]  ;;  %v4559_v57 = vld [vmem:[#allocation2 + $0x158] sm:$0xff]  ;;  %v9245_v11 = vld [vmem:[#allocation59_spill] sm:$0xff] }
 0x6e0   : > { %v3560_v62 = vpop.permute.xlu1 %3559  ;;  %v3470_v8 = vpop.permute.xlu0 %3469 }
 0x6e1   : > { %v3871_v59 = vsel %vm1879_vm8, %v3839_v32, %v3560_v62  ;;  %v9228_v32 = vld [vmem:[#allocation151_spill] sm:$0xff] }
 0x6e2   : > { %4445 = vmatmul.msk.f32.gmra.mxu1 %vm1925_vm10, %v3871_v59  ;;  %4462 = vmatmul.msk.f32.gmra.mxu3 %vm1925_vm10, %v3888_v56  ;;  %v3564_v31 = vpop.permute.xlu2 %3563  ;;  %v9229_v59 = vld [vmem:[#allocation191_spill] sm:$0xff] }
 0x6e8   : > { %v3434_v43 = vpop.permute.xlu1 %3433  ;;  %v3344_v53 = vpop.permute.xlu0 %3343 }
 0x6e9   : > { %v3840_v47 = vsel %vm1846_vm9, %v3808_v33, %v3434_v43  ;;  %v3682_v33 = vsel %vm1681_vm3, %v3650_v6, %v9233_v1  ;;  %v4560_v1 = vld [vmem:[#allocation2 + $0x168] sm:$0xff] }
 0x6ea   : > { %v3872_v34 = vsel %vm1879_vm8, %v3840_v47, %v3562_v0  ;;  %v9224_v0 = vld [vmem:[#allocation131_spill] sm:$0xff]  ;;  %v3438_v60 = vpop.permute.xlu2 %3437  ;;  %v9234_v47 = vld [vmem:[#allocation50_spill] sm:$0xff] }
 0x6eb   : > { %4446 = vmatmul.msk.f32.gmra.mxu1 %vm1925_vm10, %v3872_v34  ;;  %v3777_v17 = vsel %vm1780_vm5, %v3745_v23, %v9224_v0  ;;  %v3714_v34 = vsel %vm1714_vm4, %v3682_v33, %v9234_v47  ;;  %v3651_v23 = vsel %vm225_vm0, %v4558_v25, %v9239_v2  ;;  %v9241_v0 = vld [vmem:[#allocation136_spill] sm:$0xff] }
 0x6ec   : > { %v3809_v46 = vsel %vm1813_vm7, %v3777_v17, %v9226_v26  ;;  %v3746_v48 = vsel %vm1747_vm6, %v3714_v34, %v9235_v36  ;;  %v3683_v13 = vsel %vm1681_vm3, %v3651_v23, %v9240_v55  ;;  %v9243_v26 = vld [vmem:[#allocation66_spill] sm:$0xff]  ;;  %v9251_v33 = vld [vmem:[#allocation144_spill] sm:$0xff]  ;;  %v9252_v36 = vld [vmem:[#allocation81_spill] sm:$0xff] }
 0x6ed   : > { %v3841_v39 = vsel %vm1846_vm9, %v3809_v46, %v3436_v61  ;;  %v3698_v61 = vsel %vm1681_vm3, %v3666_v9, %v9228_v32  ;;  %v3778_v29 = vsel %vm1780_vm5, %v3746_v48, %v9237_v21  ;;  %v3715_v17 = vsel %vm1714_vm4, %v3683_v13, %v9241_v0  ;;  %v9247_v32 = vld [vmem:[#allocation163_spill] sm:$0xff]  ;;  %v9253_v21 = vld [vmem:[#allocation65_spill] sm:$0xff]  ;;  %v9256_v23 = vld [vmem:[#allocation180_spill] sm:$0xff] }
 0x6ee   : > { %v3873_v15 = vsel %vm1879_vm8, %v3841_v39, %v3564_v31  ;;  %v3730_v56 = vsel %vm1714_vm4, %v3698_v61, %v9229_v59  ;;  %v3810_v35 = vsel %vm1813_vm7, %v3778_v29, %v9238_v12  ;;  %v3668_v9 = vsel %vm225_vm0, %v4559_v57, %v9245_v11  ;;  %v9257_v0 = vld [vmem:[#allocation181_spill] sm:$0xff] }
 0x6ef   : > { %v3762_v49 = vsel %vm1747_vm6, %v3730_v56, %v9230_v10  ;;  %v3842_v44 = vsel %vm1846_vm9, %v3810_v35, %v3438_v60  ;;  %v3747_v60 = vsel %vm1747_vm6, %v3715_v17, %v9242_v27  ;;  %v9249_v56 = vld [vmem:[#allocation109_spill] sm:$0xff]  ;;  %v9255_v35 = vld [vmem:[#allocation194_spill] sm:$0xff] }
 0x6f0   : > { %v3468_v20 = vpop.permute.xlu1 %3467  ;;  %v4021_v7 = vpop.f32.mrf.mxu1  ;;  %v3794_v19 = vsel %vm1780_vm5, %v3762_v49, %v9231_v41  ;;  %v3779_v46 = vsel %vm1780_vm5, %v3747_v60, %v9243_v26 }
 0x6f1   : > { %v3857_v40 = vsel %vm1846_vm9, %v3825_v5, %v3468_v20  ;;  %v8077_v22 = vadd.f32 %v8061_v63, %v4021_v7  ;;  %v3600_v3 = vpop.permute.xlu0 %3599  ;;  %v9244_v20 = vld [vmem:[#allocation119_spill] sm:$0xff] }
 0x6f2   : > { %v3889_v54 = vsel %vm1879_vm8, %v3857_v40, %v3596_v16  ;;  %v3472_v62 = vpop.permute.xlu2 %3471  ;;  %v3811_v7 = vsel %vm1813_vm7, %v3779_v46, %v9244_v20  ;;  %v4561_v46 = vld [vmem:[#allocation2 + $0xb0] sm:$0xff] }
 0x6f3   : > { %4149 = vrot.lane.b32.xlu1 %v8077_v22, %s4579_s13  ;;  %4447 = vmatmul.msk.f32.gmra.mxu1 %vm1925_vm10, %v3873_v15 }
 0x6f4   : > { %4463 = vmatmul.msk.f32.gmra.mxu3 %vm1925_vm10, %v3889_v54 }
 0x6f8   : > { %v3342_v30 = vpop.permute.xlu1 %3341  ;;  %v4024_v24 = vpop.f32.mrf.mxu1 }
 0x6f9   : > { %v8090_v16 = vadd.f32 %v8061_v63, %v4024_v24  ;;  %v3826_v4 = vsel %vm1813_vm7, %v3794_v19, %v3342_v30  ;;  %v3568_v58 = vpop.permute.xlu0 %3567  ;;  %v9246_v30 = vld [vmem:[#allocation190_spill] sm:$0xff] }
 0x6fa   : > { %v3858_v31 = vsel %vm1846_vm9, %v3826_v4, %v3470_v8  ;;  %v3346_v43 = vpop.permute.xlu2 %3345  ;;  %v3827_v8 = vsel %vm1813_vm7, %v9236_v28, %v3344_v53  ;;  %v3700_v24 = vsel %vm1681_vm3, %v3668_v9, %v9246_v30  ;;  %v9262_v9 = vld [vmem:[#allocation157_spill] sm:$0xff] }
 0x6fb   : > { %4151 = vrot.lane.b32.xlu2 %v8090_v16, %s4579_s13  ;;  %v3859_v14 = vsel %vm1846_vm9, %v3827_v8, %v3472_v62  ;;  %v3732_v61 = vsel %vm1714_vm4, %v3700_v24, %v9247_v32  ;;  %v9248_v62 = vld [vmem:[#allocation68_spill] sm:$0xff] }
 0x6fc   : > { %v3891_v50 = vsel %vm1879_vm8, %v3859_v14, %v3600_v3  ;;  %v3764_v59 = vsel %vm1747_vm6, %v3732_v61, %v9248_v62  ;;  %v9250_v3 = vld [vmem:[#allocation63_spill] sm:$0xff] }
 0x6fd   : > { %v3796_v10 = vsel %vm1780_vm5, %v3764_v59, %v9249_v56  ;;  %v9254_v14 = vld [vmem:[#allocation51_spill] sm:$0xff] }
 0x6fe   : > { %v3828_v41 = vsel %vm1813_vm7, %v3796_v10, %v3346_v43  ;;  %v3669_v43 = vsel %vm225_vm0, %v4560_v1, %v9251_v33 }
 0x6ff   : > { %v3701_v48 = vsel %vm1681_vm3, %v3669_v43, %v9252_v36 }
 0x700   : > { %v3598_v52 = vpop.permute.xlu1 %3597  ;;  %v3733_v29 = vsel %vm1714_vm4, %v3701_v48, %v9253_v21  ;;  %v9264_v48 = vld [vmem:[#allocation4_spill] sm:$0xff] }
 0x701   : > { %v3890_v38 = vsel %vm1879_vm8, %v3858_v31, %v3598_v52  ;;  %v3442_v54 = vpop.permute.xlu0 %3441  ;;  %v3765_v12 = vsel %vm1747_vm6, %v3733_v29, %v9254_v14 }
 0x702   : > { %4464 = vmatmul.msk.f32.gmra.mxu3 %vm1925_vm10, %v3890_v38  ;;  %v3602_v37 = vpop.permute.xlu2 %3601  ;;  %v3844_v52 = vsel %vm1846_vm9, %v9250_v3, %v3442_v54 }
 0x708   : > { %v3566_v42 = vpop.permute.xlu1 %3565 }
 0x709   : > { %v3874_v51 = vsel %vm1879_vm8, %v3842_v44, %v3566_v42  ;;  %v3476_v6 = vpop.permute.xlu0 %3475  ;;  %v3797_v44 = vsel %vm1780_vm5, %v3765_v12, %v9255_v35 }
 0x70a   : > { %4448 = vmatmul.msk.f32.gmra.mxu1 %vm1925_vm10, %v3874_v51  ;;  %4465 = vmatmul.msk.f32.gmra.mxu3 %vm1925_vm10, %v3891_v50  ;;  %v3570_v49 = vpop.permute.xlu2 %3569 }
 0x70b   : > { %v3876_v18 = vsel %vm1879_vm8, %v3844_v52, %v3570_v49 }
 0x70f   : > { %v4027_v5 = vpop.f32.mrf.mxu1 }
 0x710   : > { %v8137_v39 = vadd.f32 %v8061_v63, %v4027_v5  ;;  %v3440_v40 = vpop.permute.xlu1 %3439  ;;  %v9258_v5 = vld [vmem:[#allocation55_spill] sm:$0xff] }
 0x711   : > { %v3843_v15 = vsel %vm1846_vm9, %v3811_v7, %v3440_v40  ;;  %v3350_v42 = vpop.permute.xlu0 %3349  ;;  %v3654_v20 = vsel %vm225_vm0, %v4561_v46, %v9258_v5  ;;  %v9259_v7 = vld [vmem:[#allocation103_spill] sm:$0xff] }
 0x712   : > { %4153 = vrot.lane.b32.xlu0 %v8137_v39, %s4579_s13  ;;  %v3875_v53 = vsel %vm1879_vm8, %v3843_v15, %v3568_v58  ;;  %v3444_v28 = vpop.permute.xlu2 %3443  ;;  %v3830_v55 = vsel %vm1813_vm7, %v9256_v23, %v3350_v42  ;;  %v3686_v40 = vsel %vm1681_vm3, %v3654_v20, %v9259_v7  ;;  %v9260_v15 = vld [vmem:[#allocation98_spill] sm:$0xff]  ;;  %v9266_v23 = vld [vmem:[#allocation3_spill] sm:$0xff] }
 0x713   : > { %4449 = vmatmul.msk.f32.gmra.mxu1 %vm1925_vm10, %v3875_v53  ;;  %v3845_v17 = vsel %vm1846_vm9, %v9257_v0, %v3444_v28  ;;  %v3718_v54 = vsel %vm1714_vm4, %v3686_v40, %v9260_v15  ;;  %v9261_v53 = vld [vmem:[#allocation143_spill] sm:$0xff] }
 0x714   : > { %v3750_v57 = vsel %vm1747_vm6, %v3718_v54, %v9261_v53  ;;  %v9268_v53 = vld [vmem:[#allocation10_spill] sm:$0xff] }
 0x715   : > { %v3782_v30 = vsel %vm1780_vm5, %v3750_v57, %v9262_v9 }
 0x718   : > { %v3474_v19 = vpop.permute.xlu1 %3473  ;;  %v4030_v4 = vpop.f32.mrf.mxu1 }
 0x719   : > { %v3860_v31 = vsel %vm1846_vm9, %v3828_v41, %v3474_v19  ;;  %v8159_v38 = vadd.f32 %v8061_v63, %v4030_v4  ;;  %v4069_v19 = vpop.f32.mrf.mxu3 }
 0x71a   : > { %v3892_v45 = vsel %vm1879_vm8, %v3860_v31, %v3602_v37  ;;  %v3478_v2 = vpop.permute.xlu2 %3477  ;;  %v3606_v37 = vpop.permute.xlu0 %3605 }
 0x71b   : > { %4155 = vrot.lane.b32.xlu1 %v8159_v38, %s4579_s13  ;;  %4450 = vmatmul.msk.f32.gmra.mxu1 %vm1925_vm10, %v3876_v18  ;;  %v3862_v13 = vsel %vm1846_vm9, %v3830_v55, %v3478_v2 }
 0x71c   : > { %4466 = vmatmul.msk.f32.gmra.mxu3 %vm1925_vm10, %v3892_v45  ;;  %v3894_v26 = vsel %vm1879_vm8, %v3862_v13, %v3606_v37 }
 0x720   : > { %v3348_v47 = vpop.permute.xlu1 %3347  ;;  %v4033_v34 = vpop.f32.mrf.mxu1 }
 0x721   : > { %v8172_v8 = vadd.f32 %v8061_v63, %v4033_v34  ;;  %v3829_v58 = vsel %vm1813_vm7, %v3797_v44, %v3348_v47  ;;  %v8221_v52 = vpop.f32.mrf.mxu3 }
 0x722   : > { %v3861_v50 = vsel %vm1846_vm9, %v3829_v58, %v3476_v6  ;;  %v3446_v61 = vpop.permute.xlu2 %3445  ;;  %v3574_v59 = vpop.permute.xlu0 %3573  ;;  %v9263_v6 = vld [vmem:[#allocation6_spill] sm:$0xff] }
 0x723   : > { %4157 = vrot.lane.b32.xlu2 %v8172_v8, %s4579_s13 }
 0x728   : > { %v3604_v51 = vpop.permute.xlu1 %3603 }
 0x729   : > { %v3893_v25 = vsel %vm1879_vm8, %v3861_v50, %v3604_v51  ;;  %v8223_v31 = vpop.f32.mrf.mxu3  ;;  %v9265_v51 = vld [vmem:[#allocation7_spill] sm:$0xff] }
 0x72a   : > { %4467 = vmatmul.msk.f32.gmra.mxu3 %vm1925_vm10, %v3893_v25 }
 0x730   : > { %v3572_v27 = vpop.permute.xlu1 %3571 }
 0x731   : > { %v3877_v60 = vsel %vm1879_vm8, %v3845_v17, %v3572_v27  ;;  %v4078_v33 = vpop.f32.mrf.mxu3  ;;  %v9267_v27 = vld [vmem:[#allocation5_spill] sm:$0xff] }
 0x732   : > { %4451 = vmatmul.msk.f32.gmra.mxu1 %vm1925_vm10, %v3877_v60  ;;  %4468 = vmatmul.msk.f32.gmra.mxu3 %vm1925_vm10, %v3894_v26 }
 0x737   : > { %v4036_v11 = vpop.f32.mrf.mxu1 }
 0x738   : > { %v8206_v24 = vadd.f32 %v8061_v63, %v4036_v11  ;;  %v3318_v32 = vpop.permute.xlu1 %3317  ;;  %v8295_v11 = vadd.f32 %v8061_v63, %v4078_v33 }
 0x739   : > { %v3814_v62 = vsel %vm1813_vm7, %v3782_v30, %v3318_v32  ;;  %v8241_v34 = vpop.f32.mrf.mxu3 }
 0x73a   : > { %4159 = vrot.lane.b32.xlu0 %v8206_v24, %s4579_s13  ;;  %v3846_v56 = vsel %vm1846_vm9, %v3814_v62, %v3446_v61  ;;  %v9269_v61 = vld [vmem:[#allocation9_spill] sm:$0xff] }
 0x73b   : > { %v3878_v10 = vsel %vm1879_vm8, %v3846_v56, %v3574_v59 }
 0x73c   : > { %4452 = vmatmul.msk.f32.gmra.mxu1 %vm1925_vm10, %v3878_v10 }
 0x740   : > { %v4039_v49 = vpop.f32.mrf.mxu1 }
 0x741   : > { %v8215_v41 = vadd.f32 %v8061_v63, %v4039_v49  ;;  %v8252_v14 = vpop.f32.mrf.mxu3 }
 0x743   : > { %4161 = vrot.lane.b32.xlu1 %v8215_v41, %s4579_s13 }
 0x748   : > { %v4042_v4 = vpop.f32.mrf.mxu1 }
 0x749   : > { %v4043_v3 = vadd.f32 %v8061_v63, %v4042_v4  ;;  %v8318_v4 = vadd.f32 %v8061_v63, %v8221_v52  ;;  %v8337_v52 = vadd.f32 %v8061_v63, %v8241_v34 }
 0x74b   : > { %4163 = vrot.lane.b32.xlu2 %v4043_v3, %s4579_s13 }
 0x755   : > { %v4152_v18 = vpop.permute.xlu2 %4151 }
 0x756   : > { %v4246_v45 = vmax.f32 %v8090_v16, %v4152_v18 }
 0x758   : > { %v4278_v1 = vadd.f32 %v4246_v45, %v9263_v6 }
 0x75a   : > { %4310 = vst.msk [vmem:[%s8231_s25 + $0x8] sm:$0xff] %vm225_vm0, %v4278_v1 }
 0x75f   : > { %v4045_v43 = vpop.f32.mrf.mxu1 }
 0x760   : > { %v8237_v47 = vadd.f32 %v8061_v63, %v4045_v43  ;;  %v8344_v43 = vadd.f32 %v8061_v63, %v8223_v31  ;;  %v8360_v31 = vadd.f32 %v8061_v63, %v8252_v14 }
 0x762   : > { %4165 = vrot.lane.b32.xlu0 %v8237_v47, %s4579_s13 }
 0x765   : > { %v4150_v16 = vpop.permute.xlu1 %4149 }
 0x766   : > { %v4245_v36 = vmax.f32 %v8077_v22, %v4150_v16  ;;  %v4087_v22 = vpop.f32.mrf.mxu3 }
 0x767   : > { %v8307_v10 = vadd.f32 %v8061_v63, %v4087_v22 }
 0x768   : > { %v4277_v28 = vadd.f32 %v4245_v36, %v9264_v48  ;;  %v4048_v21 = vpop.f32.mrf.mxu1 }
 0x769   : > { %v8246_v29 = vadd.f32 %v8061_v63, %v4048_v21 }
 0x76a   : > { %4309 = vst.msk [vmem:[%s8231_s25] sm:$0xff] %vm225_vm0, %v4277_v28 }
 0x76b   : > { %4167 = vrot.lane.b32.xlu1 %v8246_v29, %s4579_s13 }
 0x76e   : > { %v4090_v42 = vpop.f32.mrf.mxu3 }
 0x76f   : > { %v8353_v34 = vadd.f32 %v8061_v63, %v4090_v42 }
 0x770   : > { %v4051_v12 = vpop.f32.mrf.mxu1 }
 0x771   : > { %v8255_v35 = vadd.f32 %v8061_v63, %v4051_v12  ;;  %v9271_v12 = vld [vmem:[#allocation13_spill] sm:$0xff] }
 0x773   : > { %4169 = vrot.lane.b32.xlu2 %v8255_v35, %s4579_s13 }
 0x776   : > { %v8265_v0 = vpop.f32.mrf.mxu3 }
 0x777   : > { %v8375_v14 = vadd.f32 %v8061_v63, %v8265_v0 }
 0x77d   : > { %v4158_v44 = vpop.permute.xlu2 %4157 }
 0x77e   : > { %v4249_v58 = vmax.f32 %v8172_v8, %v4158_v44  ;;  %v4096_v46 = vpop.f32.mrf.mxu3 }
 0x77f   : > { %v8322_v45 = vadd.f32 %v8061_v63, %v4096_v46 }
 0x780   : > { %v4281_v50 = vadd.f32 %v4249_v58, %v9265_v51  ;;  %v9272_v58 = vld [vmem:[#allocation12_spill] sm:$0xff] }
 0x782   : > { %4313 = vst.msk [vmem:[%s8231_s25 + $0x20] sm:$0xff] %vm225_vm0, %v4281_v50 }
 0x784   : > { %v4154_v25 = vpop.permute.xlu0 %4153 }
 0x785   : > { %v4247_v2 = vmax.f32 %v8137_v39, %v4154_v25 }
 0x786   : > { %v4099_v7 = vpop.f32.mrf.mxu3 }
 0x787   : > { %v4279_v55 = vadd.f32 %v4247_v2, %v9266_v23  ;;  %v4054_v13 = vpop.f32.mrf.mxu1  ;;  %v8370_v21 = vadd.f32 %v8061_v63, %v4099_v7  ;;  %v9273_v2 = vld [vmem:[#allocation11_spill] sm:$0xff] }
 0x788   : > { %v8268_v17 = vadd.f32 %v8061_v63, %v4054_v13 }
 0x789   : > { %4311 = vst.msk [vmem:[%s8231_s25 + $0x10] sm:$0xff] %vm225_vm0, %v4279_v55 }
 0x78a   : > { %4171 = vrot.lane.b32.xlu0 %v8268_v17, %s4579_s13 }
 0x78d   : > { %v4156_v8 = vpop.permute.xlu1 %4155 }
 0x78e   : > { %v4248_v37 = vmax.f32 %v8159_v38, %v4156_v8  ;;  %v8289_v38 = vadd.f32 %v8061_v63, %v4069_v19  ;;  %v4102_v40 = vpop.f32.mrf.mxu3  ;;  %v9274_v8 = vld [vmem:[#allocation16_spill] sm:$0xff] }
 0x78f   : > { %v8391_v50 = vadd.f32 %v8061_v63, %v4102_v40 }
 0x790   : > { %v4280_v60 = vadd.f32 %v4248_v37, %v9267_v27  ;;  %v4057_v26 = vpop.f32.mrf.mxu1 }
 0x791   : > { %v8277_v39 = vadd.f32 %v8061_v63, %v4057_v26  ;;  %v9275_v26 = vld [vmem:[#allocation15_spill] sm:$0xff] }
 0x792   : > { %4312 = vst.msk [vmem:[%s8231_s25 + $0x18] sm:$0xff] %vm225_vm0, %v4280_v60 }
 0x793   : > { %4173 = vrot.lane.b32.xlu1 %v8277_v39, %s4579_s13 }
 0x796   : > { %v4105_v9 = vpop.f32.mrf.mxu3 }
 0x797   : > { %v8340_v33 = vadd.f32 %v8061_v63, %v4105_v9 }
 0x798   : > { %v4060_v5 = vpop.f32.mrf.mxu1 }
 0x799   : > { %v8284_v20 = vadd.f32 %v8061_v63, %v4060_v5  ;;  %v9276_v5 = vld [vmem:[#allocation19_spill] sm:$0xff] }
 0x79b   : > { %4175 = vrot.lane.b32.xlu2 %v8284_v20, %s4579_s13 }
 0x79f   : > { %v4108_v49 = vpop.f32.mrf.mxu3 }
 0x7a0   : > { %v8386_v51 = vadd.f32 %v8061_v63, %v4108_v49 }
 0x7a3   : > { %4181 = vrot.lane.b32.xlu2 %v8289_v38, %s4579_s13 }
 0x7a5   : > { %v4164_v15 = vpop.permute.xlu2 %4163 }
 0x7a6   : > { %v4252_v54 = vmax.f32 %v4043_v3, %v4164_v15  ;;  %v9270_v3 = vld [vmem:[#allocation8_spill] sm:$0xff] }
 0x7a8   : > { %v4284_v57 = vadd.f32 %v4252_v54, %v9268_v53 }
 0x7aa   : > { %4316 = vst.msk [vmem:[%s8231_s25 + $0x38] sm:$0xff] %vm225_vm0, %v4284_v57 }
 0x7ab   : > { %4187 = vrot.lane.b32.xlu2 %v8295_v11, %s4579_s13 }
 0x7ac   : > { %v4160_v30 = vpop.permute.xlu0 %4159 }
 0x7ad   : > { %v4250_v32 = vmax.f32 %v8206_v24, %v4160_v30 }
 0x7af   : > { %v4282_v62 = vadd.f32 %v4250_v32, %v9269_v61  ;;  %v4063_v59 = vpop.f32.mrf.mxu1  ;;  %v9279_v32 = vld [vmem:[#allocation25_spill] sm:$0xff] }
 0x7b0   : > { %v8304_v56 = vadd.f32 %v8061_v63, %v4063_v59 }
 0x7b1   : > { %4314 = vst.msk [vmem:[%s8231_s25 + $0x28] sm:$0xff] %vm225_vm0, %v4282_v62  ;;  %v9280_v62 = vld [vmem:[#allocation28_spill] sm:$0xff] }
 0x7b2   : > { %4177 = vrot.lane.b32.xlu0 %v8304_v56, %s4579_s13 }
 0x7b3   : > { %4193 = vrot.lane.b32.xlu2 %v8307_v10, %s4579_s13 }
 0x7b5   : > { %v4162_v19 = vpop.permute.xlu1 %4161 }
 0x7b6   : > { %v4251_v24 = vmax.f32 %v8215_v41, %v4162_v19  ;;  %v4111_v41 = vpop.f32.mrf.mxu3 }
 0x7b7   : > { %v8400_v55 = vadd.f32 %v8061_v63, %v4111_v41 }
 0x7b8   : > { %v4283_v18 = vadd.f32 %v4251_v24, %v9270_v3  ;;  %v9281_v24 = vld [vmem:[#allocation31_spill] sm:$0xff] }
 0x7b9   : > { %v4066_v6 = vpop.f32.mrf.mxu1 }
 0x7ba   : > { %4315 = vst.msk [vmem:[%s8231_s25 + $0x30] sm:$0xff] %vm225_vm0, %v4283_v18  ;;  %v8327_v1 = vadd.f32 %v8061_v63, %v4066_v6  ;;  %4183 = vrot.lane.b32.xlu0 %v8318_v4, %s4579_s13 }
 0x7bb   : > { %4199 = vrot.lane.b32.xlu2 %v8322_v45, %s4579_s13 }
 0x7bc   : > { %4179 = vrot.lane.b32.xlu1 %v8327_v1, %s4579_s13 }
 0x7be   : > { %v4114_v16 = vpop.f32.mrf.mxu3 }
 0x7bf   : > { %v8356_v36 = vadd.f32 %v8061_v63, %v4114_v16 }
 0x7c2   : > { %4189 = vrot.lane.b32.xlu0 %v8337_v52, %s4579_s13 }
 0x7c3   : > { %4205 = vrot.lane.b32.xlu2 %v8340_v33, %s4579_s13 }
 0x7c4   : > { %4185 = vrot.lane.b32.xlu1 %v8344_v43, %s4579_s13 }
 0x7ca   : > { %4195 = vrot.lane.b32.xlu0 %v8353_v34, %s4579_s13 }
 0x7cb   : > { %4211 = vrot.lane.b32.xlu2 %v8356_v36, %s4579_s13 }
 0x7cc   : > { %4191 = vrot.lane.b32.xlu1 %v8360_v31, %s4579_s13 }
 0x7cd   : > { %v4170_v48 = vpop.permute.xlu2 %4169 }
 0x7ce   : > { %v4255_v28 = vmax.f32 %v8255_v35, %v4170_v48  ;;  %v9283_v48 = vld [vmem:[#allocation87_spill] sm:$0xff] }
 0x7d0   : > { %v4287_v22 = vadd.f32 %v4255_v28, %v9271_v12 }
 0x7d2   : > { %4319 = vst.msk [vmem:[%s8231_s25 + $0x50] sm:$0xff] %vm225_vm0, %v4287_v22  ;;  %4201 = vrot.lane.b32.xlu0 %v8370_v21, %s4579_s13 }
 0x7d4   : > { %4197 = vrot.lane.b32.xlu1 %v8375_v14, %s4579_s13  ;;  %v4166_v44 = vpop.permute.xlu0 %4165 }
 0x7d5   : > { %v4253_v35 = vmax.f32 %v8237_v47, %v4166_v44  ;;  %v9284_v44 = vld [vmem:[#allocation21_spill] sm:$0xff] }
 0x7d7   : > { %v4285_v42 = vadd.f32 %v4253_v35, %v9272_v58 }
 0x7d9   : > { %4317 = vst.msk [vmem:[%s8231_s25 + $0x40] sm:$0xff] %vm225_vm0, %v4285_v42 }
 0x7da   : > { %4207 = vrot.lane.b32.xlu0 %v8386_v51, %s4579_s13 }
 0x7dc   : > { %4203 = vrot.lane.b32.xlu1 %v8391_v50, %s4579_s13 }
 0x7dd   : > { %v4168_v25 = vpop.permute.xlu1 %4167 }
 0x7de   : > { %v4254_v47 = vmax.f32 %v8246_v29, %v4168_v25 }
 0x7e0   : > { %v4286_v23 = vadd.f32 %v4254_v47, %v9273_v2  ;;  %v9286_v2 = vld [vmem:[#allocation24_spill] sm:$0xff] }
 0x7e2   : > { %4318 = vst.msk [vmem:[%s8231_s25 + $0x48] sm:$0xff] %vm225_vm0, %v4286_v23 }
 0x7e4   : > { %4209 = vrot.lane.b32.xlu1 %v8400_v55, %s4579_s13 }
 0x7f5   : > { %v4176_v13 = vpop.permute.xlu2 %4175 }
 0x7f6   : > { %v4258_v0 = vmax.f32 %v8284_v20, %v4176_v13  ;;  %v9287_v13 = vld [vmem:[#allocation20_spill] sm:$0xff] }
 0x7f8   : > { %v4290_v37 = vadd.f32 %v4258_v0, %v9274_v8 }
 0x7fa   : > { %4322 = vst.msk [vmem:[%s8231_s25 + $0x68] sm:$0xff] %vm225_vm0, %v4290_v37 }
 0x7fc   : > { %v4172_v29 = vpop.permute.xlu0 %4171 }
 0x7fd   : > { %v4256_v27 = vmax.f32 %v8268_v17, %v4172_v29  ;;  %v4182_v60 = vpop.permute.xlu2 %4181  ;;  %v9277_v17 = vld [vmem:[#allocation14_spill] sm:$0xff]  ;;  %v9288_v29 = vld [vmem:[#allocation27_spill] sm:$0xff] }
 0x7fe   : > { %v4261_v63 = vmax.f32 %v8289_v38, %v4182_v60  ;;  %v9278_v38 = vld [vmem:[#allocation22_spill] sm:$0xff]  ;;  %v9289_v60 = vld [vmem:[#allocation23_spill] sm:$0xff] }
 0x7ff   : > { %v4288_v46 = vadd.f32 %v4256_v27, %v9275_v26 }
 0x800   : > { %v4293_v7 = vadd.f32 %v4261_v63, %v9276_v5  ;;  %v9290_v5 = vld [vmem:[#allocation30_spill] sm:$0xff] }
 0x801   : > { %4320 = vst.msk [vmem:[%s8231_s25 + $0x58] sm:$0xff] %vm225_vm0, %v4288_v46 }
 0x802   : > { %4325 = vst.msk [vmem:[%s8231_s25 + $0x80] sm:$0xff] %vm225_vm0, %v4293_v7 }
 0x805   : > { %v4174_v20 = vpop.permute.xlu1 %4173  ;;  %v4188_v40 = vpop.permute.xlu2 %4187 }
 0x806   : > { %v4257_v15 = vmax.f32 %v8277_v39, %v4174_v20  ;;  %v4264_v54 = vmax.f32 %v8295_v11, %v4188_v40 }
 0x808   : > { %v4289_v53 = vadd.f32 %v4257_v15, %v9277_v17  ;;  %v4296_v57 = vadd.f32 %v4264_v54, %v9278_v38  ;;  %v9292_v17 = vld [vmem:[#allocation32_spill] sm:$0xff]  ;;  %v9293_v38 = vld [vmem:[#allocation29_spill] sm:$0xff] }
 0x80a   : > { %4321 = vst.msk [vmem:[%s8231_s25 + $0x60] sm:$0xff] %vm225_vm0, %v4289_v53 }
 0x80b   : > { %4328 = vst.msk [vmem:[%s8231_s25 + $0x98] sm:$0xff] %vm225_vm0, %v4296_v57 }
 0x80d   : > { %v4194_v9 = vpop.permute.xlu2 %4193 }
 0x80e   : > { %v4267_v30 = vmax.f32 %v8307_v10, %v4194_v9 }
 0x810   : > { %v4299_v61 = vadd.f32 %v4267_v30, %v9279_v32  ;;  %v9294_v30 = vld [vmem:[#allocation86_spill] sm:$0xff] }
 0x812   : > { %4331 = vst.msk [vmem:[%s8231_s25 + $0xb0] sm:$0xff] %vm225_vm0, %v4299_v61 }
 0x815   : > { %v4200_v39 = vpop.permute.xlu2 %4199 }
 0x816   : > { %v4270_v11 = vmax.f32 %v8322_v45, %v4200_v39  ;;  %v9282_v45 = vld [vmem:[#allocation18_spill] sm:$0xff] }
 0x818   : > { %v4302_v59 = vadd.f32 %v4270_v11, %v9280_v62 }
 0x81a   : > { %4334 = vst.msk [vmem:[%s8231_s25 + $0xc8] sm:$0xff] %vm225_vm0, %v4302_v59 }
 0x81d   : > { %v4206_v49 = vpop.permute.xlu2 %4205 }
 0x81e   : > { %v4273_v19 = vmax.f32 %v8340_v33, %v4206_v49 }
 0x820   : > { %v4305_v3 = vadd.f32 %v4273_v19, %v9281_v24 }
 0x822   : > { %4337 = vst.msk [vmem:[%s8231_s25 + $0xe0] sm:$0xff] %vm225_vm0, %v4305_v3 }
 0x824   : > { %v4178_v10 = vpop.permute.xlu0 %4177 }
 0x825   : > { %v4259_v18 = vmax.f32 %v8304_v56, %v4178_v10  ;;  %v4212_v6 = vpop.permute.xlu2 %4211 }
 0x826   : > { %v4276_v41 = vmax.f32 %v8356_v36, %v4212_v6  ;;  %v9285_v36 = vld [vmem:[#allocation17_spill] sm:$0xff] }
 0x827   : > { %v4291_v16 = vadd.f32 %v4259_v18, %v9282_v45 }
 0x828   : > { %v4308_v28 = vadd.f32 %v4276_v41, %v9283_v48 }
 0x829   : > { %4323 = vst.msk [vmem:[%s8231_s25 + $0x70] sm:$0xff] %vm225_vm0, %v4291_v16 }
 0x82a   : > { %4340 = vst.msk [vmem:[%s8231_s25 + $0xf8] sm:$0xff] %vm225_vm0, %v4308_v28 }
 0x82c   : > { %v4184_v33 = vpop.permute.xlu0 %4183 }
 0x82d   : > { %v4262_v12 = vmax.f32 %v8318_v4, %v4184_v33 }
 0x82e   : > { %v4180_v22 = vpop.permute.xlu1 %4179 }
 0x82f   : > { %v4294_v35 = vadd.f32 %v4262_v12, %v9284_v44  ;;  %v4260_v56 = vmax.f32 %v8327_v1, %v4180_v22 }
 0x831   : > { %4326 = vst.msk [vmem:[%s8231_s25 + $0x88] sm:$0xff] %vm225_vm0, %v4294_v35  ;;  %v4292_v58 = vadd.f32 %v4260_v56, %v9285_v36 }
 0x833   : > { %4324 = vst.msk [vmem:[%s8231_s25 + $0x78] sm:$0xff] %vm225_vm0, %v4292_v58 }
 0x834   : > { %v4190_v42 = vpop.permute.xlu0 %4189 }
 0x835   : > { %v4265_v25 = vmax.f32 %v8337_v52, %v4190_v42 }
 0x836   : > { %v4186_v47 = vpop.permute.xlu1 %4185 }
 0x837   : > { %v4297_v23 = vadd.f32 %v4265_v25, %v9286_v2  ;;  %v4263_v4 = vmax.f32 %v8344_v43, %v4186_v47 }
 0x839   : > { %4329 = vst.msk [vmem:[%s8231_s25 + $0xa0] sm:$0xff] %vm225_vm0, %v4297_v23  ;;  %v4295_v1 = vadd.f32 %v4263_v4, %v9287_v13 }
 0x83b   : > { %4327 = vst.msk [vmem:[%s8231_s25 + $0x90] sm:$0xff] %vm225_vm0, %v4295_v1 }
 0x83c   : > { %v4196_v0 = vpop.permute.xlu0 %4195 }
 0x83d   : > { %v4268_v8 = vmax.f32 %v8353_v34, %v4196_v0 }
 0x83e   : > { %v4192_v37 = vpop.permute.xlu1 %4191 }
 0x83f   : > { %v4300_v27 = vadd.f32 %v4268_v8, %v9288_v29  ;;  %v4266_v52 = vmax.f32 %v8360_v31, %v4192_v37  ;;  %v9291_v31 = vld [vmem:[#allocation26_spill] sm:$0xff] }
 0x841   : > { %4332 = vst.msk [vmem:[%s8231_s25 + $0xb8] sm:$0xff] %vm225_vm0, %v4300_v27  ;;  %v4298_v43 = vadd.f32 %v4266_v52, %v9289_v60 }
 0x843   : > { %4330 = vst.msk [vmem:[%s8231_s25 + $0xa8] sm:$0xff] %vm225_vm0, %v4298_v43 }
 0x844   : > { %v4202_v63 = vpop.permute.xlu0 %4201 }
 0x845   : > { %v4271_v26 = vmax.f32 %v8370_v21, %v4202_v63 }
 0x846   : > { %v4198_v46 = vpop.permute.xlu1 %4197 }
 0x847   : > { %v4303_v7 = vadd.f32 %v4271_v26, %v9290_v5  ;;  %v4269_v34 = vmax.f32 %v8375_v14, %v4198_v46 }
 0x849   : > { %4335 = vst.msk [vmem:[%s8231_s25 + $0xd0] sm:$0xff] %vm225_vm0, %v4303_v7  ;;  %v4301_v20 = vadd.f32 %v4269_v34, %v9291_v31 }
 0x84b   : > { %4333 = vst.msk [vmem:[%s8231_s25 + $0xc0] sm:$0xff] %vm225_vm0, %v4301_v20 }
 0x84c   : > { %v4208_v40 = vpop.permute.xlu0 %4207 }
 0x84d   : > { %v4274_v15 = vmax.f32 %v8386_v51, %v4208_v40 }
 0x84e   : > { %v4204_v54 = vpop.permute.xlu1 %4203 }
 0x84f   : > { %v4306_v53 = vadd.f32 %v4274_v15, %v9292_v17  ;;  %v4272_v21 = vmax.f32 %v8391_v50, %v4204_v54 }
 0x851   : > { %4338 = vst.msk [vmem:[%s8231_s25 + $0xe8] sm:$0xff] %vm225_vm0, %v4306_v53  ;;  %v4304_v57 = vadd.f32 %v4272_v21, %v9293_v38 }
 0x853   : > { %4336 = vst.msk [vmem:[%s8231_s25 + $0xd8] sm:$0xff] %vm225_vm0, %v4304_v57 }
 0x856   : > { %v4210_v14 = vpop.permute.xlu1 %4209 }
 0x857   : > { %v4275_v9 = vmax.f32 %v8400_v55, %v4210_v14 }
 0x859   : > { %v4307_v32 = vadd.f32 %v4275_v9, %v9294_v30 }
 0x85b   : > { %4339 = vst.msk [vmem:[%s8231_s25 + $0xf0] sm:$0xff] %vm225_vm0, %v4307_v32 }
 0x85c PF: > { %s15_s18 = sadd.s32 1, %s4568_s18  }
 0x85d   : > { %p12_p4 = scmp.ge.s32.totalorder %s15_s18, 4  }
 0x85f   :  { %14 = sbr.rel (!%p12_p4) target bundleno = 1 (0x1), region = 73 }

</bundles_post_ra>
